<compile_context>
chip_gen: v6e
topology: v6e:2x2x1
jax: 0.10.0
libtpu: 0.0.40
codegen_flags: <defaults>
</compile_context>

<pallas_src>
import math
import jax
import jax.numpy as jnp
from jax.experimental import pallas as pl
from jax.experimental.pallas import tpu as pltpu

_VMEM = pl.BlockSpec(memory_space=pltpu.MemorySpace.VMEM)
LN_EPS = 1e-5


# ----------------------------- Pallas kernels -----------------------------

def fused_linear(x, w, b=None, *, ln=None, residual=None, activation=None,
                 out_dtype=jnp.bfloat16):
    """y = [LayerNorm](x) @ w + b  [QuickGELU]  [+ residual].

    x:[M,K]  w:[K,N]  b:[N]  residual:[M,N].
    Matmul operands are bf16 (MXU-native); accumulation, LN statistics and
    epilogue math stay f32 (v5e VPU/EUP have no bf16).  Tiled over (M, N).
    """
    M, K = x.shape
    N = w.shape[1]
    has_b = b is not None
    has_ln = ln is not None
    has_res = residual is not None

    # Conservative tile budget: (256, <=512) bf16 tiles + double buffering stay
    # well under v5e's 16 MiB scoped default and v7x's 64 MiB physical VMEM.
    tm = M if M <= 256 else 256
    Mp = ((M + tm - 1) // tm) * tm
    if N <= 512:
        tn = N
    elif N % 512 == 0:
        tn = 512
    elif N % 256 == 0:
        tn = 256
    elif N % 128 == 0:
        tn = 128
    else:
        tn = N

    xp = x.astype(jnp.bfloat16)
    if Mp != M:
        xp = jnp.pad(xp, ((0, Mp - M), (0, 0)))

    def kernel(x_ref, w_ref, *rest):
        rest = list(rest)
        o_ref = rest.pop()                     # output ref is last
        idx = 0
        b_ref = g_ref = be_ref = r_ref = None
        if has_b:
            b_ref = rest[idx]; idx += 1
        if has_ln:
            g_ref = rest[idx]; be_ref = rest[idx + 1]; idx += 2
        if has_res:
            r_ref = rest[idx]; idx += 1

        xv = x_ref[...].astype(jnp.float32)
        if has_ln:                             # fused LayerNorm prologue (f32)
            mu = jnp.mean(xv, axis=-1, keepdims=True)
            var = jnp.mean(jnp.square(xv - mu), axis=-1, keepdims=True)
            xv = (xv - mu) * jax.lax.rsqrt(var + LN_EPS) * g_ref[...] + be_ref[...]
        acc = jnp.dot(xv.astype(jnp.bfloat16), w_ref[...],
                      preferred_element_type=jnp.float32)
        if has_b:
            acc = acc + b_ref[...]
        if activation == "quickgelu":          # CLIP QuickGELU: x*sigmoid(1.702x)
            acc = acc * jax.nn.sigmoid(1.702 * acc)
        if has_res:                            # fused residual add epilogue
            acc = acc + r_ref[...].astype(jnp.float32)
        o_ref[...] = acc.astype(o_ref.dtype)

    in_specs = [pl.BlockSpec((tm, K), lambda i, j: (i, 0)),
                pl.BlockSpec((K, tn), lambda i, j: (0, j))]
    operands = [xp, w.astype(jnp.bfloat16)]
    if has_b:
        in_specs.append(pl.BlockSpec((1, tn), lambda i, j: (0, j)))
        operands.append(b.reshape(1, N).astype(jnp.float32))
    if has_ln:
        g, be = ln
        in_specs += [pl.BlockSpec((1, K), lambda i, j: (0, 0)),
                     pl.BlockSpec((1, K), lambda i, j: (0, 0))]
        operands += [g.reshape(1, K).astype(jnp.float32),
                     be.reshape(1, K).astype(jnp.float32)]
    if has_res:
        rp = residual.astype(jnp.bfloat16)
        if Mp != M:
            rp = jnp.pad(rp, ((0, Mp - M), (0, 0)))
        in_specs.append(pl.BlockSpec((tm, tn), lambda i, j: (i, j)))
        operands.append(rp)

    out = pl.pallas_call(
        kernel,
        out_shape=jax.ShapeDtypeStruct((Mp, N), out_dtype),
        grid=(Mp // tm, N // tn),
        in_specs=in_specs,
        out_specs=pl.BlockSpec((tm, tn), lambda i, j: (i, j)),
        compiler_params=pltpu.CompilerParams(
            dimension_semantics=("parallel", "parallel")),
    )(*operands)
    return out[:M] if Mp != M else out


def layernorm(x, gamma, beta, out_dtype=jnp.bfloat16):
    """Standalone row-wise LayerNorm (only used for ln_pre).  x:[M,D]."""
    M, D = x.shape
    tm = M if M <= 256 else 256
    Mp = ((M + tm - 1) // tm) * tm
    xp = x.astype(jnp.bfloat16)
    if Mp != M:
        xp = jnp.pad(xp, ((0, Mp - M), (0, 0)))

    def kernel(x_ref, g_ref, b_ref, o_ref):
        xv = x_ref[...].astype(jnp.float32)
        mu = jnp.mean(xv, axis=-1, keepdims=True)
        var = jnp.mean(jnp.square(xv - mu), axis=-1, keepdims=True)
        o_ref[...] = ((xv - mu) * jax.lax.rsqrt(var + LN_EPS) * g_ref[...]
                      + b_ref[...]).astype(o_ref.dtype)

    out = pl.pallas_call(
        kernel,
        out_shape=jax.ShapeDtypeStruct((Mp, D), out_dtype),
        grid=(Mp // tm,),
        in_specs=[pl.BlockSpec((tm, D), lambda i: (i, 0)),
                  pl.BlockSpec((1, D), lambda i: (0, 0)),
                  pl.BlockSpec((1, D), lambda i: (0, 0))],
        out_specs=pl.BlockSpec((tm, D), lambda i: (i, 0)),
        compiler_params=pltpu.CompilerParams(dimension_semantics=("parallel",)),
    )(xp, gamma.reshape(1, D).astype(jnp.float32),
      beta.reshape(1, D).astype(jnp.float32))
    return out[:M] if Mp != M else out


def mha_attention(qkv, heads, causal):
    """Multi-head attention.  qkv:[Nb, L, 3*D] -> [Nb, L, D].

    Gridded over the batch axis; head split/merge done in-kernel so the output
    is written lane-dense as [L, heads*Dh] instead of [BH, L, Dh].
    """
    Nb, L, threeD = qkv.shape
    D = threeD // 3
    Dh = D // heads
    scale = 1.0 / math.sqrt(Dh)
    # TODO(synk): for long sequences switch to an online-softmax (flash) loop
    # over KV tiles; at CLIP's L<=257 the full per-head [L, L] scores fit VMEM.

    def kernel(qkv_ref, o_ref):
        qb = qkv_ref[0]                                            # [L, 3D] bf16
        if causal:
            row = jax.lax.broadcasted_iota(jnp.int32, (L, L), 0)
            col = jax.lax.broadcasted_iota(jnp.int32, (L, L), 1)
            mask = col <= row
        outs = []
        for h in range(heads):
            # fold 1/sqrt(Dh) into q: O(L*Dh) VPU work instead of O(L*L)
            q = (qb[:, h * Dh:(h + 1) * Dh].astype(jnp.float32) * scale
                 ).astype(jnp.bfloat16)
            k = qb[:, D + h * Dh:D + (h + 1) * Dh]
            v = qb[:, 2 * D + h * Dh:2 * D + (h + 1) * Dh]
            s = jax.lax.dot_general(q, k, (((1,), (1,)), ((), ())),
                                    preferred_element_type=jnp.float32)  # [L,L]
            if causal:
                s = jnp.where(mask, s, -1e30)
            s = s - jnp.max(s, axis=-1, keepdims=True)
            p = jnp.exp(s)
            p = p * pl.reciprocal(jnp.sum(p, axis=-1, keepdims=True), approx=True)
            outs.append(jnp.dot(p.astype(jnp.bfloat16), v,
                                preferred_element_type=jnp.float32))     # [L,Dh]
        o_ref[0] = jnp.concatenate(outs, axis=-1).astype(o_ref.dtype)    # [L,D]

    return pl.pallas_call(
        kernel,
        out_shape=jax.ShapeDtypeStruct((Nb, L, D), jnp.bfloat16),
        grid=(Nb,),
        in_specs=[pl.BlockSpec((1, L, threeD), lambda b: (b, 0, 0))],
        out_specs=pl.BlockSpec((1, L, D), lambda b: (b, 0, 0)),
        compiler_params=pltpu.CompilerParams(dimension_semantics=("parallel",)),
    )(qkv.astype(jnp.bfloat16))


def clip_logits(img_feat, txt_feat, logit_scale):
    """logits = exp(logit_scale) * img_feat @ normalize(txt_feat).T

    NOTE: image features are intentionally NOT normalized — this matches the
    reference CustomCLIP.forward, which only normalizes text_features2.
    """
    B, E = img_feat.shape
    C = txt_feat.shape[0]

    def kernel(img_ref, txt_ref, ls_ref, o_ref):
        t = txt_ref[...].astype(jnp.float32)
        t = t * jax.lax.rsqrt(jnp.sum(t * t, axis=-1, keepdims=True))
        logits = jax.lax.dot_general(img_ref[...].astype(jnp.bfloat16),
                                     t.astype(jnp.bfloat16),
                                     (((1,), (1,)), ((), ())),
                                     preferred_element_type=jnp.float32)
        o_ref[...] = jnp.exp(ls_ref[0, 0]) * logits

    # TODO(synk): for large class counts pad C to a multiple of 128 for
    # lane-dense stores; negligible at this toy size.
    return pl.pallas_call(
        kernel,
        out_shape=jax.ShapeDtypeStruct((B, C), jnp.float32),
        in_specs=[_VMEM, _VMEM, _VMEM],
        out_specs=_VMEM,
    )(img_feat.astype(jnp.float32), txt_feat.astype(jnp.float32),
      logit_scale.reshape(1, 1).astype(jnp.float32))


# ------------------------- model building blocks --------------------------

def residual_attention_block(x, p, Nb, L, heads, causal):
    """CLIP ResidualAttentionBlock.  x:[Nb*L, D] bf16 (batch-major rows)."""
    D = x.shape[-1]
    # LN1 fused into the QKV projection
    qkv = fused_linear(x, p['attn_in_w'], p['attn_in_b'],
                       ln=(p['ln1_w'], p['ln1_b']))                # [Nb*L, 3D]
    attn = mha_attention(qkv.reshape(Nb, L, 3 * D), heads, causal) # [Nb, L, D]
    # output projection with the residual add fused into its epilogue
    x = fused_linear(attn.reshape(Nb * L, D), p['attn_out_w'], p['attn_out_b'],
                     residual=x)
    # LN2 + MLP fc (+QuickGELU) fused; proj with residual fused
    h = fused_linear(x, p['mlp_fc_w'], p['mlp_fc_b'],
                     ln=(p['ln2_w'], p['ln2_b']), activation='quickgelu')
    x = fused_linear(h, p['mlp_proj_w'], p['mlp_proj_b'], residual=x)
    return x


def image_encoder(image, vp, cfg):
    """ViT-style CLIP visual encoder.  image:[B, 3, H, W] (NCHW)."""
    B, C, H, W = image.shape
    ps = cfg['patch']
    width = cfg['vision_width']
    gh, gw = H // ps, W // ps
    P = gh * gw
    L = P + 1

    # patchify: conv(stride=kernel=patch) == matmul over flattened patches
    patches = image.reshape(B, C, gh, ps, gw, ps).transpose(0, 2, 4, 1, 3, 5)
    patches = patches.reshape(B * P, C * ps * ps)
    x = fused_linear(patches, vp['conv_w'])                        # [B*P, width]
    x = x.reshape(B, P, width).astype(jnp.float32)

    cls = jnp.broadcast_to(vp['class_emb'].reshape(1, 1, width), (B, 1, width))
    x = jnp.concatenate([cls, x], axis=1) + vp['pos_emb'][None]    # [B, L, width]
    x = layernorm(x.reshape(B * L, width), vp['ln_pre_w'], vp['ln_pre_b'])

    # residual stream kept flattened [B*L, width] in batch-major (NLD) order
    for blk in vp['blocks']:
        x = residual_attention_block(x, blk, B, L, cfg['vision_heads'],
                                     causal=False)

    tokens = x.reshape(B, L, width)
    cls_tok = tokens[:, 0, :]                                      # [B, width]
    # ln_post + visual projection fused into one kernel
    pooled = fused_linear(cls_tok, vp['proj'],
                          ln=(vp['ln_post_w'], vp['ln_post_b']),
                          out_dtype=jnp.float32)
    # TODO(synk): the reference clip_model.visual returns a tuple and CustomCLIP
    # takes index [1]; we mirror that with (token features, pooled features).
    return tokens, pooled


def prompt_learner_forward(plp):
    """class_token_position == 'end': cat([prefix, ctx, suffix], dim=1)."""
    ctx = plp['ctx']                                               # [n_ctx, D]
    n_cls = plp['token_prefix'].shape[0]
    ctx = jnp.broadcast_to(ctx[None], (n_cls,) + ctx.shape)
    return jnp.concatenate([plp['token_prefix'], ctx, plp['token_suffix']], axis=1)


def text_encoder(prompts, tokenized_prompts, tp, cfg):
    """CLIP text transformer over pre-built prompt embeddings."""
    n_cls, L, D = prompts.shape
    x = (prompts + tp['pos_emb'][None]).reshape(n_cls * L, D).astype(jnp.bfloat16)
    for blk in tp['blocks']:
        x = residual_attention_block(x, blk, n_cls, L, cfg['text_heads'],
                                     causal=True)
    x = x.reshape(n_cls, L, D)
    eot = jnp.argmax(tokenized_prompts, axis=-1)                   # EOT position
    x_eot = x[jnp.arange(n_cls), eot]                              # [n_cls, D]
    # LayerNorm commutes with the per-row EOT gather -> fuse ln_final + proj
    return fused_linear(x_eot, tp['text_projection'],
                        ln=(tp['ln_final_w'], tp['ln_final_b']),
                        out_dtype=jnp.float32)


def custom_clip_forward(image, params, cfg):
    _, image_features = image_encoder(image.astype(jnp.float32),
                                      params['visual'], cfg)       # [B, embed]
    prompts = prompt_learner_forward(params['prompt_learner2'])
    text_features2 = text_encoder(prompts, params['tokenized_prompts2'],
                                  params['text'], cfg)
    # text normalization + logit_scale.exp() fused in the logits kernel
    return clip_logits(image_features, text_features2, params['logit_scale'])


# ------------------------------ param init --------------------------------

def _init_block(key, D):
    ks = jax.random.split(key, 4)
    f32, bf16 = jnp.float32, jnp.bfloat16
    return dict(
        ln1_w=jnp.ones((D,), f32), ln1_b=jnp.zeros((D,), f32),
        attn_in_w=(0.02 * jax.random.normal(ks[0], (D, 3 * D), f32)).astype(bf16),
        attn_in_b=jnp.zeros((3 * D,), f32),
        attn_out_w=(0.02 * jax.random.normal(ks[1], (D, D), f32)).astype(bf16),
        attn_out_b=jnp.zeros((D,), f32),
        ln2_w=jnp.ones((D,), f32), ln2_b=jnp.zeros((D,), f32),
        mlp_fc_w=(0.02 * jax.random.normal(ks[2], (D, 4 * D), f32)).astype(bf16),
        mlp_fc_b=jnp.zeros((4 * D,), f32),
        mlp_proj_w=(0.02 * jax.random.normal(ks[3], (4 * D, D), f32)).astype(bf16),
        mlp_proj_b=jnp.zeros((D,), f32),
    )


def init_params(key, cfg):
    f32, bf16 = jnp.float32, jnp.bfloat16
    keys = jax.random.split(key, 16)
    vw, tw, E = cfg['vision_width'], cfg['text_width'], cfg['embed_dim']
    ps, Ctx = cfg['patch'], cfg['context_length']
    P = (cfg['image_size'] // ps) ** 2

    visual = dict(
        conv_w=(0.02 * jax.random.normal(keys[0], (3 * ps * ps, vw), f32)).astype(bf16),
        class_emb=0.02 * jax.random.normal(keys[1], (vw,), f32),
        pos_emb=0.02 * jax.random.normal(keys[2], (P + 1, vw), f32),
        ln_pre_w=jnp.ones((vw,), f32), ln_pre_b=jnp.zeros((vw,), f32),
        ln_post_w=jnp.ones((vw,), f32), ln_post_b=jnp.zeros((vw,), f32),
        proj=(0.02 * jax.random.normal(keys[3], (vw, E), f32)).astype(bf16),
        blocks=[_init_block(k, vw)
                for k in jax.random.split(keys[4], cfg['vision_layers'])],
    )

    text = dict(
        pos_emb=0.02 * jax.random.normal(keys[5], (Ctx, tw), f32),
        ln_final_w=jnp.ones((tw,), f32), ln_final_b=jnp.zeros((tw,), f32),
        text_projection=(0.02 * jax.random.normal(keys[6], (tw, E), f32)).astype(bf16),
        blocks=[_init_block(k, tw)
                for k in jax.random.split(keys[7], cfg['text_layers'])],
    )

    # synthetic tokenizer output: SOT=1, ctx placeholders=2, name tokens, '.'=4,
    # EOT = vocab-1 (the max id, so argmax(-1) finds it), then zero padding.
    name_lens = [1, 2, 3][:cfg['n_cls']]
    rows = []
    for nl in name_lens:
        row = [1] + [2] * cfg['n_ctx'] + list(range(5, 5 + nl)) + [4] + [cfg['vocab'] - 1]
        row = row + [0] * (Ctx - len(row))
        rows.append(row)
    tokenized_prompts = jnp.array(rows, dtype=jnp.int32)           # [n_cls, Ctx]

    token_embedding = 0.02 * jax.random.normal(keys[8], (cfg['vocab'], tw), f32)
    embedding = token_embedding[tokenized_prompts]                 # [n_cls, Ctx, tw]

    prompt_learner2 = dict(
        ctx=0.02 * jax.random.normal(keys[9], (cfg['n_ctx'], tw), f32),
        token_prefix=embedding[:, :1, :],                          # SOT embedding
        token_suffix=embedding[:, 1 + cfg['n_ctx']:, :],           # name + EOT + pad
    )

    return dict(
        visual=visual,
        text=text,
        prompt_learner2=prompt_learner2,
        tokenized_prompts2=tokenized_prompts,
        logit_scale=jnp.array(math.log(1.0 / 0.07), f32),
    )


# --------------------------------- main ------------------------------------

if __name__ == "__main__":
    cfg = dict(
        image_size=32, patch=8,
        vision_width=64, vision_heads=4, vision_layers=2,
        text_width=64, text_heads=4, text_layers=2,
        embed_dim=64, context_length=16, n_ctx=4, n_cls=3, vocab=64,
    )

    key = jax.random.PRNGKey(0)
    k_img, k_params = jax.random.split(key)
    params = init_params(k_params, cfg)

    # layout: NCHW image input, matching the PyTorch module.
    image = jax.random.normal(k_img, (2, 3, cfg['image_size'], cfg['image_size']),
                              jnp.float32)

    fwd = jax.jit(lambda img, prm: custom_clip_forward(img, prm, cfg))
    logits2 = jax.block_until_ready(fwd(image, params))            # [B, n_cls]
    assert logits2.shape == (2, cfg['n_cls'])
    assert bool(jnp.all(jnp.isfinite(logits2)))
    print("KERNEL_OK")
</pallas_src>

<mosaic_0001>
module attributes {stable_mosaic.version = 11 : i64} {
  func.func @kernel(%arg0: i32, %arg1: i32, %arg2: memref<32x192xbf16, #tpu.memory_space<vmem>>, %arg3: memref<192x64xbf16, #tpu.memory_space<vmem>>, %arg4: memref<32x64xbf16, #tpu.memory_space<vmem>>) attributes {dimension_semantics = [#tpu.dimension_semantics<parallel>, #tpu.dimension_semantics<parallel>], iteration_bounds = array<i64: 1, 1>, scalar_prefetch = 0 : i64, scratch_operands = 0 : i64, tpu.core_type = #tpu.core_type<tc>, window_params = [{transform_indices = @transform_0, window_bounds = array<i64: 32, 192>}, {transform_indices = @transform_1, window_bounds = array<i64: 192, 64>}, {transform_indices = @transform_2, window_bounds = array<i64: 32, 64>}]} {
    %c0 = arith.constant 0 : index
    %c0_0 = arith.constant 0 : index
    %0 = vector.load %arg2[%c0, %c0_0] : memref<32x192xbf16, #tpu.memory_space<vmem>>, vector<32x192xbf16>
    %1 = arith.extf %0 : vector<32x192xbf16> to vector<32x192xf32>
    %2 = arith.truncf %1 : vector<32x192xf32> to vector<32x192xbf16>
    %c0_1 = arith.constant 0 : index
    %c0_2 = arith.constant 0 : index
    %3 = vector.load %arg3[%c0_1, %c0_2] : memref<192x64xbf16, #tpu.memory_space<vmem>>, vector<192x64xbf16>
    %cst = arith.constant dense<0.000000e+00> : vector<32x64xf32>
    %4 = tpu.matmul %2, %3, %cst {dimension_numbers = #tpu.dot_dimension_numbers<[1], [0], [0], [1], [0, 0, 1, 1], [], []>} : vector<32x192xbf16>, vector<192x64xbf16>, vector<32x64xf32> -> vector<32x64xf32>
    %5 = arith.truncf %4 : vector<32x64xf32> to vector<32x64xbf16>
    %c0_3 = arith.constant 0 : index
    %c0_4 = arith.constant 0 : index
    %6 = vector.load %arg4[%c0_3, %c0_4] : memref<32x64xbf16, #tpu.memory_space<vmem>>, vector<32x64xbf16>
    tpu.vector_store %arg4[%c0_3, %c0_4], %5 {strides = array<i32>} : memref<32x64xbf16, #tpu.memory_space<vmem>>, vector<32x64xbf16>,
    return
  }
  func.func @transform_0(%arg0: i32, %arg1: i32) -> (i32, i32) {
    %c0_i32 = arith.constant 0 : i32
    %c0_i32_0 = arith.constant 0 : i32
    return %arg0, %c0_i32 : i32, i32
  }
  func.func @transform_1(%arg0: i32, %arg1: i32) -> (i32, i32) {
    %c0_i32 = arith.constant 0 : i32
    %c0_i32_0 = arith.constant 0 : i32
    return %c0_i32, %arg1 : i32, i32
  }
  func.func @transform_2(%arg0: i32, %arg1: i32) -> (i32, i32) {
    %c0_i32 = arith.constant 0 : i32
    return %arg0, %arg1 : i32, i32
  }
}

module attributes {stable_mosaic.version = 11 : i64} {
  func.func @kernel(%arg0: i32, %arg1: memref<34x64xbf16, #tpu.memory_space<vmem>>, %arg2: memref<1x64xf32, #tpu.memory_space<vmem>>, %arg3: memref<1x64xf32, #tpu.memory_space<vmem>>, %arg4: memref<34x64xbf16, #tpu.memory_space<vmem>>) attributes {dimension_semantics = [#tpu.dimension_semantics<parallel>], iteration_bounds = array<i64: 1>, scalar_prefetch = 0 : i64, scratch_operands = 0 : i64, tpu.core_type = #tpu.core_type<tc>, window_params = [{transform_indices = @transform_0, window_bounds = array<i64: 34, 64>}, {pipeline_mode = #tpu.pipeline_mode<synchronous>, transform_indices = @transform_1, window_bounds = array<i64: 1, 64>}, {pipeline_mode = #tpu.pipeline_mode<synchronous>, transform_indices = @transform_2, window_bounds = array<i64: 1, 64>}, {transform_indices = @transform_3, window_bounds = array<i64: 34, 64>}]} {
    %c0 = arith.constant 0 : index
    %c0_0 = arith.constant 0 : index
    %0 = vector.load %arg1[%c0, %c0_0] : memref<34x64xbf16, #tpu.memory_space<vmem>>, vector<34x64xbf16>
    %1 = arith.extf %0 : vector<34x64xbf16> to vector<34x64xf32>
    %cst = arith.constant dense<0.000000e+00> : vector<34xf32>
    %2 = vector.multi_reduction <add>, %1, %cst [1] : vector<34x64xf32> to vector<34xf32>
    %3 = vector.shape_cast %2 : vector<34xf32> to vector<34x1xf32>
    %cst_1 = arith.constant 6.400000e+01 : f32
    %4 = vector.broadcast %cst_1 : f32 to vector<34x1xf32>
    %5 = arith.divf %3, %4 : vector<34x1xf32>
    %6 = vector.broadcast %5 : vector<34x1xf32> to vector<34x64xf32>
    %7 = arith.subf %1, %6 : vector<34x64xf32>
    %8 = arith.mulf %7, %7 : vector<34x64xf32>
    %cst_2 = arith.constant dense<0.000000e+00> : vector<34xf32>
    %9 = vector.multi_reduction <add>, %8, %cst_2 [1] : vector<34x64xf32> to vector<34xf32>
    %10 = vector.shape_cast %9 : vector<34xf32> to vector<34x1xf32>
    %cst_3 = arith.constant 6.400000e+01 : f32
    %11 = vector.broadcast %cst_3 : f32 to vector<34x1xf32>
    %12 = arith.divf %10, %11 : vector<34x1xf32>
    %13 = vector.broadcast %5 : vector<34x1xf32> to vector<34x64xf32>
    %14 = arith.subf %1, %13 : vector<34x64xf32>
    %cst_4 = arith.constant 9.99999974E-6 : f32
    %15 = vector.broadcast %cst_4 : f32 to vector<34x1xf32>
    %16 = arith.addf %12, %15 : vector<34x1xf32>
    %17 = math.rsqrt %16 : vector<34x1xf32>
    %18 = vector.broadcast %17 : vector<34x1xf32> to vector<34x64xf32>
    %19 = arith.mulf %14, %18 : vector<34x64xf32>
    %c0_5 = arith.constant 0 : index
    %c0_6 = arith.constant 0 : index
    %20 = vector.load %arg2[%c0_5, %c0_6] : memref<1x64xf32, #tpu.memory_space<vmem>>, vector<1x64xf32>
    %21 = vector.broadcast %20 : vector<1x64xf32> to vector<34x64xf32>
    %22 = arith.mulf %19, %21 : vector<34x64xf32>
    %c0_7 = arith.constant 0 : index
    %c0_8 = arith.constant 0 : index
    %23 = vector.load %arg3[%c0_7, %c0_8] : memref<1x64xf32, #tpu.memory_space<vmem>>, vector<1x64xf32>
    %24 = vector.broadcast %23 : vector<1x64xf32> to vector<34x64xf32>
    %25 = arith.addf %22, %24 : vector<34x64xf32>
    %26 = arith.truncf %25 : vector<34x64xf32> to vector<34x64xbf16>
    %c0_9 = arith.constant 0 : index
    %c0_10 = arith.constant 0 : index
    %27 = vector.load %arg4[%c0_9, %c0_10] : memref<34x64xbf16, #tpu.memory_space<vmem>>, vector<34x64xbf16>
    tpu.vector_store %arg4[%c0_9, %c0_10], %26 {strides = array<i32>} : memref<34x64xbf16, #tpu.memory_space<vmem>>, vector<34x64xbf16>,
    return
  }
  func.func @transform_0(%arg0: i32) -> (i32, i32) {
    %c0_i32 = arith.constant 0 : i32
    %c0_i32_0 = arith.constant 0 : i32
    return %arg0, %c0_i32 : i32, i32
  }
  func.func @transform_1(%arg0: i32) -> (i32, i32) {
    %c0_i32 = arith.constant 0 : i32
    %c0_i32_0 = arith.constant 0 : i32
    %c0_i32_1 = arith.constant 0 : i32
    return %c0_i32, %c0_i32_0 : i32, i32
  }
  func.func @transform_2(%arg0: i32) -> (i32, i32) {
    %c0_i32 = arith.constant 0 : i32
    %c0_i32_0 = arith.constant 0 : i32
    %c0_i32_1 = arith.constant 0 : i32
    return %c0_i32, %c0_i32_0 : i32, i32
  }
  func.func @transform_3(%arg0: i32) -> (i32, i32) {
    %c0_i32 = arith.constant 0 : i32
    %c0_i32_0 = arith.constant 0 : i32
    return %arg0, %c0_i32 : i32, i32
  }
}

module attributes {stable_mosaic.version = 11 : i64} {
  func.func @kernel(%arg0: i32, %arg1: i32, %arg2: memref<34x64xbf16, #tpu.memory_space<vmem>>, %arg3: memref<64x192xbf16, #tpu.memory_space<vmem>>, %arg4: memref<1x192xf32, #tpu.memory_space<vmem>>, %arg5: memref<1x64xf32, #tpu.memory_space<vmem>>, %arg6: memref<1x64xf32, #tpu.memory_space<vmem>>, %arg7: memref<34x192xbf16, #tpu.memory_space<vmem>>) attributes {dimension_semantics = [#tpu.dimension_semantics<parallel>, #tpu.dimension_semantics<parallel>], iteration_bounds = array<i64: 1, 1>, scalar_prefetch = 0 : i64, scratch_operands = 0 : i64, tpu.core_type = #tpu.core_type<tc>, window_params = [{transform_indices = @transform_0, window_bounds = array<i64: 34, 64>}, {transform_indices = @transform_1, window_bounds = array<i64: 64, 192>}, {transform_indices = @transform_2, window_bounds = array<i64: 1, 192>}, {pipeline_mode = #tpu.pipeline_mode<synchronous>, transform_indices = @transform_3, window_bounds = array<i64: 1, 64>}, {pipeline_mode = #tpu.pipeline_mode<synchronous>, transform_indices = @transform_4, window_bounds = array<i64: 1, 64>}, {transform_indices = @transform_5, window_bounds = array<i64: 34, 192>}]} {
    %c0 = arith.constant 0 : index
    %c0_0 = arith.constant 0 : index
    %0 = vector.load %arg2[%c0, %c0_0] : memref<34x64xbf16, #tpu.memory_space<vmem>>, vector<34x64xbf16>
    %1 = arith.extf %0 : vector<34x64xbf16> to vector<34x64xf32>
    %cst = arith.constant dense<0.000000e+00> : vector<34xf32>
    %2 = vector.multi_reduction <add>, %1, %cst [1] : vector<34x64xf32> to vector<34xf32>
    %3 = vector.shape_cast %2 : vector<34xf32> to vector<34x1xf32>
    %cst_1 = arith.constant 6.400000e+01 : f32
    %4 = vector.broadcast %cst_1 : f32 to vector<34x1xf32>
    %5 = arith.divf %3, %4 : vector<34x1xf32>
    %6 = vector.broadcast %5 : vector<34x1xf32> to vector<34x64xf32>
    %7 = arith.subf %1, %6 : vector<34x64xf32>
    %8 = arith.mulf %7, %7 : vector<34x64xf32>
    %cst_2 = arith.constant dense<0.000000e+00> : vector<34xf32>
    %9 = vector.multi_reduction <add>, %8, %cst_2 [1] : vector<34x64xf32> to vector<34xf32>
    %10 = vector.shape_cast %9 : vector<34xf32> to vector<34x1xf32>
    %cst_3 = arith.constant 6.400000e+01 : f32
    %11 = vector.broadcast %cst_3 : f32 to vector<34x1xf32>
    %12 = arith.divf %10, %11 : vector<34x1xf32>
    %13 = vector.broadcast %5 : vector<34x1xf32> to vector<34x64xf32>
    %14 = arith.subf %1, %13 : vector<34x64xf32>
    %cst_4 = arith.constant 9.99999974E-6 : f32
    %15 = vector.broadcast %cst_4 : f32 to vector<34x1xf32>
    %16 = arith.addf %12, %15 : vector<34x1xf32>
    %17 = math.rsqrt %16 : vector<34x1xf32>
    %18 = vector.broadcast %17 : vector<34x1xf32> to vector<34x64xf32>
    %19 = arith.mulf %14, %18 : vector<34x64xf32>
    %c0_5 = arith.constant 0 : index
    %c0_6 = arith.constant 0 : index
    %20 = vector.load %arg5[%c0_5, %c0_6] : memref<1x64xf32, #tpu.memory_space<vmem>>, vector<1x64xf32>
    %21 = vector.broadcast %20 : vector<1x64xf32> to vector<34x64xf32>
    %22 = arith.mulf %19, %21 : vector<34x64xf32>
    %c0_7 = arith.constant 0 : index
    %c0_8 = arith.constant 0 : index
    %23 = vector.load %arg6[%c0_7, %c0_8] : memref<1x64xf32, #tpu.memory_space<vmem>>, vector<1x64xf32>
    %24 = vector.broadcast %23 : vector<1x64xf32> to vector<34x64xf32>
    %25 = arith.addf %22, %24 : vector<34x64xf32>
    %26 = arith.truncf %25 : vector<34x64xf32> to vector<34x64xbf16>
    %c0_9 = arith.constant 0 : index
    %c0_10 = arith.constant 0 : index
    %27 = vector.load %arg3[%c0_9, %c0_10] : memref<64x192xbf16, #tpu.memory_space<vmem>>, vector<64x192xbf16>
    %cst_11 = arith.constant dense<0.000000e+00> : vector<34x192xf32>
    %28 = tpu.matmul %26, %27, %cst_11 {dimension_numbers = #tpu.dot_dimension_numbers<[1], [0], [0], [1], [0, 0, 1, 1], [], []>} : vector<34x64xbf16>, vector<64x192xbf16>, vector<34x192xf32> -> vector<34x192xf32>
    %c0_12 = arith.constant 0 : index
    %c0_13 = arith.constant 0 : index
    %29 = vector.load %arg4[%c0_12, %c0_13] : memref<1x192xf32, #tpu.memory_space<vmem>>, vector<1x192xf32>
    %30 = vector.broadcast %29 : vector<1x192xf32> to vector<34x192xf32>
    %31 = arith.addf %28, %30 : vector<34x192xf32>
    %32 = arith.truncf %31 : vector<34x192xf32> to vector<34x192xbf16>
    %c0_14 = arith.constant 0 : index
    %c0_15 = arith.constant 0 : index
    %33 = vector.load %arg7[%c0_14, %c0_15] : memref<34x192xbf16, #tpu.memory_space<vmem>>, vector<34x192xbf16>
    tpu.vector_store %arg7[%c0_14, %c0_15], %32 {strides = array<i32>} : memref<34x192xbf16, #tpu.memory_space<vmem>>, vector<34x192xbf16>,
    return
  }
  func.func @transform_0(%arg0: i32, %arg1: i32) -> (i32, i32) {
    %c0_i32 = arith.constant 0 : i32
    %c0_i32_0 = arith.constant 0 : i32
    return %arg0, %c0_i32 : i32, i32
  }
  func.func @transform_1(%arg0: i32, %arg1: i32) -> (i32, i32) {
    %c0_i32 = arith.constant 0 : i32
    %c0_i32_0 = arith.constant 0 : i32
    return %c0_i32, %arg1 : i32, i32
  }
  func.func @transform_2(%arg0: i32, %arg1: i32) -> (i32, i32) {
    %c0_i32 = arith.constant 0 : i32
    %c0_i32_0 = arith.constant 0 : i32
    return %c0_i32, %arg1 : i32, i32
  }
  func.func @transform_3(%arg0: i32, %arg1: i32) -> (i32, i32) {
    %c0_i32 = arith.constant 0 : i32
    %c0_i32_0 = arith.constant 0 : i32
    %c0_i32_1 = arith.constant 0 : i32
    return %c0_i32, %c0_i32_0 : i32, i32
  }
  func.func @transform_4(%arg0: i32, %arg1: i32) -> (i32, i32) {
    %c0_i32 = arith.constant 0 : i32
    %c0_i32_0 = arith.constant 0 : i32
    %c0_i32_1 = arith.constant 0 : i32
    return %c0_i32, %c0_i32_0 : i32, i32
  }
  func.func @transform_5(%arg0: i32, %arg1: i32) -> (i32, i32) {
    %c0_i32 = arith.constant 0 : i32
    return %arg0, %arg1 : i32, i32
  }
}

module attributes {stable_mosaic.version = 11 : i64} {
  func.func @kernel(%arg0: i32, %arg1: memref<1x17x192xbf16, #tpu.memory_space<vmem>>, %arg2: memref<1x17x64xbf16, #tpu.memory_space<vmem>>) attributes {dimension_semantics = [#tpu.dimension_semantics<parallel>], iteration_bounds = array<i64: 2>, scalar_prefetch = 0 : i64, scratch_operands = 0 : i64, tpu.core_type = #tpu.core_type<tc>, window_params = [{transform_indices = @transform_0, window_bounds = array<i64: 1, 17, 192>}, {transform_indices = @transform_1, window_bounds = array<i64: 1, 17, 64>}]} {
    %c0 = arith.constant 0 : index
    %c0_0 = arith.constant 0 : index
    %c0_1 = arith.constant 0 : index
    %0 = vector.load %arg1[%c0, %c0_0, %c0_1] : memref<1x17x192xbf16, #tpu.memory_space<vmem>>, vector<1x17x192xbf16>
    %1 = vector.shape_cast %0 : vector<1x17x192xbf16> to vector<17x192xbf16>
    %2 = vector.extract_strided_slice %1 {offsets = [0, 0], sizes = [17, 16], strides = [1, 1]} : vector<17x192xbf16> to vector<17x16xbf16>
    %3 = arith.extf %2 : vector<17x16xbf16> to vector<17x16xf32>
    %cst = arith.constant 2.500000e-01 : f32
    %4 = vector.broadcast %cst : f32 to vector<17x16xf32>
    %5 = arith.mulf %3, %4 : vector<17x16xf32>
    %6 = arith.truncf %5 : vector<17x16xf32> to vector<17x16xbf16>
    %7 = vector.extract_strided_slice %1 {offsets = [0, 64], sizes = [17, 16], strides = [1, 1]} : vector<17x192xbf16> to vector<17x16xbf16>
    %8 = vector.extract_strided_slice %1 {offsets = [0, 128], sizes = [17, 16], strides = [1, 1]} : vector<17x192xbf16> to vector<17x16xbf16>
    %cst_2 = arith.constant dense<0.000000e+00> : vector<17x17xf32>
    %9 = tpu.matmul %6, %7, %cst_2 {dimension_numbers = #tpu.dot_dimension_numbers<[1], [1], [0], [0], [0, 0, 1, 0], [], []>} : vector<17x16xbf16>, vector<17x16xbf16>, vector<17x17xf32> -> vector<17x17xf32>
    %cst_3 = arith.constant dense<0xFF800000> : vector<17xf32>
    %10 = vector.multi_reduction <maximumf>, %9, %cst_3 [1] : vector<17x17xf32> to vector<17xf32>
    %11 = vector.shape_cast %10 : vector<17xf32> to vector<17x1xf32>
    %12 = vector.broadcast %11 : vector<17x1xf32> to vector<17x17xf32>
    %13 = arith.subf %9, %12 : vector<17x17xf32>
    %14 = math.exp %13 : vector<17x17xf32>
    %cst_4 = arith.constant dense<0.000000e+00> : vector<17xf32>
    %15 = vector.multi_reduction <add>, %14, %cst_4 [1] : vector<17x17xf32> to vector<17xf32>
    %16 = vector.shape_cast %15 : vector<17xf32> to vector<17x1xf32>
    %17 = tpu.reciprocal %16 {approx = true} : vector<17x1xf32> -> vector<17x1xf32>
    %18 = vector.broadcast %17 : vector<17x1xf32> to vector<17x17xf32>
    %19 = arith.mulf %14, %18 : vector<17x17xf32>
    %20 = arith.truncf %19 : vector<17x17xf32> to vector<17x17xbf16>
    %cst_5 = arith.constant dense<0.000000e+00> : vector<17x16xf32>
    %21 = tpu.matmul %20, %8, %cst_5 {dimension_numbers = #tpu.dot_dimension_numbers<[1], [0], [0], [1], [0, 0, 1, 1], [], []>} : vector<17x17xbf16>, vector<17x16xbf16>, vector<17x16xf32> -> vector<17x16xf32>
    %22 = vector.extract_strided_slice %1 {offsets = [0, 16], sizes = [17, 16], strides = [1, 1]} : vector<17x192xbf16> to vector<17x16xbf16>
    %23 = arith.extf %22 : vector<17x16xbf16> to vector<17x16xf32>
    %cst_6 = arith.constant 2.500000e-01 : f32
    %24 = vector.broadcast %cst_6 : f32 to vector<17x16xf32>
    %25 = arith.mulf %23, %24 : vector<17x16xf32>
    %26 = arith.truncf %25 : vector<17x16xf32> to vector<17x16xbf16>
    %27 = vector.extract_strided_slice %1 {offsets = [0, 80], sizes = [17, 16], strides = [1, 1]} : vector<17x192xbf16> to vector<17x16xbf16>
    %28 = vector.extract_strided_slice %1 {offsets = [0, 144], sizes = [17, 16], strides = [1, 1]} : vector<17x192xbf16> to vector<17x16xbf16>
    %cst_7 = arith.constant dense<0.000000e+00> : vector<17x17xf32>
    %29 = tpu.matmul %26, %27, %cst_7 {dimension_numbers = #tpu.dot_dimension_numbers<[1], [1], [0], [0], [0, 0, 1, 0], [], []>} : vector<17x16xbf16>, vector<17x16xbf16>, vector<17x17xf32> -> vector<17x17xf32>
    %cst_8 = arith.constant dense<0xFF800000> : vector<17xf32>
    %30 = vector.multi_reduction <maximumf>, %29, %cst_8 [1] : vector<17x17xf32> to vector<17xf32>
    %31 = vector.shape_cast %30 : vector<17xf32> to vector<17x1xf32>
    %32 = vector.broadcast %31 : vector<17x1xf32> to vector<17x17xf32>
    %33 = arith.subf %29, %32 : vector<17x17xf32>
    %34 = math.exp %33 : vector<17x17xf32>
    %cst_9 = arith.constant dense<0.000000e+00> : vector<17xf32>
    %35 = vector.multi_reduction <add>, %34, %cst_9 [1] : vector<17x17xf32> to vector<17xf32>
    %36 = vector.shape_cast %35 : vector<17xf32> to vector<17x1xf32>
    %37 = tpu.reciprocal %36 {approx = true} : vector<17x1xf32> -> vector<17x1xf32>
    %38 = vector.broadcast %37 : vector<17x1xf32> to vector<17x17xf32>
    %39 = arith.mulf %34, %38 : vector<17x17xf32>
    %40 = arith.truncf %39 : vector<17x17xf32> to vector<17x17xbf16>
    %cst_10 = arith.constant dense<0.000000e+00> : vector<17x16xf32>
    %41 = tpu.matmul %40, %28, %cst_10 {dimension_numbers = #tpu.dot_dimension_numbers<[1], [0], [0], [1], [0, 0, 1, 1], [], []>} : vector<17x17xbf16>, vector<17x16xbf16>, vector<17x16xf32> -> vector<17x16xf32>
    %42 = vector.extract_strided_slice %1 {offsets = [0, 32], sizes = [17, 16], strides = [1, 1]} : vector<17x192xbf16> to vector<17x16xbf16>
    %43 = arith.extf %42 : vector<17x16xbf16> to vector<17x16xf32>
    %cst_11 = arith.constant 2.500000e-01 : f32
    %44 = vector.broadcast %cst_11 : f32 to vector<17x16xf32>
    %45 = arith.mulf %43, %44 : vector<17x16xf32>
    %46 = arith.truncf %45 : vector<17x16xf32> to vector<17x16xbf16>
    %47 = vector.extract_strided_slice %1 {offsets = [0, 96], sizes = [17, 16], strides = [1, 1]} : vector<17x192xbf16> to vector<17x16xbf16>
    %48 = vector.extract_strided_slice %1 {offsets = [0, 160], sizes = [17, 16], strides = [1, 1]} : vector<17x192xbf16> to vector<17x16xbf16>
    %cst_12 = arith.constant dense<0.000000e+00> : vector<17x17xf32>
    %49 = tpu.matmul %46, %47, %cst_12 {dimension_numbers = #tpu.dot_dimension_numbers<[1], [1], [0], [0], [0, 0, 1, 0], [], []>} : vector<17x16xbf16>, vector<17x16xbf16>, vector<17x17xf32> -> vector<17x17xf32>
    %cst_13 = arith.constant dense<0xFF800000> : vector<17xf32>
    %50 = vector.multi_reduction <maximumf>, %49, %cst_13 [1] : vector<17x17xf32> to vector<17xf32>
    %51 = vector.shape_cast %50 : vector<17xf32> to vector<17x1xf32>
    %52 = vector.broadcast %51 : vector<17x1xf32> to vector<17x17xf32>
    %53 = arith.subf %49, %52 : vector<17x17xf32>
    %54 = math.exp %53 : vector<17x17xf32>
    %cst_14 = arith.constant dense<0.000000e+00> : vector<17xf32>
    %55 = vector.multi_reduction <add>, %54, %cst_14 [1] : vector<17x17xf32> to vector<17xf32>
    %56 = vector.shape_cast %55 : vector<17xf32> to vector<17x1xf32>
    %57 = tpu.reciprocal %56 {approx = true} : vector<17x1xf32> -> vector<17x1xf32>
    %58 = vector.broadcast %57 : vector<17x1xf32> to vector<17x17xf32>
    %59 = arith.mulf %54, %58 : vector<17x17xf32>
    %60 = arith.truncf %59 : vector<17x17xf32> to vector<17x17xbf16>
    %cst_15 = arith.constant dense<0.000000e+00> : vector<17x16xf32>
    %61 = tpu.matmul %60, %48, %cst_15 {dimension_numbers = #tpu.dot_dimension_numbers<[1], [0], [0], [1], [0, 0, 1, 1], [], []>} : vector<17x17xbf16>, vector<17x16xbf16>, vector<17x16xf32> -> vector<17x16xf32>
    %62 = vector.extract_strided_slice %1 {offsets = [0, 48], sizes = [17, 16], strides = [1, 1]} : vector<17x192xbf16> to vector<17x16xbf16>
    %63 = arith.extf %62 : vector<17x16xbf16> to vector<17x16xf32>
    %cst_16 = arith.constant 2.500000e-01 : f32
    %64 = vector.broadcast %cst_16 : f32 to vector<17x16xf32>
    %65 = arith.mulf %63, %64 : vector<17x16xf32>
    %66 = arith.truncf %65 : vector<17x16xf32> to vector<17x16xbf16>
    %67 = vector.extract_strided_slice %1 {offsets = [0, 112], sizes = [17, 16], strides = [1, 1]} : vector<17x192xbf16> to vector<17x16xbf16>
    %68 = vector.extract_strided_slice %1 {offsets = [0, 176], sizes = [17, 16], strides = [1, 1]} : vector<17x192xbf16> to vector<17x16xbf16>
    %cst_17 = arith.constant dense<0.000000e+00> : vector<17x17xf32>
    %69 = tpu.matmul %66, %67, %cst_17 {dimension_numbers = #tpu.dot_dimension_numbers<[1], [1], [0], [0], [0, 0, 1, 0], [], []>} : vector<17x16xbf16>, vector<17x16xbf16>, vector<17x17xf32> -> vector<17x17xf32>
    %cst_18 = arith.constant dense<0xFF800000> : vector<17xf32>
    %70 = vector.multi_reduction <maximumf>, %69, %cst_18 [1] : vector<17x17xf32> to vector<17xf32>
    %71 = vector.shape_cast %70 : vector<17xf32> to vector<17x1xf32>
    %72 = vector.broadcast %71 : vector<17x1xf32> to vector<17x17xf32>
    %73 = arith.subf %69, %72 : vector<17x17xf32>
    %74 = math.exp %73 : vector<17x17xf32>
    %cst_19 = arith.constant dense<0.000000e+00> : vector<17xf32>
    %75 = vector.multi_reduction <add>, %74, %cst_19 [1] : vector<17x17xf32> to vector<17xf32>
    %76 = vector.shape_cast %75 : vector<17xf32> to vector<17x1xf32>
    %77 = tpu.reciprocal %76 {approx = true} : vector<17x1xf32> -> vector<17x1xf32>
    %78 = vector.broadcast %77 : vector<17x1xf32> to vector<17x17xf32>
    %79 = arith.mulf %74, %78 : vector<17x17xf32>
    %80 = arith.truncf %79 : vector<17x17xf32> to vector<17x17xbf16>
    %cst_20 = arith.constant dense<0.000000e+00> : vector<17x16xf32>
    %81 = tpu.matmul %80, %68, %cst_20 {dimension_numbers = #tpu.dot_dimension_numbers<[1], [0], [0], [1], [0, 0, 1, 1], [], []>} : vector<17x17xbf16>, vector<17x16xbf16>, vector<17x16xf32> -> vector<17x16xf32>
    %82 = tpu.concatenate %21, %41, %61, %81 in 1 : vector<17x16xf32>, vector<17x16xf32>, vector<17x16xf32>, vector<17x16xf32> -> vector<17x64xf32>
    %83 = arith.truncf %82 : vector<17x64xf32> to vector<17x64xbf16>
    %c0_21 = arith.constant 0 : index
    %c0_22 = arith.constant 0 : index
    %c0_23 = arith.constant 0 : index
    %84 = vector.load %arg2[%c0_21, %c0_22, %c0_23] : memref<1x17x64xbf16, #tpu.memory_space<vmem>>, vector<1x17x64xbf16>
    %85 = vector.shape_cast %84 : vector<1x17x64xbf16> to vector<17x64xbf16>
    %86 = vector.shape_cast %83 : vector<17x64xbf16> to vector<1x17x64xbf16>
    tpu.vector_store %arg2[%c0_21, %c0_22, %c0_23], %86 {strides = array<i32>} : memref<1x17x64xbf16, #tpu.memory_space<vmem>>, vector<1x17x64xbf16>,
    return
  }
  func.func @transform_0(%arg0: i32) -> (i32, i32, i32) {
    %c0_i32 = arith.constant 0 : i32
    %c0_i32_0 = arith.constant 0 : i32
    %c0_i32_1 = arith.constant 0 : i32
    return %arg0, %c0_i32, %c0_i32_0 : i32, i32, i32
  }
  func.func @transform_1(%arg0: i32) -> (i32, i32, i32) {
    %c0_i32 = arith.constant 0 : i32
    %c0_i32_0 = arith.constant 0 : i32
    %c0_i32_1 = arith.constant 0 : i32
    return %arg0, %c0_i32, %c0_i32_0 : i32, i32, i32
  }
}

module attributes {stable_mosaic.version = 11 : i64} {
  func.func @kernel(%arg0: i32, %arg1: i32, %arg2: memref<34x64xbf16, #tpu.memory_space<vmem>>, %arg3: memref<64x64xbf16, #tpu.memory_space<vmem>>, %arg4: memref<1x64xf32, #tpu.memory_space<vmem>>, %arg5: memref<34x64xbf16, #tpu.memory_space<vmem>>, %arg6: memref<34x64xbf16, #tpu.memory_space<vmem>>) attributes {dimension_semantics = [#tpu.dimension_semantics<parallel>, #tpu.dimension_semantics<parallel>], iteration_bounds = array<i64: 1, 1>, scalar_prefetch = 0 : i64, scratch_operands = 0 : i64, tpu.core_type = #tpu.core_type<tc>, window_params = [{transform_indices = @transform_0, window_bounds = array<i64: 34, 64>}, {transform_indices = @transform_1, window_bounds = array<i64: 64, 64>}, {transform_indices = @transform_2, window_bounds = array<i64: 1, 64>}, {transform_indices = @transform_3, window_bounds = array<i64: 34, 64>}, {transform_indices = @transform_4, window_bounds = array<i64: 34, 64>}]} {
    %c0 = arith.constant 0 : index
    %c0_0 = arith.constant 0 : index
    %0 = vector.load %arg2[%c0, %c0_0] : memref<34x64xbf16, #tpu.memory_space<vmem>>, vector<34x64xbf16>
    %1 = arith.extf %0 : vector<34x64xbf16> to vector<34x64xf32>
    %2 = arith.truncf %1 : vector<34x64xf32> to vector<34x64xbf16>
    %c0_1 = arith.constant 0 : index
    %c0_2 = arith.constant 0 : index
    %3 = vector.load %arg3[%c0_1, %c0_2] : memref<64x64xbf16, #tpu.memory_space<vmem>>, vector<64x64xbf16>
    %cst = arith.constant dense<0.000000e+00> : vector<34x64xf32>
    %4 = tpu.matmul %2, %3, %cst {dimension_numbers = #tpu.dot_dimension_numbers<[1], [0], [0], [1], [0, 0, 1, 1], [], []>} : vector<34x64xbf16>, vector<64x64xbf16>, vector<34x64xf32> -> vector<34x64xf32>
    %c0_3 = arith.constant 0 : index
    %c0_4 = arith.constant 0 : index
    %5 = vector.load %arg4[%c0_3, %c0_4] : memref<1x64xf32, #tpu.memory_space<vmem>>, vector<1x64xf32>
    %6 = vector.broadcast %5 : vector<1x64xf32> to vector<34x64xf32>
    %7 = arith.addf %4, %6 : vector<34x64xf32>
    %c0_5 = arith.constant 0 : index
    %c0_6 = arith.constant 0 : index
    %8 = vector.load %arg5[%c0_5, %c0_6] : memref<34x64xbf16, #tpu.memory_space<vmem>>, vector<34x64xbf16>
    %9 = arith.extf %8 : vector<34x64xbf16> to vector<34x64xf32>
    %10 = arith.addf %7, %9 : vector<34x64xf32>
    %11 = arith.truncf %10 : vector<34x64xf32> to vector<34x64xbf16>
    %c0_7 = arith.constant 0 : index
    %c0_8 = arith.constant 0 : index
    %12 = vector.load %arg6[%c0_7, %c0_8] : memref<34x64xbf16, #tpu.memory_space<vmem>>, vector<34x64xbf16>
    tpu.vector_store %arg6[%c0_7, %c0_8], %11 {strides = array<i32>} : memref<34x64xbf16, #tpu.memory_space<vmem>>, vector<34x64xbf16>,
    return
  }
  func.func @transform_0(%arg0: i32, %arg1: i32) -> (i32, i32) {
    %c0_i32 = arith.constant 0 : i32
    %c0_i32_0 = arith.constant 0 : i32
    return %arg0, %c0_i32 : i32, i32
  }
  func.func @transform_1(%arg0: i32, %arg1: i32) -> (i32, i32) {
    %c0_i32 = arith.constant 0 : i32
    %c0_i32_0 = arith.constant 0 : i32
    return %c0_i32, %arg1 : i32, i32
  }
  func.func @transform_2(%arg0: i32, %arg1: i32) -> (i32, i32) {
    %c0_i32 = arith.constant 0 : i32
    %c0_i32_0 = arith.constant 0 : i32
    return %c0_i32, %arg1 : i32, i32
  }
  func.func @transform_3(%arg0: i32, %arg1: i32) -> (i32, i32) {
    %c0_i32 = arith.constant 0 : i32
    return %arg0, %arg1 : i32, i32
  }
  func.func @transform_4(%arg0: i32, %arg1: i32) -> (i32, i32) {
    %c0_i32 = arith.constant 0 : i32
    return %arg0, %arg1 : i32, i32
  }
}

module attributes {stable_mosaic.version = 11 : i64} {
  func.func @kernel(%arg0: i32, %arg1: i32, %arg2: memref<34x64xbf16, #tpu.memory_space<vmem>>, %arg3: memref<64x256xbf16, #tpu.memory_space<vmem>>, %arg4: memref<1x256xf32, #tpu.memory_space<vmem>>, %arg5: memref<1x64xf32, #tpu.memory_space<vmem>>, %arg6: memref<1x64xf32, #tpu.memory_space<vmem>>, %arg7: memref<34x256xbf16, #tpu.memory_space<vmem>>) attributes {dimension_semantics = [#tpu.dimension_semantics<parallel>, #tpu.dimension_semantics<parallel>], iteration_bounds = array<i64: 1, 1>, scalar_prefetch = 0 : i64, scratch_operands = 0 : i64, tpu.core_type = #tpu.core_type<tc>, window_params = [{transform_indices = @transform_0, window_bounds = array<i64: 34, 64>}, {transform_indices = @transform_1, window_bounds = array<i64: 64, 256>}, {transform_indices = @transform_2, window_bounds = array<i64: 1, 256>}, {pipeline_mode = #tpu.pipeline_mode<synchronous>, transform_indices = @transform_3, window_bounds = array<i64: 1, 64>}, {pipeline_mode = #tpu.pipeline_mode<synchronous>, transform_indices = @transform_4, window_bounds = array<i64: 1, 64>}, {transform_indices = @transform_5, window_bounds = array<i64: 34, 256>}]} {
    %c0 = arith.constant 0 : index
    %c0_0 = arith.constant 0 : index
    %0 = vector.load %arg2[%c0, %c0_0] : memref<34x64xbf16, #tpu.memory_space<vmem>>, vector<34x64xbf16>
    %1 = arith.extf %0 : vector<34x64xbf16> to vector<34x64xf32>
    %cst = arith.constant dense<0.000000e+00> : vector<34xf32>
    %2 = vector.multi_reduction <add>, %1, %cst [1] : vector<34x64xf32> to vector<34xf32>
    %3 = vector.shape_cast %2 : vector<34xf32> to vector<34x1xf32>
    %cst_1 = arith.constant 6.400000e+01 : f32
    %4 = vector.broadcast %cst_1 : f32 to vector<34x1xf32>
    %5 = arith.divf %3, %4 : vector<34x1xf32>
    %6 = vector.broadcast %5 : vector<34x1xf32> to vector<34x64xf32>
    %7 = arith.subf %1, %6 : vector<34x64xf32>
    %8 = arith.mulf %7, %7 : vector<34x64xf32>
    %cst_2 = arith.constant dense<0.000000e+00> : vector<34xf32>
    %9 = vector.multi_reduction <add>, %8, %cst_2 [1] : vector<34x64xf32> to vector<34xf32>
    %10 = vector.shape_cast %9 : vector<34xf32> to vector<34x1xf32>
    %cst_3 = arith.constant 6.400000e+01 : f32
    %11 = vector.broadcast %cst_3 : f32 to vector<34x1xf32>
    %12 = arith.divf %10, %11 : vector<34x1xf32>
    %13 = vector.broadcast %5 : vector<34x1xf32> to vector<34x64xf32>
    %14 = arith.subf %1, %13 : vector<34x64xf32>
    %cst_4 = arith.constant 9.99999974E-6 : f32
    %15 = vector.broadcast %cst_4 : f32 to vector<34x1xf32>
    %16 = arith.addf %12, %15 : vector<34x1xf32>
    %17 = math.rsqrt %16 : vector<34x1xf32>
    %18 = vector.broadcast %17 : vector<34x1xf32> to vector<34x64xf32>
    %19 = arith.mulf %14, %18 : vector<34x64xf32>
    %c0_5 = arith.constant 0 : index
    %c0_6 = arith.constant 0 : index
    %20 = vector.load %arg5[%c0_5, %c0_6] : memref<1x64xf32, #tpu.memory_space<vmem>>, vector<1x64xf32>
    %21 = vector.broadcast %20 : vector<1x64xf32> to vector<34x64xf32>
    %22 = arith.mulf %19, %21 : vector<34x64xf32>
    %c0_7 = arith.constant 0 : index
    %c0_8 = arith.constant 0 : index
    %23 = vector.load %arg6[%c0_7, %c0_8] : memref<1x64xf32, #tpu.memory_space<vmem>>, vector<1x64xf32>
    %24 = vector.broadcast %23 : vector<1x64xf32> to vector<34x64xf32>
    %25 = arith.addf %22, %24 : vector<34x64xf32>
    %26 = arith.truncf %25 : vector<34x64xf32> to vector<34x64xbf16>
    %c0_9 = arith.constant 0 : index
    %c0_10 = arith.constant 0 : index
    %27 = vector.load %arg3[%c0_9, %c0_10] : memref<64x256xbf16, #tpu.memory_space<vmem>>, vector<64x256xbf16>
    %cst_11 = arith.constant dense<0.000000e+00> : vector<34x256xf32>
    %28 = tpu.matmul %26, %27, %cst_11 {dimension_numbers = #tpu.dot_dimension_numbers<[1], [0], [0], [1], [0, 0, 1, 1], [], []>} : vector<34x64xbf16>, vector<64x256xbf16>, vector<34x256xf32> -> vector<34x256xf32>
    %c0_12 = arith.constant 0 : index
    %c0_13 = arith.constant 0 : index
    %29 = vector.load %arg4[%c0_12, %c0_13] : memref<1x256xf32, #tpu.memory_space<vmem>>, vector<1x256xf32>
    %30 = vector.broadcast %29 : vector<1x256xf32> to vector<34x256xf32>
    %31 = arith.addf %28, %30 : vector<34x256xf32>
    %cst_14 = arith.constant 1.702000e+00 : f32
    %32 = vector.broadcast %cst_14 : f32 to vector<34x256xf32>
    %33 = arith.mulf %32, %31 : vector<34x256xf32>
    %34 = arith.negf %33 : vector<34x256xf32>
    %35 = math.exp %34 : vector<34x256xf32>
    %cst_15 = arith.constant 1.000000e+00 : f32
    %36 = vector.broadcast %cst_15 : f32 to vector<34x256xf32>
    %37 = arith.addf %36, %35 : vector<34x256xf32>
    %38 = arith.divf %36, %37 : vector<34x256xf32>
    %39 = arith.mulf %31, %38 : vector<34x256xf32>
    %40 = arith.truncf %39 : vector<34x256xf32> to vector<34x256xbf16>
    %c0_16 = arith.constant 0 : index
    %c0_17 = arith.constant 0 : index
    %41 = vector.load %arg7[%c0_16, %c0_17] : memref<34x256xbf16, #tpu.memory_space<vmem>>, vector<34x256xbf16>
    tpu.vector_store %arg7[%c0_16, %c0_17], %40 {strides = array<i32>} : memref<34x256xbf16, #tpu.memory_space<vmem>>, vector<34x256xbf16>,
    return
  }
  func.func @transform_0(%arg0: i32, %arg1: i32) -> (i32, i32) {
    %c0_i32 = arith.constant 0 : i32
    %c0_i32_0 = arith.constant 0 : i32
    return %arg0, %c0_i32 : i32, i32
  }
  func.func @transform_1(%arg0: i32, %arg1: i32) -> (i32, i32) {
    %c0_i32 = arith.constant 0 : i32
    %c0_i32_0 = arith.constant 0 : i32
    return %c0_i32, %arg1 : i32, i32
  }
  func.func @transform_2(%arg0: i32, %arg1: i32) -> (i32, i32) {
    %c0_i32 = arith.constant 0 : i32
    %c0_i32_0 = arith.constant 0 : i32
    return %c0_i32, %arg1 : i32, i32
  }
  func.func @transform_3(%arg0: i32, %arg1: i32) -> (i32, i32) {
    %c0_i32 = arith.constant 0 : i32
    %c0_i32_0 = arith.constant 0 : i32
    %c0_i32_1 = arith.constant 0 : i32
    return %c0_i32, %c0_i32_0 : i32, i32
  }
  func.func @transform_4(%arg0: i32, %arg1: i32) -> (i32, i32) {
    %c0_i32 = arith.constant 0 : i32
    %c0_i32_0 = arith.constant 0 : i32
    %c0_i32_1 = arith.constant 0 : i32
    return %c0_i32, %c0_i32_0 : i32, i32
  }
  func.func @transform_5(%arg0: i32, %arg1: i32) -> (i32, i32) {
    %c0_i32 = arith.constant 0 : i32
    return %arg0, %arg1 : i32, i32
  }
}

module attributes {stable_mosaic.version = 11 : i64} {
  func.func @kernel(%arg0: i32, %arg1: i32, %arg2: memref<34x256xbf16, #tpu.memory_space<vmem>>, %arg3: memref<256x64xbf16, #tpu.memory_space<vmem>>, %arg4: memref<1x64xf32, #tpu.memory_space<vmem>>, %arg5: memref<34x64xbf16, #tpu.memory_space<vmem>>, %arg6: memref<34x64xbf16, #tpu.memory_space<vmem>>) attributes {dimension_semantics = [#tpu.dimension_semantics<parallel>, #tpu.dimension_semantics<parallel>], iteration_bounds = array<i64: 1, 1>, scalar_prefetch = 0 : i64, scratch_operands = 0 : i64, tpu.core_type = #tpu.core_type<tc>, window_params = [{transform_indices = @transform_0, window_bounds = array<i64: 34, 256>}, {transform_indices = @transform_1, window_bounds = array<i64: 256, 64>}, {transform_indices = @transform_2, window_bounds = array<i64: 1, 64>}, {transform_indices = @transform_3, window_bounds = array<i64: 34, 64>}, {transform_indices = @transform_4, window_bounds = array<i64: 34, 64>}]} {
    %c0 = arith.constant 0 : index
    %c0_0 = arith.constant 0 : index
    %0 = vector.load %arg2[%c0, %c0_0] : memref<34x256xbf16, #tpu.memory_space<vmem>>, vector<34x256xbf16>
    %1 = arith.extf %0 : vector<34x256xbf16> to vector<34x256xf32>
    %2 = arith.truncf %1 : vector<34x256xf32> to vector<34x256xbf16>
    %c0_1 = arith.constant 0 : index
    %c0_2 = arith.constant 0 : index
    %3 = vector.load %arg3[%c0_1, %c0_2] : memref<256x64xbf16, #tpu.memory_space<vmem>>, vector<256x64xbf16>
    %cst = arith.constant dense<0.000000e+00> : vector<34x64xf32>
    %4 = tpu.matmul %2, %3, %cst {dimension_numbers = #tpu.dot_dimension_numbers<[1], [0], [0], [1], [0, 0, 1, 1], [], []>} : vector<34x256xbf16>, vector<256x64xbf16>, vector<34x64xf32> -> vector<34x64xf32>
    %c0_3 = arith.constant 0 : index
    %c0_4 = arith.constant 0 : index
    %5 = vector.load %arg4[%c0_3, %c0_4] : memref<1x64xf32, #tpu.memory_space<vmem>>, vector<1x64xf32>
    %6 = vector.broadcast %5 : vector<1x64xf32> to vector<34x64xf32>
    %7 = arith.addf %4, %6 : vector<34x64xf32>
    %c0_5 = arith.constant 0 : index
    %c0_6 = arith.constant 0 : index
    %8 = vector.load %arg5[%c0_5, %c0_6] : memref<34x64xbf16, #tpu.memory_space<vmem>>, vector<34x64xbf16>
    %9 = arith.extf %8 : vector<34x64xbf16> to vector<34x64xf32>
    %10 = arith.addf %7, %9 : vector<34x64xf32>
    %11 = arith.truncf %10 : vector<34x64xf32> to vector<34x64xbf16>
    %c0_7 = arith.constant 0 : index
    %c0_8 = arith.constant 0 : index
    %12 = vector.load %arg6[%c0_7, %c0_8] : memref<34x64xbf16, #tpu.memory_space<vmem>>, vector<34x64xbf16>
    tpu.vector_store %arg6[%c0_7, %c0_8], %11 {strides = array<i32>} : memref<34x64xbf16, #tpu.memory_space<vmem>>, vector<34x64xbf16>,
    return
  }
  func.func @transform_0(%arg0: i32, %arg1: i32) -> (i32, i32) {
    %c0_i32 = arith.constant 0 : i32
    %c0_i32_0 = arith.constant 0 : i32
    return %arg0, %c0_i32 : i32, i32
  }
  func.func @transform_1(%arg0: i32, %arg1: i32) -> (i32, i32) {
    %c0_i32 = arith.constant 0 : i32
    %c0_i32_0 = arith.constant 0 : i32
    return %c0_i32, %arg1 : i32, i32
  }
  func.func @transform_2(%arg0: i32, %arg1: i32) -> (i32, i32) {
    %c0_i32 = arith.constant 0 : i32
    %c0_i32_0 = arith.constant 0 : i32
    return %c0_i32, %arg1 : i32, i32
  }
  func.func @transform_3(%arg0: i32, %arg1: i32) -> (i32, i32) {
    %c0_i32 = arith.constant 0 : i32
    return %arg0, %arg1 : i32, i32
  }
  func.func @transform_4(%arg0: i32, %arg1: i32) -> (i32, i32) {
    %c0_i32 = arith.constant 0 : i32
    return %arg0, %arg1 : i32, i32
  }
}

module attributes {stable_mosaic.version = 11 : i64} {
  func.func @kernel(%arg0: i32, %arg1: i32, %arg2: memref<2x64xbf16, #tpu.memory_space<vmem>>, %arg3: memref<64x64xbf16, #tpu.memory_space<vmem>>, %arg4: memref<1x64xf32, #tpu.memory_space<vmem>>, %arg5: memref<1x64xf32, #tpu.memory_space<vmem>>, %arg6: memref<2x64xf32, #tpu.memory_space<vmem>>) attributes {dimension_semantics = [#tpu.dimension_semantics<parallel>, #tpu.dimension_semantics<parallel>], iteration_bounds = array<i64: 1, 1>, scalar_prefetch = 0 : i64, scratch_operands = 0 : i64, tpu.core_type = #tpu.core_type<tc>, window_params = [{transform_indices = @transform_0, window_bounds = array<i64: 2, 64>}, {transform_indices = @transform_1, window_bounds = array<i64: 64, 64>}, {pipeline_mode = #tpu.pipeline_mode<synchronous>, transform_indices = @transform_2, window_bounds = array<i64: 1, 64>}, {pipeline_mode = #tpu.pipeline_mode<synchronous>, transform_indices = @transform_3, window_bounds = array<i64: 1, 64>}, {transform_indices = @transform_4, window_bounds = array<i64: 2, 64>}]} {
    %c0 = arith.constant 0 : index
    %c0_0 = arith.constant 0 : index
    %0 = vector.load %arg2[%c0, %c0_0] : memref<2x64xbf16, #tpu.memory_space<vmem>>, vector<2x64xbf16>
    %1 = arith.extf %0 : vector<2x64xbf16> to vector<2x64xf32>
    %cst = arith.constant dense<0.000000e+00> : vector<2xf32>
    %2 = vector.multi_reduction <add>, %1, %cst [1] : vector<2x64xf32> to vector<2xf32>
    %3 = vector.shape_cast %2 : vector<2xf32> to vector<2x1xf32>
    %cst_1 = arith.constant 6.400000e+01 : f32
    %4 = vector.broadcast %cst_1 : f32 to vector<2x1xf32>
    %5 = arith.divf %3, %4 : vector<2x1xf32>
    %6 = vector.broadcast %5 : vector<2x1xf32> to vector<2x64xf32>
    %7 = arith.subf %1, %6 : vector<2x64xf32>
    %8 = arith.mulf %7, %7 : vector<2x64xf32>
    %cst_2 = arith.constant dense<0.000000e+00> : vector<2xf32>
    %9 = vector.multi_reduction <add>, %8, %cst_2 [1] : vector<2x64xf32> to vector<2xf32>
    %10 = vector.shape_cast %9 : vector<2xf32> to vector<2x1xf32>
    %cst_3 = arith.constant 6.400000e+01 : f32
    %11 = vector.broadcast %cst_3 : f32 to vector<2x1xf32>
    %12 = arith.divf %10, %11 : vector<2x1xf32>
    %13 = vector.broadcast %5 : vector<2x1xf32> to vector<2x64xf32>
    %14 = arith.subf %1, %13 : vector<2x64xf32>
    %cst_4 = arith.constant 9.99999974E-6 : f32
    %15 = vector.broadcast %cst_4 : f32 to vector<2x1xf32>
    %16 = arith.addf %12, %15 : vector<2x1xf32>
    %17 = math.rsqrt %16 : vector<2x1xf32>
    %18 = vector.broadcast %17 : vector<2x1xf32> to vector<2x64xf32>
    %19 = arith.mulf %14, %18 : vector<2x64xf32>
    %c0_5 = arith.constant 0 : index
    %c0_6 = arith.constant 0 : index
    %20 = vector.load %arg4[%c0_5, %c0_6] : memref<1x64xf32, #tpu.memory_space<vmem>>, vector<1x64xf32>
    %21 = vector.broadcast %20 : vector<1x64xf32> to vector<2x64xf32>
    %22 = arith.mulf %19, %21 : vector<2x64xf32>
    %c0_7 = arith.constant 0 : index
    %c0_8 = arith.constant 0 : index
    %23 = vector.load %arg5[%c0_7, %c0_8] : memref<1x64xf32, #tpu.memory_space<vmem>>, vector<1x64xf32>
    %24 = vector.broadcast %23 : vector<1x64xf32> to vector<2x64xf32>
    %25 = arith.addf %22, %24 : vector<2x64xf32>
    %26 = arith.truncf %25 : vector<2x64xf32> to vector<2x64xbf16>
    %c0_9 = arith.constant 0 : index
    %c0_10 = arith.constant 0 : index
    %27 = vector.load %arg3[%c0_9, %c0_10] : memref<64x64xbf16, #tpu.memory_space<vmem>>, vector<64x64xbf16>
    %cst_11 = arith.constant dense<0.000000e+00> : vector<2x64xf32>
    %28 = tpu.matmul %26, %27, %cst_11 {dimension_numbers = #tpu.dot_dimension_numbers<[1], [0], [0], [1], [0, 0, 1, 1], [], []>} : vector<2x64xbf16>, vector<64x64xbf16>, vector<2x64xf32> -> vector<2x64xf32>
    %c0_12 = arith.constant 0 : index
    %c0_13 = arith.constant 0 : index
    %29 = vector.load %arg6[%c0_12, %c0_13] : memref<2x64xf32, #tpu.memory_space<vmem>>, vector<2x64xf32>
    tpu.vector_store %arg6[%c0_12, %c0_13], %28 {strides = array<i32>} : memref<2x64xf32, #tpu.memory_space<vmem>>, vector<2x64xf32>,
    return
  }
  func.func @transform_0(%arg0: i32, %arg1: i32) -> (i32, i32) {
    %c0_i32 = arith.constant 0 : i32
    %c0_i32_0 = arith.constant 0 : i32
    return %arg0, %c0_i32 : i32, i32
  }
  func.func @transform_1(%arg0: i32, %arg1: i32) -> (i32, i32) {
    %c0_i32 = arith.constant 0 : i32
    %c0_i32_0 = arith.constant 0 : i32
    return %c0_i32, %arg1 : i32, i32
  }
  func.func @transform_2(%arg0: i32, %arg1: i32) -> (i32, i32) {
    %c0_i32 = arith.constant 0 : i32
    %c0_i32_0 = arith.constant 0 : i32
    %c0_i32_1 = arith.constant 0 : i32
    return %c0_i32, %c0_i32_0 : i32, i32
  }
  func.func @transform_3(%arg0: i32, %arg1: i32) -> (i32, i32) {
    %c0_i32 = arith.constant 0 : i32
    %c0_i32_0 = arith.constant 0 : i32
    %c0_i32_1 = arith.constant 0 : i32
    return %c0_i32, %c0_i32_0 : i32, i32
  }
  func.func @transform_4(%arg0: i32, %arg1: i32) -> (i32, i32) {
    %c0_i32 = arith.constant 0 : i32
    return %arg0, %arg1 : i32, i32
  }
}

module attributes {stable_mosaic.version = 11 : i64} {
  func.func @kernel(%arg0: i32, %arg1: i32, %arg2: memref<48x64xbf16, #tpu.memory_space<vmem>>, %arg3: memref<64x192xbf16, #tpu.memory_space<vmem>>, %arg4: memref<1x192xf32, #tpu.memory_space<vmem>>, %arg5: memref<1x64xf32, #tpu.memory_space<vmem>>, %arg6: memref<1x64xf32, #tpu.memory_space<vmem>>, %arg7: memref<48x192xbf16, #tpu.memory_space<vmem>>) attributes {dimension_semantics = [#tpu.dimension_semantics<parallel>, #tpu.dimension_semantics<parallel>], iteration_bounds = array<i64: 1, 1>, scalar_prefetch = 0 : i64, scratch_operands = 0 : i64, tpu.core_type = #tpu.core_type<tc>, window_params = [{transform_indices = @transform_0, window_bounds = array<i64: 48, 64>}, {transform_indices = @transform_1, window_bounds = array<i64: 64, 192>}, {transform_indices = @transform_2, window_bounds = array<i64: 1, 192>}, {pipeline_mode = #tpu.pipeline_mode<synchronous>, transform_indices = @transform_3, window_bounds = array<i64: 1, 64>}, {pipeline_mode = #tpu.pipeline_mode<synchronous>, transform_indices = @transform_4, window_bounds = array<i64: 1, 64>}, {transform_indices = @transform_5, window_bounds = array<i64: 48, 192>}]} {
    %c0 = arith.constant 0 : index
    %c0_0 = arith.constant 0 : index
    %0 = vector.load %arg2[%c0, %c0_0] : memref<48x64xbf16, #tpu.memory_space<vmem>>, vector<48x64xbf16>
    %1 = arith.extf %0 : vector<48x64xbf16> to vector<48x64xf32>
    %cst = arith.constant dense<0.000000e+00> : vector<48xf32>
    %2 = vector.multi_reduction <add>, %1, %cst [1] : vector<48x64xf32> to vector<48xf32>
    %3 = vector.shape_cast %2 : vector<48xf32> to vector<48x1xf32>
    %cst_1 = arith.constant 6.400000e+01 : f32
    %4 = vector.broadcast %cst_1 : f32 to vector<48x1xf32>
    %5 = arith.divf %3, %4 : vector<48x1xf32>
    %6 = vector.broadcast %5 : vector<48x1xf32> to vector<48x64xf32>
    %7 = arith.subf %1, %6 : vector<48x64xf32>
    %8 = arith.mulf %7, %7 : vector<48x64xf32>
    %cst_2 = arith.constant dense<0.000000e+00> : vector<48xf32>
    %9 = vector.multi_reduction <add>, %8, %cst_2 [1] : vector<48x64xf32> to vector<48xf32>
    %10 = vector.shape_cast %9 : vector<48xf32> to vector<48x1xf32>
    %cst_3 = arith.constant 6.400000e+01 : f32
    %11 = vector.broadcast %cst_3 : f32 to vector<48x1xf32>
    %12 = arith.divf %10, %11 : vector<48x1xf32>
    %13 = vector.broadcast %5 : vector<48x1xf32> to vector<48x64xf32>
    %14 = arith.subf %1, %13 : vector<48x64xf32>
    %cst_4 = arith.constant 9.99999974E-6 : f32
    %15 = vector.broadcast %cst_4 : f32 to vector<48x1xf32>
    %16 = arith.addf %12, %15 : vector<48x1xf32>
    %17 = math.rsqrt %16 : vector<48x1xf32>
    %18 = vector.broadcast %17 : vector<48x1xf32> to vector<48x64xf32>
    %19 = arith.mulf %14, %18 : vector<48x64xf32>
    %c0_5 = arith.constant 0 : index
    %c0_6 = arith.constant 0 : index
    %20 = vector.load %arg5[%c0_5, %c0_6] : memref<1x64xf32, #tpu.memory_space<vmem>>, vector<1x64xf32>
    %21 = vector.broadcast %20 : vector<1x64xf32> to vector<48x64xf32>
    %22 = arith.mulf %19, %21 : vector<48x64xf32>
    %c0_7 = arith.constant 0 : index
    %c0_8 = arith.constant 0 : index
    %23 = vector.load %arg6[%c0_7, %c0_8] : memref<1x64xf32, #tpu.memory_space<vmem>>, vector<1x64xf32>
    %24 = vector.broadcast %23 : vector<1x64xf32> to vector<48x64xf32>
    %25 = arith.addf %22, %24 : vector<48x64xf32>
    %26 = arith.truncf %25 : vector<48x64xf32> to vector<48x64xbf16>
    %c0_9 = arith.constant 0 : index
    %c0_10 = arith.constant 0 : index
    %27 = vector.load %arg3[%c0_9, %c0_10] : memref<64x192xbf16, #tpu.memory_space<vmem>>, vector<64x192xbf16>
    %cst_11 = arith.constant dense<0.000000e+00> : vector<48x192xf32>
    %28 = tpu.matmul %26, %27, %cst_11 {dimension_numbers = #tpu.dot_dimension_numbers<[1], [0], [0], [1], [0, 0, 1, 1], [], []>} : vector<48x64xbf16>, vector<64x192xbf16>, vector<48x192xf32> -> vector<48x192xf32>
    %c0_12 = arith.constant 0 : index
    %c0_13 = arith.constant 0 : index
    %29 = vector.load %arg4[%c0_12, %c0_13] : memref<1x192xf32, #tpu.memory_space<vmem>>, vector<1x192xf32>
    %30 = vector.broadcast %29 : vector<1x192xf32> to vector<48x192xf32>
    %31 = arith.addf %28, %30 : vector<48x192xf32>
    %32 = arith.truncf %31 : vector<48x192xf32> to vector<48x192xbf16>
    %c0_14 = arith.constant 0 : index
    %c0_15 = arith.constant 0 : index
    %33 = vector.load %arg7[%c0_14, %c0_15] : memref<48x192xbf16, #tpu.memory_space<vmem>>, vector<48x192xbf16>
    tpu.vector_store %arg7[%c0_14, %c0_15], %32 {strides = array<i32>} : memref<48x192xbf16, #tpu.memory_space<vmem>>, vector<48x192xbf16>,
    return
  }
  func.func @transform_0(%arg0: i32, %arg1: i32) -> (i32, i32) {
    %c0_i32 = arith.constant 0 : i32
    %c0_i32_0 = arith.constant 0 : i32
    return %arg0, %c0_i32 : i32, i32
  }
  func.func @transform_1(%arg0: i32, %arg1: i32) -> (i32, i32) {
    %c0_i32 = arith.constant 0 : i32
    %c0_i32_0 = arith.constant 0 : i32
    return %c0_i32, %arg1 : i32, i32
  }
  func.func @transform_2(%arg0: i32, %arg1: i32) -> (i32, i32) {
    %c0_i32 = arith.constant 0 : i32
    %c0_i32_0 = arith.constant 0 : i32
    return %c0_i32, %arg1 : i32, i32
  }
  func.func @transform_3(%arg0: i32, %arg1: i32) -> (i32, i32) {
    %c0_i32 = arith.constant 0 : i32
    %c0_i32_0 = arith.constant 0 : i32
    %c0_i32_1 = arith.constant 0 : i32
    return %c0_i32, %c0_i32_0 : i32, i32
  }
  func.func @transform_4(%arg0: i32, %arg1: i32) -> (i32, i32) {
    %c0_i32 = arith.constant 0 : i32
    %c0_i32_0 = arith.constant 0 : i32
    %c0_i32_1 = arith.constant 0 : i32
    return %c0_i32, %c0_i32_0 : i32, i32
  }
  func.func @transform_5(%arg0: i32, %arg1: i32) -> (i32, i32) {
    %c0_i32 = arith.constant 0 : i32
    return %arg0, %arg1 : i32, i32
  }
}

module attributes {stable_mosaic.version = 11 : i64} {
  func.func @kernel(%arg0: i32, %arg1: memref<1x16x192xbf16, #tpu.memory_space<vmem>>, %arg2: memref<1x16x64xbf16, #tpu.memory_space<vmem>>) attributes {dimension_semantics = [#tpu.dimension_semantics<parallel>], iteration_bounds = array<i64: 3>, scalar_prefetch = 0 : i64, scratch_operands = 0 : i64, tpu.core_type = #tpu.core_type<tc>, window_params = [{transform_indices = @transform_0, window_bounds = array<i64: 1, 16, 192>}, {transform_indices = @transform_1, window_bounds = array<i64: 1, 16, 64>}]} {
    %c0 = arith.constant 0 : index
    %c0_0 = arith.constant 0 : index
    %c0_1 = arith.constant 0 : index
    %0 = vector.load %arg1[%c0, %c0_0, %c0_1] : memref<1x16x192xbf16, #tpu.memory_space<vmem>>, vector<1x16x192xbf16>
    %1 = vector.shape_cast %0 : vector<1x16x192xbf16> to vector<16x192xbf16>
    %2 = tpu.iota {dimensions = array<i32: 0>} : vector<16x16xi32>
    %3 = tpu.iota {dimensions = array<i32: 1>} : vector<16x16xi32>
    %4 = arith.cmpi sle, %3, %2 : vector<16x16xi32>
    %5 = vector.extract_strided_slice %1 {offsets = [0, 0], sizes = [16, 16], strides = [1, 1]} : vector<16x192xbf16> to vector<16x16xbf16>
    %6 = arith.extf %5 : vector<16x16xbf16> to vector<16x16xf32>
    %cst = arith.constant 2.500000e-01 : f32
    %7 = vector.broadcast %cst : f32 to vector<16x16xf32>
    %8 = arith.mulf %6, %7 : vector<16x16xf32>
    %9 = arith.truncf %8 : vector<16x16xf32> to vector<16x16xbf16>
    %10 = vector.extract_strided_slice %1 {offsets = [0, 64], sizes = [16, 16], strides = [1, 1]} : vector<16x192xbf16> to vector<16x16xbf16>
    %11 = vector.extract_strided_slice %1 {offsets = [0, 128], sizes = [16, 16], strides = [1, 1]} : vector<16x192xbf16> to vector<16x16xbf16>
    %cst_2 = arith.constant dense<0.000000e+00> : vector<16x16xf32>
    %12 = tpu.matmul %9, %10, %cst_2 {dimension_numbers = #tpu.dot_dimension_numbers<[1], [1], [0], [0], [0, 0, 1, 0], [], []>} : vector<16x16xbf16>, vector<16x16xbf16>, vector<16x16xf32> -> vector<16x16xf32>
    %cst_3 = arith.constant -1.000000e+30 : f32
    %13 = vector.broadcast %cst_3 : f32 to vector<16x16xf32>
    %14 = arith.select %4, %12, %13 : vector<16x16xi1>, vector<16x16xf32>
    %cst_4 = arith.constant dense<0xFF800000> : vector<16xf32>
    %15 = vector.multi_reduction <maximumf>, %14, %cst_4 [1] : vector<16x16xf32> to vector<16xf32>
    %16 = vector.shape_cast %15 : vector<16xf32> to vector<16x1xf32>
    %17 = vector.broadcast %16 : vector<16x1xf32> to vector<16x16xf32>
    %18 = arith.subf %14, %17 : vector<16x16xf32>
    %19 = math.exp %18 : vector<16x16xf32>
    %cst_5 = arith.constant dense<0.000000e+00> : vector<16xf32>
    %20 = vector.multi_reduction <add>, %19, %cst_5 [1] : vector<16x16xf32> to vector<16xf32>
    %21 = vector.shape_cast %20 : vector<16xf32> to vector<16x1xf32>
    %22 = tpu.reciprocal %21 {approx = true} : vector<16x1xf32> -> vector<16x1xf32>
    %23 = vector.broadcast %22 : vector<16x1xf32> to vector<16x16xf32>
    %24 = arith.mulf %19, %23 : vector<16x16xf32>
    %25 = arith.truncf %24 : vector<16x16xf32> to vector<16x16xbf16>
    %cst_6 = arith.constant dense<0.000000e+00> : vector<16x16xf32>
    %26 = tpu.matmul %25, %11, %cst_6 {dimension_numbers = #tpu.dot_dimension_numbers<[1], [0], [0], [1], [0, 0, 1, 1], [], []>} : vector<16x16xbf16>, vector<16x16xbf16>, vector<16x16xf32> -> vector<16x16xf32>
    %27 = vector.extract_strided_slice %1 {offsets = [0, 16], sizes = [16, 16], strides = [1, 1]} : vector<16x192xbf16> to vector<16x16xbf16>
    %28 = arith.extf %27 : vector<16x16xbf16> to vector<16x16xf32>
    %cst_7 = arith.constant 2.500000e-01 : f32
    %29 = vector.broadcast %cst_7 : f32 to vector<16x16xf32>
    %30 = arith.mulf %28, %29 : vector<16x16xf32>
    %31 = arith.truncf %30 : vector<16x16xf32> to vector<16x16xbf16>
    %32 = vector.extract_strided_slice %1 {offsets = [0, 80], sizes = [16, 16], strides = [1, 1]} : vector<16x192xbf16> to vector<16x16xbf16>
    %33 = vector.extract_strided_slice %1 {offsets = [0, 144], sizes = [16, 16], strides = [1, 1]} : vector<16x192xbf16> to vector<16x16xbf16>
    %cst_8 = arith.constant dense<0.000000e+00> : vector<16x16xf32>
    %34 = tpu.matmul %31, %32, %cst_8 {dimension_numbers = #tpu.dot_dimension_numbers<[1], [1], [0], [0], [0, 0, 1, 0], [], []>} : vector<16x16xbf16>, vector<16x16xbf16>, vector<16x16xf32> -> vector<16x16xf32>
    %cst_9 = arith.constant -1.000000e+30 : f32
    %35 = vector.broadcast %cst_9 : f32 to vector<16x16xf32>
    %36 = arith.select %4, %34, %35 : vector<16x16xi1>, vector<16x16xf32>
    %cst_10 = arith.constant dense<0xFF800000> : vector<16xf32>
    %37 = vector.multi_reduction <maximumf>, %36, %cst_10 [1] : vector<16x16xf32> to vector<16xf32>
    %38 = vector.shape_cast %37 : vector<16xf32> to vector<16x1xf32>
    %39 = vector.broadcast %38 : vector<16x1xf32> to vector<16x16xf32>
    %40 = arith.subf %36, %39 : vector<16x16xf32>
    %41 = math.exp %40 : vector<16x16xf32>
    %cst_11 = arith.constant dense<0.000000e+00> : vector<16xf32>
    %42 = vector.multi_reduction <add>, %41, %cst_11 [1] : vector<16x16xf32> to vector<16xf32>
    %43 = vector.shape_cast %42 : vector<16xf32> to vector<16x1xf32>
    %44 = tpu.reciprocal %43 {approx = true} : vector<16x1xf32> -> vector<16x1xf32>
    %45 = vector.broadcast %44 : vector<16x1xf32> to vector<16x16xf32>
    %46 = arith.mulf %41, %45 : vector<16x16xf32>
    %47 = arith.truncf %46 : vector<16x16xf32> to vector<16x16xbf16>
    %cst_12 = arith.constant dense<0.000000e+00> : vector<16x16xf32>
    %48 = tpu.matmul %47, %33, %cst_12 {dimension_numbers = #tpu.dot_dimension_numbers<[1], [0], [0], [1], [0, 0, 1, 1], [], []>} : vector<16x16xbf16>, vector<16x16xbf16>, vector<16x16xf32> -> vector<16x16xf32>
    %49 = vector.extract_strided_slice %1 {offsets = [0, 32], sizes = [16, 16], strides = [1, 1]} : vector<16x192xbf16> to vector<16x16xbf16>
    %50 = arith.extf %49 : vector<16x16xbf16> to vector<16x16xf32>
    %cst_13 = arith.constant 2.500000e-01 : f32
    %51 = vector.broadcast %cst_13 : f32 to vector<16x16xf32>
    %52 = arith.mulf %50, %51 : vector<16x16xf32>
    %53 = arith.truncf %52 : vector<16x16xf32> to vector<16x16xbf16>
    %54 = vector.extract_strided_slice %1 {offsets = [0, 96], sizes = [16, 16], strides = [1, 1]} : vector<16x192xbf16> to vector<16x16xbf16>
    %55 = vector.extract_strided_slice %1 {offsets = [0, 160], sizes = [16, 16], strides = [1, 1]} : vector<16x192xbf16> to vector<16x16xbf16>
    %cst_14 = arith.constant dense<0.000000e+00> : vector<16x16xf32>
    %56 = tpu.matmul %53, %54, %cst_14 {dimension_numbers = #tpu.dot_dimension_numbers<[1], [1], [0], [0], [0, 0, 1, 0], [], []>} : vector<16x16xbf16>, vector<16x16xbf16>, vector<16x16xf32> -> vector<16x16xf32>
    %cst_15 = arith.constant -1.000000e+30 : f32
    %57 = vector.broadcast %cst_15 : f32 to vector<16x16xf32>
    %58 = arith.select %4, %56, %57 : vector<16x16xi1>, vector<16x16xf32>
    %cst_16 = arith.constant dense<0xFF800000> : vector<16xf32>
    %59 = vector.multi_reduction <maximumf>, %58, %cst_16 [1] : vector<16x16xf32> to vector<16xf32>
    %60 = vector.shape_cast %59 : vector<16xf32> to vector<16x1xf32>
    %61 = vector.broadcast %60 : vector<16x1xf32> to vector<16x16xf32>
    %62 = arith.subf %58, %61 : vector<16x16xf32>
    %63 = math.exp %62 : vector<16x16xf32>
    %cst_17 = arith.constant dense<0.000000e+00> : vector<16xf32>
    %64 = vector.multi_reduction <add>, %63, %cst_17 [1] : vector<16x16xf32> to vector<16xf32>
    %65 = vector.shape_cast %64 : vector<16xf32> to vector<16x1xf32>
    %66 = tpu.reciprocal %65 {approx = true} : vector<16x1xf32> -> vector<16x1xf32>
    %67 = vector.broadcast %66 : vector<16x1xf32> to vector<16x16xf32>
    %68 = arith.mulf %63, %67 : vector<16x16xf32>
    %69 = arith.truncf %68 : vector<16x16xf32> to vector<16x16xbf16>
    %cst_18 = arith.constant dense<0.000000e+00> : vector<16x16xf32>
    %70 = tpu.matmul %69, %55, %cst_18 {dimension_numbers = #tpu.dot_dimension_numbers<[1], [0], [0], [1], [0, 0, 1, 1], [], []>} : vector<16x16xbf16>, vector<16x16xbf16>, vector<16x16xf32> -> vector<16x16xf32>
    %71 = vector.extract_strided_slice %1 {offsets = [0, 48], sizes = [16, 16], strides = [1, 1]} : vector<16x192xbf16> to vector<16x16xbf16>
    %72 = arith.extf %71 : vector<16x16xbf16> to vector<16x16xf32>
    %cst_19 = arith.constant 2.500000e-01 : f32
    %73 = vector.broadcast %cst_19 : f32 to vector<16x16xf32>
    %74 = arith.mulf %72, %73 : vector<16x16xf32>
    %75 = arith.truncf %74 : vector<16x16xf32> to vector<16x16xbf16>
    %76 = vector.extract_strided_slice %1 {offsets = [0, 112], sizes = [16, 16], strides = [1, 1]} : vector<16x192xbf16> to vector<16x16xbf16>
    %77 = vector.extract_strided_slice %1 {offsets = [0, 176], sizes = [16, 16], strides = [1, 1]} : vector<16x192xbf16> to vector<16x16xbf16>
    %cst_20 = arith.constant dense<0.000000e+00> : vector<16x16xf32>
    %78 = tpu.matmul %75, %76, %cst_20 {dimension_numbers = #tpu.dot_dimension_numbers<[1], [1], [0], [0], [0, 0, 1, 0], [], []>} : vector<16x16xbf16>, vector<16x16xbf16>, vector<16x16xf32> -> vector<16x16xf32>
    %cst_21 = arith.constant -1.000000e+30 : f32
    %79 = vector.broadcast %cst_21 : f32 to vector<16x16xf32>
    %80 = arith.select %4, %78, %79 : vector<16x16xi1>, vector<16x16xf32>
    %cst_22 = arith.constant dense<0xFF800000> : vector<16xf32>
    %81 = vector.multi_reduction <maximumf>, %80, %cst_22 [1] : vector<16x16xf32> to vector<16xf32>
    %82 = vector.shape_cast %81 : vector<16xf32> to vector<16x1xf32>
    %83 = vector.broadcast %82 : vector<16x1xf32> to vector<16x16xf32>
    %84 = arith.subf %80, %83 : vector<16x16xf32>
    %85 = math.exp %84 : vector<16x16xf32>
    %cst_23 = arith.constant dense<0.000000e+00> : vector<16xf32>
    %86 = vector.multi_reduction <add>, %85, %cst_23 [1] : vector<16x16xf32> to vector<16xf32>
    %87 = vector.shape_cast %86 : vector<16xf32> to vector<16x1xf32>
    %88 = tpu.reciprocal %87 {approx = true} : vector<16x1xf32> -> vector<16x1xf32>
    %89 = vector.broadcast %88 : vector<16x1xf32> to vector<16x16xf32>
    %90 = arith.mulf %85, %89 : vector<16x16xf32>
    %91 = arith.truncf %90 : vector<16x16xf32> to vector<16x16xbf16>
    %cst_24 = arith.constant dense<0.000000e+00> : vector<16x16xf32>
    %92 = tpu.matmul %91, %77, %cst_24 {dimension_numbers = #tpu.dot_dimension_numbers<[1], [0], [0], [1], [0, 0, 1, 1], [], []>} : vector<16x16xbf16>, vector<16x16xbf16>, vector<16x16xf32> -> vector<16x16xf32>
    %93 = tpu.concatenate %26, %48, %70, %92 in 1 : vector<16x16xf32>, vector<16x16xf32>, vector<16x16xf32>, vector<16x16xf32> -> vector<16x64xf32>
    %94 = arith.truncf %93 : vector<16x64xf32> to vector<16x64xbf16>
    %c0_25 = arith.constant 0 : index
    %c0_26 = arith.constant 0 : index
    %c0_27 = arith.constant 0 : index
    %95 = vector.load %arg2[%c0_25, %c0_26, %c0_27] : memref<1x16x64xbf16, #tpu.memory_space<vmem>>, vector<1x16x64xbf16>
    %96 = vector.shape_cast %95 : vector<1x16x64xbf16> to vector<16x64xbf16>
    %97 = vector.shape_cast %94 : vector<16x64xbf16> to vector<1x16x64xbf16>
    tpu.vector_store %arg2[%c0_25, %c0_26, %c0_27], %97 {strides = array<i32>} : memref<1x16x64xbf16, #tpu.memory_space<vmem>>, vector<1x16x64xbf16>,
    return
  }
  func.func @transform_0(%arg0: i32) -> (i32, i32, i32) {
    %c0_i32 = arith.constant 0 : i32
    %c0_i32_0 = arith.constant 0 : i32
    %c0_i32_1 = arith.constant 0 : i32
    return %arg0, %c0_i32, %c0_i32_0 : i32, i32, i32
  }
  func.func @transform_1(%arg0: i32) -> (i32, i32, i32) {
    %c0_i32 = arith.constant 0 : i32
    %c0_i32_0 = arith.constant 0 : i32
    %c0_i32_1 = arith.constant 0 : i32
    return %arg0, %c0_i32, %c0_i32_0 : i32, i32, i32
  }
}

module attributes {stable_mosaic.version = 11 : i64} {
  func.func @kernel(%arg0: i32, %arg1: i32, %arg2: memref<48x64xbf16, #tpu.memory_space<vmem>>, %arg3: memref<64x64xbf16, #tpu.memory_space<vmem>>, %arg4: memref<1x64xf32, #tpu.memory_space<vmem>>, %arg5: memref<48x64xbf16, #tpu.memory_space<vmem>>, %arg6: memref<48x64xbf16, #tpu.memory_space<vmem>>) attributes {dimension_semantics = [#tpu.dimension_semantics<parallel>, #tpu.dimension_semantics<parallel>], iteration_bounds = array<i64: 1, 1>, scalar_prefetch = 0 : i64, scratch_operands = 0 : i64, tpu.core_type = #tpu.core_type<tc>, window_params = [{transform_indices = @transform_0, window_bounds = array<i64: 48, 64>}, {transform_indices = @transform_1, window_bounds = array<i64: 64, 64>}, {transform_indices = @transform_2, window_bounds = array<i64: 1, 64>}, {transform_indices = @transform_3, window_bounds = array<i64: 48, 64>}, {transform_indices = @transform_4, window_bounds = array<i64: 48, 64>}]} {
    %c0 = arith.constant 0 : index
    %c0_0 = arith.constant 0 : index
    %0 = vector.load %arg2[%c0, %c0_0] : memref<48x64xbf16, #tpu.memory_space<vmem>>, vector<48x64xbf16>
    %1 = arith.extf %0 : vector<48x64xbf16> to vector<48x64xf32>
    %2 = arith.truncf %1 : vector<48x64xf32> to vector<48x64xbf16>
    %c0_1 = arith.constant 0 : index
    %c0_2 = arith.constant 0 : index
    %3 = vector.load %arg3[%c0_1, %c0_2] : memref<64x64xbf16, #tpu.memory_space<vmem>>, vector<64x64xbf16>
    %cst = arith.constant dense<0.000000e+00> : vector<48x64xf32>
    %4 = tpu.matmul %2, %3, %cst {dimension_numbers = #tpu.dot_dimension_numbers<[1], [0], [0], [1], [0, 0, 1, 1], [], []>} : vector<48x64xbf16>, vector<64x64xbf16>, vector<48x64xf32> -> vector<48x64xf32>
    %c0_3 = arith.constant 0 : index
    %c0_4 = arith.constant 0 : index
    %5 = vector.load %arg4[%c0_3, %c0_4] : memref<1x64xf32, #tpu.memory_space<vmem>>, vector<1x64xf32>
    %6 = vector.broadcast %5 : vector<1x64xf32> to vector<48x64xf32>
    %7 = arith.addf %4, %6 : vector<48x64xf32>
    %c0_5 = arith.constant 0 : index
    %c0_6 = arith.constant 0 : index
    %8 = vector.load %arg5[%c0_5, %c0_6] : memref<48x64xbf16, #tpu.memory_space<vmem>>, vector<48x64xbf16>
    %9 = arith.extf %8 : vector<48x64xbf16> to vector<48x64xf32>
    %10 = arith.addf %7, %9 : vector<48x64xf32>
    %11 = arith.truncf %10 : vector<48x64xf32> to vector<48x64xbf16>
    %c0_7 = arith.constant 0 : index
    %c0_8 = arith.constant 0 : index
    %12 = vector.load %arg6[%c0_7, %c0_8] : memref<48x64xbf16, #tpu.memory_space<vmem>>, vector<48x64xbf16>
    tpu.vector_store %arg6[%c0_7, %c0_8], %11 {strides = array<i32>} : memref<48x64xbf16, #tpu.memory_space<vmem>>, vector<48x64xbf16>,
    return
  }
  func.func @transform_0(%arg0: i32, %arg1: i32) -> (i32, i32) {
    %c0_i32 = arith.constant 0 : i32
    %c0_i32_0 = arith.constant 0 : i32
    return %arg0, %c0_i32 : i32, i32
  }
  func.func @transform_1(%arg0: i32, %arg1: i32) -> (i32, i32) {
    %c0_i32 = arith.constant 0 : i32
    %c0_i32_0 = arith.constant 0 : i32
    return %c0_i32, %arg1 : i32, i32
  }
  func.func @transform_2(%arg0: i32, %arg1: i32) -> (i32, i32) {
    %c0_i32 = arith.constant 0 : i32
    %c0_i32_0 = arith.constant 0 : i32
    return %c0_i32, %arg1 : i32, i32
  }
  func.func @transform_3(%arg0: i32, %arg1: i32) -> (i32, i32) {
    %c0_i32 = arith.constant 0 : i32
    return %arg0, %arg1 : i32, i32
  }
  func.func @transform_4(%arg0: i32, %arg1: i32) -> (i32, i32) {
    %c0_i32 = arith.constant 0 : i32
    return %arg0, %arg1 : i32, i32
  }
}

module attributes {stable_mosaic.version = 11 : i64} {
  func.func @kernel(%arg0: i32, %arg1: i32, %arg2: memref<48x64xbf16, #tpu.memory_space<vmem>>, %arg3: memref<64x256xbf16, #tpu.memory_space<vmem>>, %arg4: memref<1x256xf32, #tpu.memory_space<vmem>>, %arg5: memref<1x64xf32, #tpu.memory_space<vmem>>, %arg6: memref<1x64xf32, #tpu.memory_space<vmem>>, %arg7: memref<48x256xbf16, #tpu.memory_space<vmem>>) attributes {dimension_semantics = [#tpu.dimension_semantics<parallel>, #tpu.dimension_semantics<parallel>], iteration_bounds = array<i64: 1, 1>, scalar_prefetch = 0 : i64, scratch_operands = 0 : i64, tpu.core_type = #tpu.core_type<tc>, window_params = [{transform_indices = @transform_0, window_bounds = array<i64: 48, 64>}, {transform_indices = @transform_1, window_bounds = array<i64: 64, 256>}, {transform_indices = @transform_2, window_bounds = array<i64: 1, 256>}, {pipeline_mode = #tpu.pipeline_mode<synchronous>, transform_indices = @transform_3, window_bounds = array<i64: 1, 64>}, {pipeline_mode = #tpu.pipeline_mode<synchronous>, transform_indices = @transform_4, window_bounds = array<i64: 1, 64>}, {transform_indices = @transform_5, window_bounds = array<i64: 48, 256>}]} {
    %c0 = arith.constant 0 : index
    %c0_0 = arith.constant 0 : index
    %0 = vector.load %arg2[%c0, %c0_0] : memref<48x64xbf16, #tpu.memory_space<vmem>>, vector<48x64xbf16>
    %1 = arith.extf %0 : vector<48x64xbf16> to vector<48x64xf32>
    %cst = arith.constant dense<0.000000e+00> : vector<48xf32>
    %2 = vector.multi_reduction <add>, %1, %cst [1] : vector<48x64xf32> to vector<48xf32>
    %3 = vector.shape_cast %2 : vector<48xf32> to vector<48x1xf32>
    %cst_1 = arith.constant 6.400000e+01 : f32
    %4 = vector.broadcast %cst_1 : f32 to vector<48x1xf32>
    %5 = arith.divf %3, %4 : vector<48x1xf32>
    %6 = vector.broadcast %5 : vector<48x1xf32> to vector<48x64xf32>
    %7 = arith.subf %1, %6 : vector<48x64xf32>
    %8 = arith.mulf %7, %7 : vector<48x64xf32>
    %cst_2 = arith.constant dense<0.000000e+00> : vector<48xf32>
    %9 = vector.multi_reduction <add>, %8, %cst_2 [1] : vector<48x64xf32> to vector<48xf32>
    %10 = vector.shape_cast %9 : vector<48xf32> to vector<48x1xf32>
    %cst_3 = arith.constant 6.400000e+01 : f32
    %11 = vector.broadcast %cst_3 : f32 to vector<48x1xf32>
    %12 = arith.divf %10, %11 : vector<48x1xf32>
    %13 = vector.broadcast %5 : vector<48x1xf32> to vector<48x64xf32>
    %14 = arith.subf %1, %13 : vector<48x64xf32>
    %cst_4 = arith.constant 9.99999974E-6 : f32
    %15 = vector.broadcast %cst_4 : f32 to vector<48x1xf32>
    %16 = arith.addf %12, %15 : vector<48x1xf32>
    %17 = math.rsqrt %16 : vector<48x1xf32>
    %18 = vector.broadcast %17 : vector<48x1xf32> to vector<48x64xf32>
    %19 = arith.mulf %14, %18 : vector<48x64xf32>
    %c0_5 = arith.constant 0 : index
    %c0_6 = arith.constant 0 : index
    %20 = vector.load %arg5[%c0_5, %c0_6] : memref<1x64xf32, #tpu.memory_space<vmem>>, vector<1x64xf32>
    %21 = vector.broadcast %20 : vector<1x64xf32> to vector<48x64xf32>
    %22 = arith.mulf %19, %21 : vector<48x64xf32>
    %c0_7 = arith.constant 0 : index
    %c0_8 = arith.constant 0 : index
    %23 = vector.load %arg6[%c0_7, %c0_8] : memref<1x64xf32, #tpu.memory_space<vmem>>, vector<1x64xf32>
    %24 = vector.broadcast %23 : vector<1x64xf32> to vector<48x64xf32>
    %25 = arith.addf %22, %24 : vector<48x64xf32>
    %26 = arith.truncf %25 : vector<48x64xf32> to vector<48x64xbf16>
    %c0_9 = arith.constant 0 : index
    %c0_10 = arith.constant 0 : index
    %27 = vector.load %arg3[%c0_9, %c0_10] : memref<64x256xbf16, #tpu.memory_space<vmem>>, vector<64x256xbf16>
    %cst_11 = arith.constant dense<0.000000e+00> : vector<48x256xf32>
    %28 = tpu.matmul %26, %27, %cst_11 {dimension_numbers = #tpu.dot_dimension_numbers<[1], [0], [0], [1], [0, 0, 1, 1], [], []>} : vector<48x64xbf16>, vector<64x256xbf16>, vector<48x256xf32> -> vector<48x256xf32>
    %c0_12 = arith.constant 0 : index
    %c0_13 = arith.constant 0 : index
    %29 = vector.load %arg4[%c0_12, %c0_13] : memref<1x256xf32, #tpu.memory_space<vmem>>, vector<1x256xf32>
    %30 = vector.broadcast %29 : vector<1x256xf32> to vector<48x256xf32>
    %31 = arith.addf %28, %30 : vector<48x256xf32>
    %cst_14 = arith.constant 1.702000e+00 : f32
    %32 = vector.broadcast %cst_14 : f32 to vector<48x256xf32>
    %33 = arith.mulf %32, %31 : vector<48x256xf32>
    %34 = arith.negf %33 : vector<48x256xf32>
    %35 = math.exp %34 : vector<48x256xf32>
    %cst_15 = arith.constant 1.000000e+00 : f32
    %36 = vector.broadcast %cst_15 : f32 to vector<48x256xf32>
    %37 = arith.addf %36, %35 : vector<48x256xf32>
    %38 = arith.divf %36, %37 : vector<48x256xf32>
    %39 = arith.mulf %31, %38 : vector<48x256xf32>
    %40 = arith.truncf %39 : vector<48x256xf32> to vector<48x256xbf16>
    %c0_16 = arith.constant 0 : index
    %c0_17 = arith.constant 0 : index
    %41 = vector.load %arg7[%c0_16, %c0_17] : memref<48x256xbf16, #tpu.memory_space<vmem>>, vector<48x256xbf16>
    tpu.vector_store %arg7[%c0_16, %c0_17], %40 {strides = array<i32>} : memref<48x256xbf16, #tpu.memory_space<vmem>>, vector<48x256xbf16>,
    return
  }
  func.func @transform_0(%arg0: i32, %arg1: i32) -> (i32, i32) {
    %c0_i32 = arith.constant 0 : i32
    %c0_i32_0 = arith.constant 0 : i32
    return %arg0, %c0_i32 : i32, i32
  }
  func.func @transform_1(%arg0: i32, %arg1: i32) -> (i32, i32) {
    %c0_i32 = arith.constant 0 : i32
    %c0_i32_0 = arith.constant 0 : i32
    return %c0_i32, %arg1 : i32, i32
  }
  func.func @transform_2(%arg0: i32, %arg1: i32) -> (i32, i32) {
    %c0_i32 = arith.constant 0 : i32
    %c0_i32_0 = arith.constant 0 : i32
    return %c0_i32, %arg1 : i32, i32
  }
  func.func @transform_3(%arg0: i32, %arg1: i32) -> (i32, i32) {
    %c0_i32 = arith.constant 0 : i32
    %c0_i32_0 = arith.constant 0 : i32
    %c0_i32_1 = arith.constant 0 : i32
    return %c0_i32, %c0_i32_0 : i32, i32
  }
  func.func @transform_4(%arg0: i32, %arg1: i32) -> (i32, i32) {
    %c0_i32 = arith.constant 0 : i32
    %c0_i32_0 = arith.constant 0 : i32
    %c0_i32_1 = arith.constant 0 : i32
    return %c0_i32, %c0_i32_0 : i32, i32
  }
  func.func @transform_5(%arg0: i32, %arg1: i32) -> (i32, i32) {
    %c0_i32 = arith.constant 0 : i32
    return %arg0, %arg1 : i32, i32
  }
}

module attributes {stable_mosaic.version = 11 : i64} {
  func.func @kernel(%arg0: i32, %arg1: i32, %arg2: memref<48x256xbf16, #tpu.memory_space<vmem>>, %arg3: memref<256x64xbf16, #tpu.memory_space<vmem>>, %arg4: memref<1x64xf32, #tpu.memory_space<vmem>>, %arg5: memref<48x64xbf16, #tpu.memory_space<vmem>>, %arg6: memref<48x64xbf16, #tpu.memory_space<vmem>>) attributes {dimension_semantics = [#tpu.dimension_semantics<parallel>, #tpu.dimension_semantics<parallel>], iteration_bounds = array<i64: 1, 1>, scalar_prefetch = 0 : i64, scratch_operands = 0 : i64, tpu.core_type = #tpu.core_type<tc>, window_params = [{transform_indices = @transform_0, window_bounds = array<i64: 48, 256>}, {transform_indices = @transform_1, window_bounds = array<i64: 256, 64>}, {transform_indices = @transform_2, window_bounds = array<i64: 1, 64>}, {transform_indices = @transform_3, window_bounds = array<i64: 48, 64>}, {transform_indices = @transform_4, window_bounds = array<i64: 48, 64>}]} {
    %c0 = arith.constant 0 : index
    %c0_0 = arith.constant 0 : index
    %0 = vector.load %arg2[%c0, %c0_0] : memref<48x256xbf16, #tpu.memory_space<vmem>>, vector<48x256xbf16>
    %1 = arith.extf %0 : vector<48x256xbf16> to vector<48x256xf32>
    %2 = arith.truncf %1 : vector<48x256xf32> to vector<48x256xbf16>
    %c0_1 = arith.constant 0 : index
    %c0_2 = arith.constant 0 : index
    %3 = vector.load %arg3[%c0_1, %c0_2] : memref<256x64xbf16, #tpu.memory_space<vmem>>, vector<256x64xbf16>
    %cst = arith.constant dense<0.000000e+00> : vector<48x64xf32>
    %4 = tpu.matmul %2, %3, %cst {dimension_numbers = #tpu.dot_dimension_numbers<[1], [0], [0], [1], [0, 0, 1, 1], [], []>} : vector<48x256xbf16>, vector<256x64xbf16>, vector<48x64xf32> -> vector<48x64xf32>
    %c0_3 = arith.constant 0 : index
    %c0_4 = arith.constant 0 : index
    %5 = vector.load %arg4[%c0_3, %c0_4] : memref<1x64xf32, #tpu.memory_space<vmem>>, vector<1x64xf32>
    %6 = vector.broadcast %5 : vector<1x64xf32> to vector<48x64xf32>
    %7 = arith.addf %4, %6 : vector<48x64xf32>
    %c0_5 = arith.constant 0 : index
    %c0_6 = arith.constant 0 : index
    %8 = vector.load %arg5[%c0_5, %c0_6] : memref<48x64xbf16, #tpu.memory_space<vmem>>, vector<48x64xbf16>
    %9 = arith.extf %8 : vector<48x64xbf16> to vector<48x64xf32>
    %10 = arith.addf %7, %9 : vector<48x64xf32>
    %11 = arith.truncf %10 : vector<48x64xf32> to vector<48x64xbf16>
    %c0_7 = arith.constant 0 : index
    %c0_8 = arith.constant 0 : index
    %12 = vector.load %arg6[%c0_7, %c0_8] : memref<48x64xbf16, #tpu.memory_space<vmem>>, vector<48x64xbf16>
    tpu.vector_store %arg6[%c0_7, %c0_8], %11 {strides = array<i32>} : memref<48x64xbf16, #tpu.memory_space<vmem>>, vector<48x64xbf16>,
    return
  }
  func.func @transform_0(%arg0: i32, %arg1: i32) -> (i32, i32) {
    %c0_i32 = arith.constant 0 : i32
    %c0_i32_0 = arith.constant 0 : i32
    return %arg0, %c0_i32 : i32, i32
  }
  func.func @transform_1(%arg0: i32, %arg1: i32) -> (i32, i32) {
    %c0_i32 = arith.constant 0 : i32
    %c0_i32_0 = arith.constant 0 : i32
    return %c0_i32, %arg1 : i32, i32
  }
  func.func @transform_2(%arg0: i32, %arg1: i32) -> (i32, i32) {
    %c0_i32 = arith.constant 0 : i32
    %c0_i32_0 = arith.constant 0 : i32
    return %c0_i32, %arg1 : i32, i32
  }
  func.func @transform_3(%arg0: i32, %arg1: i32) -> (i32, i32) {
    %c0_i32 = arith.constant 0 : i32
    return %arg0, %arg1 : i32, i32
  }
  func.func @transform_4(%arg0: i32, %arg1: i32) -> (i32, i32) {
    %c0_i32 = arith.constant 0 : i32
    return %arg0, %arg1 : i32, i32
  }
}

module attributes {stable_mosaic.version = 11 : i64} {
  func.func @kernel(%arg0: i32, %arg1: i32, %arg2: memref<3x64xbf16, #tpu.memory_space<vmem>>, %arg3: memref<64x64xbf16, #tpu.memory_space<vmem>>, %arg4: memref<1x64xf32, #tpu.memory_space<vmem>>, %arg5: memref<1x64xf32, #tpu.memory_space<vmem>>, %arg6: memref<3x64xf32, #tpu.memory_space<vmem>>) attributes {dimension_semantics = [#tpu.dimension_semantics<parallel>, #tpu.dimension_semantics<parallel>], iteration_bounds = array<i64: 1, 1>, scalar_prefetch = 0 : i64, scratch_operands = 0 : i64, tpu.core_type = #tpu.core_type<tc>, window_params = [{transform_indices = @transform_0, window_bounds = array<i64: 3, 64>}, {transform_indices = @transform_1, window_bounds = array<i64: 64, 64>}, {pipeline_mode = #tpu.pipeline_mode<synchronous>, transform_indices = @transform_2, window_bounds = array<i64: 1, 64>}, {pipeline_mode = #tpu.pipeline_mode<synchronous>, transform_indices = @transform_3, window_bounds = array<i64: 1, 64>}, {transform_indices = @transform_4, window_bounds = array<i64: 3, 64>}]} {
    %c0 = arith.constant 0 : index
    %c0_0 = arith.constant 0 : index
    %0 = vector.load %arg2[%c0, %c0_0] : memref<3x64xbf16, #tpu.memory_space<vmem>>, vector<3x64xbf16>
    %1 = arith.extf %0 : vector<3x64xbf16> to vector<3x64xf32>
    %cst = arith.constant dense<0.000000e+00> : vector<3xf32>
    %2 = vector.multi_reduction <add>, %1, %cst [1] : vector<3x64xf32> to vector<3xf32>
    %3 = vector.shape_cast %2 : vector<3xf32> to vector<3x1xf32>
    %cst_1 = arith.constant 6.400000e+01 : f32
    %4 = vector.broadcast %cst_1 : f32 to vector<3x1xf32>
    %5 = arith.divf %3, %4 : vector<3x1xf32>
    %6 = vector.broadcast %5 : vector<3x1xf32> to vector<3x64xf32>
    %7 = arith.subf %1, %6 : vector<3x64xf32>
    %8 = arith.mulf %7, %7 : vector<3x64xf32>
    %cst_2 = arith.constant dense<0.000000e+00> : vector<3xf32>
    %9 = vector.multi_reduction <add>, %8, %cst_2 [1] : vector<3x64xf32> to vector<3xf32>
    %10 = vector.shape_cast %9 : vector<3xf32> to vector<3x1xf32>
    %cst_3 = arith.constant 6.400000e+01 : f32
    %11 = vector.broadcast %cst_3 : f32 to vector<3x1xf32>
    %12 = arith.divf %10, %11 : vector<3x1xf32>
    %13 = vector.broadcast %5 : vector<3x1xf32> to vector<3x64xf32>
    %14 = arith.subf %1, %13 : vector<3x64xf32>
    %cst_4 = arith.constant 9.99999974E-6 : f32
    %15 = vector.broadcast %cst_4 : f32 to vector<3x1xf32>
    %16 = arith.addf %12, %15 : vector<3x1xf32>
    %17 = math.rsqrt %16 : vector<3x1xf32>
    %18 = vector.broadcast %17 : vector<3x1xf32> to vector<3x64xf32>
    %19 = arith.mulf %14, %18 : vector<3x64xf32>
    %c0_5 = arith.constant 0 : index
    %c0_6 = arith.constant 0 : index
    %20 = vector.load %arg4[%c0_5, %c0_6] : memref<1x64xf32, #tpu.memory_space<vmem>>, vector<1x64xf32>
    %21 = vector.broadcast %20 : vector<1x64xf32> to vector<3x64xf32>
    %22 = arith.mulf %19, %21 : vector<3x64xf32>
    %c0_7 = arith.constant 0 : index
    %c0_8 = arith.constant 0 : index
    %23 = vector.load %arg5[%c0_7, %c0_8] : memref<1x64xf32, #tpu.memory_space<vmem>>, vector<1x64xf32>
    %24 = vector.broadcast %23 : vector<1x64xf32> to vector<3x64xf32>
    %25 = arith.addf %22, %24 : vector<3x64xf32>
    %26 = arith.truncf %25 : vector<3x64xf32> to vector<3x64xbf16>
    %c0_9 = arith.constant 0 : index
    %c0_10 = arith.constant 0 : index
    %27 = vector.load %arg3[%c0_9, %c0_10] : memref<64x64xbf16, #tpu.memory_space<vmem>>, vector<64x64xbf16>
    %cst_11 = arith.constant dense<0.000000e+00> : vector<3x64xf32>
    %28 = tpu.matmul %26, %27, %cst_11 {dimension_numbers = #tpu.dot_dimension_numbers<[1], [0], [0], [1], [0, 0, 1, 1], [], []>} : vector<3x64xbf16>, vector<64x64xbf16>, vector<3x64xf32> -> vector<3x64xf32>
    %c0_12 = arith.constant 0 : index
    %c0_13 = arith.constant 0 : index
    %29 = vector.load %arg6[%c0_12, %c0_13] : memref<3x64xf32, #tpu.memory_space<vmem>>, vector<3x64xf32>
    tpu.vector_store %arg6[%c0_12, %c0_13], %28 {strides = array<i32>} : memref<3x64xf32, #tpu.memory_space<vmem>>, vector<3x64xf32>,
    return
  }
  func.func @transform_0(%arg0: i32, %arg1: i32) -> (i32, i32) {
    %c0_i32 = arith.constant 0 : i32
    %c0_i32_0 = arith.constant 0 : i32
    return %arg0, %c0_i32 : i32, i32
  }
  func.func @transform_1(%arg0: i32, %arg1: i32) -> (i32, i32) {
    %c0_i32 = arith.constant 0 : i32
    %c0_i32_0 = arith.constant 0 : i32
    return %c0_i32, %arg1 : i32, i32
  }
  func.func @transform_2(%arg0: i32, %arg1: i32) -> (i32, i32) {
    %c0_i32 = arith.constant 0 : i32
    %c0_i32_0 = arith.constant 0 : i32
    %c0_i32_1 = arith.constant 0 : i32
    return %c0_i32, %c0_i32_0 : i32, i32
  }
  func.func @transform_3(%arg0: i32, %arg1: i32) -> (i32, i32) {
    %c0_i32 = arith.constant 0 : i32
    %c0_i32_0 = arith.constant 0 : i32
    %c0_i32_1 = arith.constant 0 : i32
    return %c0_i32, %c0_i32_0 : i32, i32
  }
  func.func @transform_4(%arg0: i32, %arg1: i32) -> (i32, i32) {
    %c0_i32 = arith.constant 0 : i32
    return %arg0, %arg1 : i32, i32
  }
}

module attributes {stable_mosaic.version = 11 : i64} {
  func.func @kernel(%arg0: memref<2x64xf32, #tpu.memory_space<vmem>>, %arg1: memref<3x64xf32, #tpu.memory_space<vmem>>, %arg2: memref<1x1xf32, #tpu.memory_space<vmem>>, %arg3: memref<2x3xf32, #tpu.memory_space<vmem>>) attributes {dimension_semantics = [], scalar_prefetch = 0 : i64, scratch_operands = 0 : i64, tpu.core_type = #tpu.core_type<tc>} {
    %c0 = arith.constant 0 : index
    %c0_0 = arith.constant 0 : index
    %0 = vector.load %arg1[%c0, %c0_0] : memref<3x64xf32, #tpu.memory_space<vmem>>, vector<3x64xf32>
    %1 = arith.mulf %0, %0 : vector<3x64xf32>
    %cst = arith.constant dense<0.000000e+00> : vector<3xf32>
    %2 = vector.multi_reduction <add>, %1, %cst [1] : vector<3x64xf32> to vector<3xf32>
    %3 = vector.shape_cast %2 : vector<3xf32> to vector<3x1xf32>
    %4 = math.rsqrt %3 : vector<3x1xf32>
    %5 = vector.broadcast %4 : vector<3x1xf32> to vector<3x64xf32>
    %6 = arith.mulf %0, %5 : vector<3x64xf32>
    %c0_1 = arith.constant 0 : index
    %c0_2 = arith.constant 0 : index
    %7 = vector.load %arg0[%c0_1, %c0_2] : memref<2x64xf32, #tpu.memory_space<vmem>>, vector<2x64xf32>
    %8 = arith.truncf %7 : vector<2x64xf32> to vector<2x64xbf16>
    %9 = arith.truncf %6 : vector<3x64xf32> to vector<3x64xbf16>
    %cst_3 = arith.constant dense<0.000000e+00> : vector<2x3xf32>
    %10 = tpu.matmul %8, %9, %cst_3 {dimension_numbers = #tpu.dot_dimension_numbers<[1], [1], [0], [0], [0, 0, 1, 0], [], []>} : vector<2x64xbf16>, vector<3x64xbf16>, vector<2x3xf32> -> vector<2x3xf32>
    %c0_4 = arith.constant 0 : index
    %c0_5 = arith.constant 0 : index
    %11 = vector.load %arg2[%c0_4, %c0_5] : memref<1x1xf32, #tpu.memory_space<vmem>>, vector<1x1xf32>
    %12 = vector.extract %11[0, 0] : f32 from vector<1x1xf32>
    %13 = math.exp %12 : f32
    %14 = vector.broadcast %13 : f32 to vector<2x3xf32>
    %15 = arith.mulf %14, %10 : vector<2x3xf32>
    %c0_6 = arith.constant 0 : index
    %c0_7 = arith.constant 0 : index
    %16 = vector.load %arg3[%c0_6, %c0_7] : memref<2x3xf32, #tpu.memory_space<vmem>>, vector<2x3xf32>
    tpu.vector_store %arg3[%c0_6, %c0_7], %15 {strides = array<i32>} : memref<2x3xf32, #tpu.memory_space<vmem>>, vector<2x3xf32>,
    return
  }
}

</mosaic_0001>

<bundles_post_ra>
// kernel: _lambda_.26
= control target key start
LH: loop header
LB: loop body
LE: loop exit
PB: predicated region body
PF: predicated region fallthrough
CT: control target
= control target key end

     0   :  { %vm24_vm0 = vcmask 523264   ;;  %vm37_vm1 = vcmask 517120   ;;  %vm137_vm2 = vcmask 519168   ;;  %vm142_vm3 = vcmask 516096   ;;  %s243_s0 = inlined_call_operand.vmem [shape: bf16[34,64], index: 0, kind: input, shape index: {}]   ;;  %s244_s1 = inlined_call_operand.vmem [shape: f32[1,64], index: 1, kind: input, shape index: {}]   ;;  %s245_s2 = inlined_call_operand.vmem [shape: f32[1,64], index: 2, kind: input, shape index: {}]   ;;  %s246_s3 = inlined_call_operand.vmem [shape: bf16[34,64], index: 3, kind: output, shape index: {}]  }
   0x1   :  { %v161_v0 = vld [vmem:[%s243_s0] sm:$0xff]   ;;  %v168_v1 = vld [vmem:[%s243_s0 + $0x8] sm:$0xff]   ;;  %v18_v6 = vld [vmem:[%s243_s0 + $0x10] sm:$0x1] }
   0x2   :  { %v162_v2 = vunpack.c.l.bf16 %v161_v0  ;;  %v166_v3 = vunpack.c.l.bf16 %v168_v1  ;;  %v163_v4 = vunpack.c.h.bf16 %v161_v0  ;;  %v167_v5 = vunpack.c.h.bf16 %v168_v1  ;;  %v148_v54 = vld [vmem:[%s244_s1] ss:$0 sm:$0xff] }
   0x3   :  { %v23_v11 = vunpack.c.l.bf16 %v18_v6  ;;  %v149_v56 = vld [vmem:[%s245_s2] ss:$0 sm:$0xff] }
   0x4   :  { %v25_v7 = vsel %vm24_vm0, %v162_v2, 0.0  ;;  %v31_v8 = vsel %vm24_vm0, %v166_v3, 0.0  ;;  %v28_v9 = vsel %vm24_vm0, %v163_v4, 0.0  ;;  %v34_v10 = vsel %vm24_vm0, %v167_v5, 0.0 }
   0x5   :  { %26 = vadd.xlane.f32.xlu0 %v25_v7  ;;  %32 = vadd.xlane.f32.xlu1 %v31_v8  ;;  %v38_v12 = vsel %vm37_vm1, %v23_v11, 0.0 }
   0x9   :  { %29 = vadd.xlane.f32.xlu0 %v28_v9  ;;  %35 = vadd.xlane.f32.xlu1 %v34_v10 }
   0xd   :  { %39 = vadd.xlane.f32.xlu0 %v38_v12 }
  0x8e   :  { %v27_v13 = vpop.xlane.xlu0 %26  ;;  %v33_v14 = vpop.xlane.xlu1 %32 }
  0x8f   :  { %v42_v15 = vmul.f32 0.015625, %v27_v13  ;;  %v44_v16 = vmul.f32 0.015625, %v33_v14 }
  0x91   :  { %v47_v17 = vsub.f32 %v162_v2, %v42_v15  ;;  %v49_v18 = vsub.f32 %v166_v3, %v44_v16 }
  0x92   :  { %v30_v19 = vpop.xlane.xlu0 %29  ;;  %v36_v20 = vpop.xlane.xlu1 %35 }
  0x93   :  { %v43_v21 = vmul.f32 0.015625, %v30_v19  ;;  %v45_v22 = vmul.f32 0.015625, %v36_v20  ;;  %v52_v23 = vmul.f32 %v47_v17, %v47_v17  ;;  %v54_v24 = vmul.f32 %v49_v18, %v49_v18 }
  0x95   :  { %v48_v25 = vsub.f32 %v163_v4, %v43_v21  ;;  %v50_v26 = vsub.f32 %v167_v5, %v45_v22  ;;  %v57_v27 = vsel %vm24_vm0, %v52_v23, 0.0  ;;  %v63_v30 = vsel %vm24_vm0, %v54_v24, 0.0 }
  0x96   :  { %58 = vadd.xlane.f32.xlu1 %v57_v27  ;;  %v40_v28 = vpop.xlane.xlu0 %39 }
  0x97   :  { %v46_v29 = vmul.f32 0.015625, %v40_v28  ;;  %v53_v31 = vmul.f32 %v48_v25, %v48_v25  ;;  %v55_v32 = vmul.f32 %v50_v26, %v50_v26 }
  0x99   :  { %v51_v33 = vsub.f32 %v23_v11, %v46_v29  ;;  %v60_v34 = vsel %vm24_vm0, %v53_v31, 0.0  ;;  %v66_v35 = vsel %vm24_vm0, %v55_v32, 0.0 }
  0x9a   :  { %64 = vadd.xlane.f32.xlu1 %v63_v30  ;;  %61 = vadd.xlane.f32.xlu0 %v60_v34 }
  0x9b   :  { %v56_v36 = vmul.f32 %v51_v33, %v51_v33 }
  0x9d   :  { %v69_v37 = vsel %vm37_vm1, %v56_v36, 0.0 }
  0x9e   :  { %67 = vadd.xlane.f32.xlu0 %v66_v35  ;;  %70 = vadd.xlane.f32.xlu1 %v69_v37 }
 0x11f   :  { %v59_v38 = vpop.xlane.xlu1 %58 }
 0x120   :  { %v72_v39 = vmul.f32 0.015625, %v59_v38 }
 0x122   :  { %v77_v40 = vadd.f32 1e-05, %v72_v39 }
 0x123   :  { %v65_v41 = vpop.xlane.xlu1 %64  ;;  %v62_v42 = vpop.xlane.xlu0 %61 }
 0x124   :  { %169 = vrsqrt.f32 %v77_v40  ;;  %v74_v43 = vmul.f32 0.015625, %v65_v41  ;;  %v73_v44 = vmul.f32 0.015625, %v62_v42 }
 0x126   :  { %v79_v45 = vadd.f32 1e-05, %v74_v43  ;;  %v78_v46 = vadd.f32 1e-05, %v73_v44 }
 0x127   :  { %v71_v47 = vpop.xlane.xlu1 %70  ;;  %v68_v48 = vpop.xlane.xlu0 %67 }
 0x128   :  { %171 = vrsqrt.f32 %v79_v45  ;;  %v76_v49 = vmul.f32 0.015625, %v71_v47  ;;  %v75_v50 = vmul.f32 0.015625, %v68_v48 }
 0x129   :  { %173 = vrsqrt.f32 %v78_v46 }
 0x12a   :  { %v81_v51 = vadd.f32 1e-05, %v76_v49  ;;  %v80_v52 = vadd.f32 1e-05, %v75_v50 }
 0x12c   :  { %175 = vrsqrt.f32 %v81_v51 }
 0x12d   :  { %177 = vrsqrt.f32 %v80_v52 }
 0x131   :  { %v170_v53 = vpop.eup %169 }
 0x132   :  { %v87_v55 = vmul.f32 %v170_v53, %v47_v17 }
 0x134   :  { %v99_v57 = vmul.f32 %v148_v54, %v87_v55 }
 0x135   :  { %v172_v58 = vpop.eup %171 }
 0x136   :  { %v174_v59 = vpop.eup %173  ;;  %v111_v60 = vadd.f32 %v149_v56, %v99_v57  ;;  %v89_v61 = vmul.f32 %v172_v58, %v49_v18 }
 0x137   :  { %v88_v62 = vmul.f32 %v174_v59, %v48_v25 }
 0x138   :  { %v155_v63 = vpack.c.bf16 %v111_v60, %v111_v60  ;;  %v101_v0 = vmul.f32 %v148_v54, %v89_v61 }
 0x139   :  { %v176_v1 = vpop.eup %175  ;;  %v100_v2 = vmul.f32 %v148_v54, %v88_v62 }
 0x13a   :  { %v178_v3 = vpop.eup %177  ;;  %138 = vst.msk [vmem:[%s246_s3] sm:$0xf] %vm137_vm2, %v155_v63  ;;  %v113_v4 = vadd.f32 %v149_v56, %v101_v0  ;;  %v91_v5 = vmul.f32 %v176_v1, %v51_v33 }
 0x13b   :  { %v112_v6 = vadd.f32 %v149_v56, %v100_v2  ;;  %v90_v7 = vmul.f32 %v178_v3, %v50_v26 }
 0x13c   :  { %v157_v8 = vpack.c.bf16 %v113_v4, %v113_v4  ;;  %v103_v9 = vmul.f32 %v148_v54, %v91_v5 }
 0x13d   :  { %v156_v10 = vpack.c.bf16 %v112_v6, %v112_v6  ;;  %v102_v11 = vmul.f32 %v148_v54, %v90_v7 }
 0x13e   :  { %140 = vst.msk [vmem:[%s246_s3 + $0x8] sm:$0xf] %vm137_vm2, %v157_v8  ;;  %v115_v12 = vadd.f32 %v149_v56, %v103_v9 }
 0x13f   :  { %139 = vst.msk [vmem:[%s246_s3 + $0x4] sm:$0xf] %vm137_vm2, %v156_v10  ;;  %v114_v13 = vadd.f32 %v149_v56, %v102_v11 }
 0x140   :  { %v159_v14 = vpack.c.bf16 %v115_v12, %v115_v12 }
 0x141   :  { %v158_v15 = vpack.c.bf16 %v114_v13, %v114_v13 }
 0x142   :  { %143 = vst.msk [vmem:[%s246_s3 + $0x10] sm:$0x1] %vm142_vm3, %v159_v14 }
 0x143   :  { %141 = vst.msk [vmem:[%s246_s3 + $0xc] sm:$0xf] %vm137_vm2, %v158_v15 }

// kernel: _lambda_.25
= control target key start
LH: loop header
LB: loop body
LE: loop exit
PB: predicated region body
PF: predicated region fallthrough
CT: control target
= control target key end

     0   :  { %v280_v0 = vmov 0   ;;  %vm130_vm0 = vcmask 523264   ;;  %vm202_vm1 = vcmask 519168   ;;  %s380_s1 = inlined_call_operand.vmem [shape: bf16[192,64], index: 1, kind: input, shape index: {}]   ;;  %s381_s0 = inlined_call_operand.vmem [shape: bf16[32,192], index: 0, kind: input, shape index: {}]   ;;  %s382_s2 = inlined_call_operand.vmem [shape: bf16[32,64], index: 2, kind: output, shape index: {}]  }
   0x1   :  { %137 = vmatprep.subr.bf16.mxu0 %v280_v0  ;;  %237 = vmatprep.subr.bf16.mxu1 %v280_v0  ;;  %v262_v1 = vld [vmem:[%s380_s1 + $0x38] sm:$0xff]   ;;  %v263_v2 = vld [vmem:[%s380_s1 + $0x30] sm:$0xff]   ;;  %v264_v3 = vld [vmem:[%s380_s1 + $0x28] sm:$0xff]  }
   0x2   :  { %138 = vmatpush1.bf16.msra.mxu0 %v262_v1  ;;  %249 = vmatpush1.bf16.msra.mxu1 %v262_v1  ;;  %v265_v4 = vld [vmem:[%s380_s1 + $0x20] sm:$0xff]   ;;  %v266_v6 = vld [vmem:[%s380_s1 + $0x18] sm:$0xff]   ;;  %v267_v8 = vld [vmem:[%s380_s1 + $0x10] sm:$0xff]  }
   0x3   :  { %139 = vmatprep.subr.bf16.mxu0 %v280_v0  ;;  %238 = vmatprep.subr.bf16.mxu1 %v280_v0  ;;  %v276_v5 = vld [vmem:[%s381_s0 + $0x4] ss:$8 sps:$4 sm:$0xff]   ;;  %v279_v7 = vld [vmem:[%s381_s0 + $0x14] ss:$8 sps:$4 sm:$0xff]   ;;  %v274_v15 = vld [vmem:[%s381_s0] ss:$8 sps:$4 sm:$0xff]  }
   0x4   :  { %227 = vmatprep.mubr.msk.bf16.mxu0 %vm130_vm0, %v276_v5  ;;  %228 = vmatprep.mubr.msk.bf16.mxu1 %vm130_vm0, %v279_v7  ;;  %v268_v9 = vld [vmem:[%s380_s1 + $0x8] sm:$0xff]   ;;  %v269_v10 = vld [vmem:[%s380_s1] sm:$0xff]   ;;  %v270_v11 = vld [vmem:[%s380_s1 + $0x58] sm:$0xff]  }
   0x5   :  { %v271_v12 = vld [vmem:[%s380_s1 + $0x50] sm:$0xff]   ;;  %v272_v13 = vld [vmem:[%s380_s1 + $0x48] sm:$0xff]   ;;  %v273_v14 = vld [vmem:[%s380_s1 + $0x40] sm:$0xff]  }
   0x6   :  { %140 = vmatpush1.bf16.msra.mxu0 %v263_v2  ;;  %250 = vmatpush1.bf16.msra.mxu1 %v263_v2  ;;  %v277_v16 = vld [vmem:[%s381_s0 + $0x10] ss:$8 sps:$4 sm:$0xff]  }
   0x7   :  { %141 = vmatprep.subr.bf16.mxu0 %v280_v0  ;;  %239 = vmatprep.subr.bf16.mxu1 %v280_v0 }
   0xa   :  { %142 = vmatpush1.bf16.msra.mxu0 %v264_v3  ;;  %251 = vmatpush1.bf16.msra.mxu1 %v264_v3 }
   0xb   :  { %143 = vmatprep.subr.bf16.mxu0 %v280_v0  ;;  %240 = vmatprep.subr.bf16.mxu1 %v280_v0 }
   0xe   :  { %144 = vmatpush1.bf16.msra.mxu0 %v265_v4  ;;  %252 = vmatpush1.bf16.msra.mxu1 %v265_v4 }
   0xf   :  { %145 = vmatprep.subr.bf16.mxu0 %v280_v0  ;;  %241 = vmatprep.subr.bf16.mxu1 %v280_v0 }
  0x12   :  { %146 = vmatpush1.bf16.msra.mxu0 %v266_v6  ;;  %253 = vmatpush1.bf16.msra.mxu1 %v266_v6 }
  0x13   :  { %147 = vmatprep.subr.bf16.mxu0 %v280_v0  ;;  %242 = vmatprep.subr.bf16.mxu1 %v280_v0 }
  0x16   :  { %148 = vmatpush1.bf16.msra.mxu0 %v267_v8  ;;  %254 = vmatpush1.bf16.msra.mxu1 %v267_v8 }
  0x17   :  { %149 = vmatprep.subr.bf16.mxu0 %v280_v0  ;;  %243 = vmatprep.subr.bf16.mxu1 %v280_v0 }
  0x1a   :  { %150 = vmatpush1.bf16.msra.mxu0 %v268_v9  ;;  %255 = vmatpush1.bf16.msra.mxu1 %v268_v9 }
  0x1b   :  { %151 = vmatprep.subr.bf16.mxu0 %v280_v0  ;;  %244 = vmatprep.subr.bf16.mxu1 %v280_v0 }
  0x1e   :  { %152 = vmatpush1.bf16.msra.mxu0 %v269_v10  ;;  %256 = vmatpush1.bf16.msra.mxu1 %v269_v10 }
  0x1f   :  { %161 = vmatprep.subr.bf16.mxu0 %v280_v0  ;;  %245 = vmatprep.subr.bf16.mxu1 %v280_v0 }
  0x22   :  { %162 = vmatpush2.bf16.msra.mxu0 %v270_v11  ;;  %257 = vmatpush2.bf16.msra.mxu1 %v270_v11 }
  0x23   :  { %163 = vmatprep.subr.bf16.mxu0 %v280_v0  ;;  %246 = vmatprep.subr.bf16.mxu1 %v280_v0 }
  0x26   :  { %164 = vmatpush2.bf16.msra.mxu0 %v271_v12  ;;  %258 = vmatpush2.bf16.msra.mxu1 %v271_v12 }
  0x27   :  { %165 = vmatprep.subr.bf16.mxu0 %v280_v0  ;;  %247 = vmatprep.subr.bf16.mxu1 %v280_v0 }
  0x2a   :  { %166 = vmatpush2.bf16.msra.mxu0 %v272_v13  ;;  %259 = vmatpush2.bf16.msra.mxu1 %v272_v13 }
  0x2b   :  { %167 = vmatprep.subr.bf16.mxu0 %v280_v0  ;;  %248 = vmatprep.subr.bf16.mxu1 %v280_v0 }
  0x2e   :  { %168 = vmatpush2.bf16.msra.mxu0 %v273_v14  ;;  %260 = vmatpush2.bf16.msra.mxu1 %v273_v14 }
  0x31   :  { %170 = vmatmul.mubr.bf16.vlgmr.msra.gmra.mxu0 %v274_v15  ;;  %178 = vmatmul.mubr.bf16.vlgmr.msra.gmra.mxu1 %v277_v16 }
  0xf1   :  { %v171_v17 = vpop.f32.mrf.mxu0  ;;  %v179_v18 = vpop.f32.mrf.mxu1 }
  0xf2   :  { %v233_v19 = vpack.c.bf16 %v171_v17, %v171_v17  ;;  %v235_v20 = vpack.c.bf16 %v179_v18, %v179_v18 }
  0xf3   :  { %v173_v21 = vpop.f32.mrf.mxu0  ;;  %v181_v22 = vpop.f32.mrf.mxu1 }
  0xf4   :  { %203 = vst.msk [vmem:[%s382_s2] sm:$0xf] %vm202_vm1, %v233_v19  ;;  %205 = vst.msk [vmem:[%s382_s2 + $0x8] sm:$0xf] %vm202_vm1, %v235_v20 }
  0xf5   :  { %v174_v23 = vpop.f32.mrf.mxu0  ;;  %v182_v24 = vpop.f32.mrf.mxu1 }
  0xf6   :  { %v234_v25 = vpack.c.bf16 %v174_v23, %v174_v23  ;;  %v236_v26 = vpack.c.bf16 %v182_v24, %v182_v24 }
  0xf7   :  { %v176_v27 = vpop.f32.mrf.mxu0  ;;  %v184_v28 = vpop.f32.mrf.mxu1 }
  0xf8   :  { %204 = vst.msk [vmem:[%s382_s2 + $0x4] sm:$0xf] %vm202_vm1, %v234_v25  ;;  %206 = vst.msk [vmem:[%s382_s2 + $0xc] sm:$0xf] %vm202_vm1, %v236_v26 }

// kernel: _lambda_.27
= control target key start
LH: loop header
LB: loop body
LE: loop exit
PB: predicated region body
PF: predicated region fallthrough
CT: control target
= control target key end

     0   :  { %vm31_vm0 = vcmask 523264   ;;  %vm44_vm1 = vcmask 517120   ;;  %v366_v40 = vmov 0   ;;  %vm288_vm2 = vcmask 1043456   ;;  %s507_s0 = inlined_call_operand.vmem [shape: bf16[34,64], index: 0, kind: input, shape index: {}]   ;;  %s508_s1 = inlined_call_operand.vmem [shape: bf16[64,192], index: 1, kind: input, shape index: {}]   ;;  %s509_s3 = inlined_call_operand.vmem [shape: f32[1,64], index: 3, kind: input, shape index: {}]   ;;  %s510_s4 = inlined_call_operand.vmem [shape: f32[1,64], index: 4, kind: input, shape index: {}]   ;;  %s511_s2 = inlined_call_operand.vmem [shape: f32[1,192], index: 2, kind: input, shape index: {}]   ;;  %s512_s5 = inlined_call_operand.vmem [shape: bf16[34,192], index: 5, kind: output, shape index: {}]  }
   0x1   :  { %v334_v0 = vld [vmem:[%s507_s0 + $0x8] sm:$0xff]   ;;  %v327_v1 = vld [vmem:[%s507_s0] sm:$0xff]   ;;  %v25_v5 = vld [vmem:[%s507_s0 + $0x10] sm:$0x1]  ;;  %237 = vmatprep.mubr.bf16.mxu1 %v366_v40  ;;  %227 = vmatprep.mubr.bf16.mxu0 %v366_v40  ;;  %vm289_vm3 = vcmask 523268   ;;  %vm295_vm5 = vcmask 1040384  }
   0x2   :  { %v332_v2 = vunpack.c.l.bf16 %v334_v0  ;;  %v333_v3 = vunpack.c.h.bf16 %v334_v0  ;;  %v328_v4 = vunpack.c.l.bf16 %v327_v1  ;;  %v329_v6 = vunpack.c.h.bf16 %v327_v1  ;;  %v344_v38 = vld [vmem:[%s508_s1 + $0x34] ss:$8 sps:$4 sm:$0xff]   ;;  %v346_v39 = vld [vmem:[%s508_s1 + $0x30] ss:$8 sps:$4 sm:$0xff]   ;;  %v347_v41 = vld [vmem:[%s508_s1 + $0x24] ss:$8 sps:$4 sm:$0xff]  }
   0x3   :  { %v30_v10 = vunpack.c.l.bf16 %v25_v5  ;;  %335 = vmatprep.subr.bf16.mxu1 %v344_v38  ;;  %203 = vmatprep.subr.bf16.mxu0 %v344_v38  ;;  %v349_v42 = vld [vmem:[%s508_s1 + $0x20] ss:$8 sps:$4 sm:$0xff]   ;;  %v350_v43 = vld [vmem:[%s508_s1 + $0x14] ss:$8 sps:$4 sm:$0xff]   ;;  %v352_v44 = vld [vmem:[%s508_s1 + $0x10] ss:$8 sps:$4 sm:$0xff]  }
   0x4   :  { %v38_v7 = vsel %vm31_vm0, %v332_v2, 0.0  ;;  %v32_v8 = vsel %vm31_vm0, %v328_v4, 0.0  ;;  %v41_v9 = vsel %vm31_vm0, %v333_v3, 0.0  ;;  %v35_v11 = vsel %vm31_vm0, %v329_v6, 0.0  ;;  %339 = vmatpush1.bf16.msra.mxu1 %v346_v39  ;;  %204 = vmatpush1.bf16.msra.mxu0 %v346_v39  ;;  %v353_v45 = vld [vmem:[%s508_s1 + $0x4] ss:$8 sps:$4 sm:$0xff]   ;;  %vm480_vm4 = vmor %vm289_vm3, %vm288_vm2 }
   0x5   :  { %39 = vadd.xlane.f32.xlu0 %v38_v7  ;;  %33 = vadd.xlane.f32.xlu1 %v32_v8  ;;  %v45_v12 = vsel %vm44_vm1, %v30_v10, 0.0  ;;  %v355_v46 = vld [vmem:[%s508_s1] ss:$8 sps:$4 sm:$0xff]   ;;  %vm296_vm6 = vcmask 520196  }
   0x6   :  { %336 = vmatprep.subr.bf16.mxu1 %v347_v41  ;;  %205 = vmatprep.subr.bf16.mxu0 %v347_v41  ;;  %v303_v0 = vld [vmem:[%s509_s3] ss:$0 sm:$0xff]  ;;  %vm297_vm7 = vmor %vm296_vm6, %vm295_vm5 }
   0x7   :  { %v304_v5 = vld [vmem:[%s510_s4] ss:$0 sm:$0xff] }
   0x8   :  { %340 = vmatpush1.bf16.msra.mxu1 %v349_v42  ;;  %206 = vmatpush1.bf16.msra.mxu0 %v349_v42 }
   0x9   :  { %42 = vadd.xlane.f32.xlu0 %v41_v9  ;;  %36 = vadd.xlane.f32.xlu1 %v35_v11 }
   0xa   :  { %337 = vmatprep.subr.bf16.mxu1 %v350_v43  ;;  %207 = vmatprep.subr.bf16.mxu0 %v350_v43 }
   0xc   :  { %341 = vmatpush1.bf16.msra.mxu1 %v352_v44  ;;  %208 = vmatpush1.bf16.msra.mxu0 %v352_v44 }
   0xd   :  { %46 = vadd.xlane.f32.xlu0 %v45_v12  ;;  %338 = vmatprep.subr.bf16.mxu1 %v353_v45 }
   0xe   :  { %209 = vmatprep.subr.bf16.mxu0 %v353_v45 }
  0x10   :  { %342 = vmatpush1.bf16.msra.mxu1 %v355_v46  ;;  %210 = vmatpush1.bf16.msra.mxu0 %v355_v46 }
  0x8e   :  { %v40_v13 = vpop.xlane.xlu0 %39  ;;  %v34_v14 = vpop.xlane.xlu1 %33 }
  0x8f   :  { %v51_v15 = vmul.f32 0.015625, %v40_v13  ;;  %v49_v16 = vmul.f32 0.015625, %v34_v14 }
  0x91   :  { %v411_v17 = vsub.f32 %v332_v2, %v51_v15  ;;  %v413_v18 = vsub.f32 %v328_v4, %v49_v16 }
  0x92   :  { %v43_v19 = vpop.xlane.xlu0 %42  ;;  %v37_v20 = vpop.xlane.xlu1 %36 }
  0x93   :  { %v52_v21 = vmul.f32 0.015625, %v43_v19  ;;  %v61_v22 = vmul.f32 %v411_v17, %v411_v17  ;;  %v50_v23 = vmul.f32 0.015625, %v37_v20  ;;  %v59_v24 = vmul.f32 %v413_v18, %v413_v18 }
  0x95   :  { %v419_v25 = vsub.f32 %v333_v3, %v52_v21  ;;  %v70_v26 = vsel %vm31_vm0, %v61_v22, 0.0  ;;  %v422_v27 = vsub.f32 %v329_v6, %v50_v23  ;;  %v64_v31 = vsel %vm31_vm0, %v59_v24, 0.0 }
  0x96   :  { %v47_v28 = vpop.xlane.xlu0 %46  ;;  %71 = vadd.xlane.f32.xlu1 %v70_v26  ;;  %v136_v23 = vlaneseq }
  0x97   :  { %v53_v29 = vmul.f32 0.015625, %v47_v28  ;;  %v62_v30 = vmul.f32 %v419_v25, %v419_v25  ;;  %v60_v32 = vmul.f32 %v422_v27, %v422_v27 }
  0x98   :  { %v137_v24 = vshrl.u32 %v136_v23, 7 }
  0x99   :  { %v429_v33 = vsub.f32 %v30_v10, %v53_v29  ;;  %v73_v34 = vsel %vm31_vm0, %v62_v30, 0.0  ;;  %v67_v36 = vsel %vm31_vm0, %v60_v32, 0.0 }
  0x9a   :  { %74 = vadd.xlane.f32.xlu0 %v73_v34  ;;  %65 = vadd.xlane.f32.xlu1 %v64_v31  ;;  %v142_v26 = vsub.s32 1, %v137_v24 }
  0x9b   :  { %v63_v35 = vmul.f32 %v429_v33, %v429_v33 }
  0x9d   :  { %v76_v37 = vsel %vm44_vm1, %v63_v35, 0.0 }
  0x9e   :  { %77 = vadd.xlane.f32.xlu1 %v76_v37  ;;  %68 = vadd.xlane.f32.xlu0 %v67_v36 }
 0x11f   :  { %v72_v47 = vpop.xlane.xlu1 %71 }
 0x120   :  { %v81_v48 = vmul.f32 0.015625, %v72_v47 }
 0x122   :  { %v86_v49 = vadd.f32 1e-05, %v81_v48 }
 0x123   :  { %v75_v50 = vpop.xlane.xlu0 %74  ;;  %v66_v51 = vpop.xlane.xlu1 %65 }
 0x124   :  { %356 = vrsqrt.f32 %v86_v49  ;;  %v82_v52 = vmul.f32 0.015625, %v75_v50  ;;  %v79_v53 = vmul.f32 0.015625, %v66_v51 }
 0x126   :  { %v87_v54 = vadd.f32 1e-05, %v82_v52  ;;  %v84_v55 = vadd.f32 1e-05, %v79_v53 }
 0x127   :  { %v69_v56 = vpop.xlane.xlu0 %68  ;;  %v78_v57 = vpop.xlane.xlu1 %77 }
 0x128   :  { %358 = vrsqrt.f32 %v87_v54  ;;  %v80_v58 = vmul.f32 0.015625, %v69_v56  ;;  %v83_v59 = vmul.f32 0.015625, %v78_v57 }
 0x129   :  { %360 = vrsqrt.f32 %v84_v55 }
 0x12a   :  { %v85_v60 = vadd.f32 1e-05, %v80_v58  ;;  %v88_v61 = vadd.f32 1e-05, %v83_v59 }
 0x12c   :  { %362 = vrsqrt.f32 %v85_v60 }
 0x12d   :  { %364 = vrsqrt.f32 %v88_v61 }
 0x131   :  { %v357_v62 = vpop.eup %356 }
 0x132   :  { %v96_v63 = vmul.f32 %v357_v62, %v411_v17 }
 0x134   :  { %v108_v4 = vmul.f32 %v303_v0, %v96_v63 }
 0x135   :  { %v359_v1 = vpop.eup %358 }
 0x136   :  { %v361_v2 = vpop.eup %360  ;;  %v97_v3 = vmul.f32 %v359_v1, %v419_v25  ;;  %v120_v10 = vadd.f32 %v304_v5, %v108_v4  ;;  %v138_v25 = vsub.s32 0, %v137_v24 }
 0x137   :  { %v94_v6 = vmul.f32 %v361_v2, %v413_v18 }
 0x138   :  { %v109_v7 = vmul.f32 %v303_v0, %v97_v3 }
 0x139   :  { %v363_v8 = vpop.eup %362  ;;  %v106_v13 = vmul.f32 %v303_v0, %v94_v6 }
 0x13a   :  { %v365_v9 = vpop.eup %364  ;;  %v121_v11 = vadd.f32 %v304_v5, %v109_v7  ;;  %v95_v12 = vmul.f32 %v363_v8, %v422_v27  ;;  %v134_v27 = vld [vmem:[%s511_s2] sm:$0x3] }
 0x13b   :  { %v98_v14 = vmul.f32 %v365_v9, %v429_v33  ;;  %v118_v19 = vadd.f32 %v304_v5, %v106_v13  ;;  %v139_v28 = vrot.slane %v134_v27, %v138_v25  ;;  %v143_v29 = vrot.slane %v134_v27, %v142_v26 }
 0x13c   :  { %v124_v15 = vpack.c.bf16 %v121_v11, %v120_v10  ;;  %v107_v16 = vmul.f32 %v303_v0, %v95_v12 }
 0x13d   :  { %v110_v17 = vmul.f32 %v303_v0, %v98_v14 }
 0x13e   :  { %314 = vmatmul.mubr.msk.bf16.vlgmr.msra.gmra.mxu1 %vm31_vm0, %v124_v15  ;;  %v119_v20 = vadd.f32 %v304_v5, %v107_v16 }
 0x13f   :  { %247 = vmatprep.mubr.bf16.mxu1 %v366_v40  ;;  %v122_v21 = vadd.f32 %v304_v5, %v110_v17 }
 0x140   :  { %v123_v18 = vpack.c.bf16 %v119_v20, %v118_v19 }
 0x141   :  { %v125_v22 = vpack.c.bf16 %v122_v21, %v122_v21 }
 0x142   :  { %313 = vmatmul.mubr.msk.bf16.vlgmr.msra.gmra.mxu0 %vm31_vm0, %v123_v18 }
 0x146   :  { %315 = vmatmul.mubr.msk.bf16.gmra.mxu1 %vm31_vm0, %v125_v22 }
 0x1fe   :  { %v239_v30 = vpop.f32.mrf.mxu1 }
 0x1ff   :  { %v240_v32 = vadd.f32 %v239_v30, %v139_v28 }
 0x200   :  { %v241_v31 = vpop.f32.mrf.mxu1 }
 0x201   :  { %v242_v33 = vadd.f32 %v241_v31, %v143_v29 }
 0x202   :  { %v229_v35 = vpop.f32.mrf.mxu0  ;;  %v243_v36 = vpop.f32.mrf.mxu1 }
 0x203   :  { %v323_v37 = vpack.c.bf16 %v242_v33, %v240_v32  ;;  %v230_v40 = vadd.f32 %v229_v35, %v139_v28  ;;  %v244_v41 = vadd.f32 %v243_v36, %v139_v28 }
 0x204   :  { %v231_v38 = vpop.f32.mrf.mxu0  ;;  %v245_v39 = vpop.f32.mrf.mxu1 }
 0x205   :  { %293 = vst.msk [vmem:[%s512_s5 + $0x10] sm:$0xff] %vm480_vm4, %v323_v37  ;;  %v232_v42 = vadd.f32 %v231_v38, %v143_v29  ;;  %v246_v43 = vadd.f32 %v245_v39, %v143_v29 }
 0x206   :  { %v233_v44 = vpop.f32.mrf.mxu0  ;;  %v249_v45 = vpop.f32.mrf.mxu1 }
 0x207   :  { %v321_v46 = vpack.c.bf16 %v232_v42, %v230_v40  ;;  %v324_v47 = vpack.c.bf16 %v246_v43, %v244_v41  ;;  %v234_v50 = vadd.f32 %v233_v44, %v139_v28  ;;  %v250_v51 = vadd.f32 %v249_v45, %v139_v28 }
 0x208   :  { %v235_v48 = vpop.f32.mrf.mxu0  ;;  %v251_v49 = vpop.f32.mrf.mxu1 }
 0x209   :  { %291 = vst.msk [vmem:[%s512_s5] sm:$0xff] %vm480_vm4, %v321_v46  ;;  %294 = vst.msk [vmem:[%s512_s5 + $0x18] sm:$0xff] %vm480_vm4, %v324_v47  ;;  %v236_v52 = vadd.f32 %v235_v48, %v143_v29  ;;  %v252_v53 = vadd.f32 %v251_v49, %v143_v29 }
 0x20a   :  { %v253_v54 = vpop.f32.mrf.mxu1 }
 0x20b   :  { %v322_v55 = vpack.c.bf16 %v236_v52, %v234_v50  ;;  %v325_v56 = vpack.c.bf16 %v252_v53, %v250_v51 }
 0x20c   :  { %v254_v57 = vpop.f32.mrf.mxu1 }
 0x20d   :  { %292 = vst.msk [vmem:[%s512_s5 + $0x8] sm:$0xff] %vm480_vm4, %v322_v55 }
 0x20e   :  { %298 = vst.msk [vmem:[%s512_s5 + $0x20] sm:$0x11] %vm297_vm7, %v325_v56 }

// kernel: _lambda_.28
= control target key start
LH: loop header
LB: loop body
LE: loop exit
PB: predicated region body
PF: predicated region fallthrough
CT: control target
= control target key end

     0   :  { %s1176_s6 = smov 0   ;;  %s1357_s0 = inlined_call_operand.vmem [shape: bf16[2,17,192], index: 0, kind: input, shape index: {}]   ;;  %s1358_s1 = inlined_call_operand.vmem [shape: bf16[2,17,64], index: 1, kind: output, shape index: {}]  }
   0x1 LB: > { %s926_s7 = sadd.s32 4294967295, %s1156_s6   ;;  %p930_p0 = scmp.ge.s32.totalorder %s1156_s6, 1  ;;  %s1156_s6 = sphi %s1176_s6, %s11_s6  }
   0x2   : > { %p87_p1 = scmp.lt.s32.totalorder %s1156_s6, 3 }
   0x4   : > { %p88_p2 = pnand %p930_p0, %p87_p1 }
   0x5   : > { %p107_p3 = scmp.lt.s32.totalorder (!%p88_p2), %s926_s7, 1  ;;  %s1158_s12 = smov (!%p88_p2), 64  }
   0x6   : > { %91 = sbr.rel (%p88_p2) target bundleno = 2583 (0xa17), region = 24  ;;  %s1159_s13 = smov (!%p88_p2), 112  }
   0x7   : > { %s1161_s14 = smov (!%p88_p2), 48   ;;  %s1162_s15 = smov (!%p88_p2), 32  }
   0x8   : > { %s1163_s16 = smov (!%p88_p2), 96   ;;  %s1164_s17 = smov (!%p88_p2), 16  }
   0x9   : > { %s1165_s18 = smov (!%p88_p2), 80  }
   0xb   : > { %s1360_s7 = smov (!%p107_p3, %s926_s7), 1  ;;  %vm141_vm0 = vcmask 130048   ;;  %vm209_vm1 = vcmask 131072   ;;  %vm202_vm2 = vcmask 138240   ;;  %vm251_vm3 = vcmask 1040384  }
   0xc   : > { %s1065_s8 = smul.u32 24, %s1360_s7  ;;  %v1160_v40 = vmov 0   ;;  %vm841_vm4 = vcmask 261120   ;;  %vm845_vm5 = vcmask 392192   ;;  %vm865_vm6 = vcmask 516096  }
   0xd   : > { %v1226_v41 = vsel %vm251_vm3, 65535, %v1160_v40  ;;  %s1066_s19 = smul.u32 12, %s1360_s7  ;;  %vm866_vm7 = vsmask.f32 256  ;;  %vm862_vm8 = vcmask 519168  }
   0xe   : > { %s111_s11 = scalar_lea.vmem %s1357_s0, %s1065_s8  ;;  %vm867_vm9 = vmand %vm865_vm6, %vm866_vm7 }
   0xf   : > { %v120_v0 = vld [vmem:[%s111_s11 + $0x10] sm:$0x11]  ;;  %v1190_v1 = vld [vmem:[%s111_s11] sm:$0xff]  ;;  %v1192_v2 = vld [vmem:[%s111_s11 + $0x8] sm:$0xff]  ;;  %s116_s22 = scalar_lea.vmem %s1358_s1, %s1066_s19 }
  0x10   : > { %v1194_v3 = vcombine.low %v120_v0, %v120_v0  ;;  %v121_v4 = vunpack.c.l.bf16 %v1190_v1  ;;  %v122_v5 = vunpack.c.l.bf16 %v1192_v2  ;;  %v1201_v6 = vcombine.low %v1190_v1, %v1192_v2 }
  0x11   : > { %v123_v13 = vunpack.c.l.bf16 %v120_v0  ;;  %v1224_v39 = vcombine.high %v120_v0, %v120_v0  ;;  %v1232_v43 = vcombine.high %v1190_v1, %v1192_v2 }
  0x12   : > { %139 = vrot.lane.b32.xlu0 %v1194_v3, %s1158_s12  ;;  %v124_v7 = vmul.f32 0.25, %v121_v4  ;;  %v125_v8 = vmul.f32 0.25, %v122_v5 }
  0x13   : > { %v126_v15 = vmul.f32 0.25, %v123_v13  ;;  %v255_v42 = vand.u32 %v1224_v39, %v1226_v41 }
  0x14   : > { %v1203_v9 = vpack.c.bf16 %v125_v8, %v124_v7 }
  0x15   : > { %v1212_v16 = vpack.c.bf16 %v126_v15, %v126_v15  ;;  %1001 = vmatprep.subr.bf16.mxu1 %v255_v42 }
  0x16   : > { %137 = vrot.lane.b32.xlu0 %v1201_v6, %s1158_s12  ;;  %997 = vmatprep.mubr.msk.bf16.mxu0 %vm141_vm0, %v1203_v9 }
  0x17   : > { %1002 = vmatpush3.bf16.msra.mxu1 %v255_v42 }
  0x18   : > { %1003 = vmatprep.subr.bf16.mxu1 %v1232_v43 }
  0x1b   : > { %1004 = vmatpush3.bf16.msra.mxu1 %v1232_v43 }
  0x84   : > { %v140_v10 = vpop.permute.xlu0 %139 }
  0x85   : > { %1057 = vmatprep.subr.msk.bf16.mxu0 %vm141_vm0, %v140_v10  ;;  %v152_v11 = vsel %vm141_vm0, %v140_v10, 0 }
  0x86   : > { %994 = vmatpush3.bf16.xpose.msra.mxu0 %v152_v11 }
  0x88   : > { %v138_v12 = vpop.permute.xlu0 %137 }
  0x89   : > { %1058 = vmatprep.subr.msk.bf16.mxu0 %vm141_vm0, %v138_v12  ;;  %v149_v14 = vsel %vm141_vm0, %v138_v12, 0 }
  0x8e   : > { %996 = vmatpush3.bf16.xpose.msra.mxu0 %v149_v14 }
  0x95   : > { %998 = vmatmul.mubr.msk.bf16.vlgmr.msra.gmra.mxu0 %vm141_vm0, %v1212_v16 }
 0x155   : > { %v999_v17 = vpop.f32.mrf.mxu0 }
 0x156   : > { %v210_v18 = vsel %vm209_vm1, %v999_v17, -inf }
 0x157   : > { %211 = vmax.xlane.f32.xlu0 %v210_v18  ;;  %v188_v19 = vpop.f32.mrf.mxu0 }
 0x158   : > { %v203_v20 = vsel %vm202_vm2, %v188_v19, -inf }
 0x159   : > { %204 = vmax.xlane.f32.xlu1 %v203_v20  ;;  %v1000_v21 = vpop.f32.mrf.mxu0 }
 0x15b   : > { %v191_v22 = vpop.f32.mrf.mxu0 }
 0x15c   : > { %v206_v23 = vsel %vm202_vm2, %v191_v22, -inf }
 0x15d   : > { %207 = vmax.xlane.f32.xlu1 %v206_v23 }
 0x16d   : > { %307 = vrot.lane.b32.xlu0 %v1203_v9, %s1159_s13 }
 0x1e0   : > { %v212_v24 = vpop.xlane.xlu0 %211 }
 0x1e1   : > { %v215_v25 = vsub.f32 %v999_v17, %v212_v24 }
 0x1e2   : > { %v205_v26 = vpop.xlane.xlu1 %204 }
 0x1e3   : > { %v220_v27 = vmul.f32 1.442695, %v215_v25  ;;  %v213_v28 = vsub.f32 %v188_v19, %v205_v26 }
 0x1e4   : > { %v308_v57 = vpop.permute.xlu0 %307 }
 0x1e5   : > { %1102 = vpow2.f32 %v220_v27  ;;  %v216_v29 = vmul.f32 1.442695, %v213_v28 }
 0x1e6   : > { %v208_v30 = vpop.xlane.xlu1 %207 }
 0x1e7   : > { %1104 = vpow2.f32 %v216_v29  ;;  %v214_v31 = vsub.f32 %v191_v22, %v208_v30 }
 0x1e9   : > { %v218_v32 = vmul.f32 1.442695, %v214_v31 }
 0x1eb   : > { %1106 = vpow2.f32 %v218_v32 }
 0x1f2   : > { %v1103_v33 = vpop.eup %1102 }
 0x1f3   : > { %v228_v34 = vsel %vm209_vm1, %v1103_v33, 0.0 }
 0x1f4   : > { %v1105_v35 = vpop.eup %1104  ;;  %229 = vadd.xlane.f32.xlu1 %v228_v34 }
 0x1f5   : > { %v222_v36 = vsel %vm202_vm2, %v1105_v35, 0.0 }
 0x1f8   : > { %v1107_v37 = vpop.eup %1106  ;;  %223 = vadd.xlane.f32.xlu1 %v222_v36 }
 0x1f9   : > { %v225_v38 = vsel %vm202_vm2, %v1107_v37, 0.0 }
 0x1fc   : > { %226 = vadd.xlane.f32.xlu1 %v225_v38 }
 0x20d   : > { %313 = vrot.lane.b32.xlu1 %v1194_v3, %s1161_s14 }
 0x211   : > { %311 = vrot.lane.b32.xlu1 %v1201_v6, %s1161_s14 }
 0x215   : > { %309 = vrot.lane.b32.xlu1 %v1212_v16, %s1159_s13 }
 0x27d   : > { %v230_v44 = vpop.xlane.xlu1 %229 }
 0x27e   : > { %1108 = vrcp.f32 %v230_v44 }
 0x281   : > { %v224_v45 = vpop.xlane.xlu1 %223 }
 0x282   : > { %1110 = vrcp.f32 %v224_v45 }
 0x285   : > { %v227_v46 = vpop.xlane.xlu1 %226 }
 0x286   : > { %1112 = vrcp.f32 %v227_v46 }
 0x289   : > { %v314_v47 = vpop.permute.xlu1 %313 }
 0x28a   : > { %1059 = vmatprep.subr.msk.bf16.mxu1 %vm141_vm0, %v314_v47  ;;  %v325_v55 = vsel %vm141_vm0, %v314_v47, 0 }
 0x28b   : > { %v1109_v48 = vpop.eup %1108 }
 0x28c   : > { %v236_v51 = vmul.f32 %v1109_v48, %v1103_v33 }
 0x28d   : > { %v312_v58 = vpop.permute.xlu1 %311 }
 0x28e   : > { %v238_v56 = vpack.c.bf16 %v236_v51, %v236_v51  ;;  %v322_v59 = vsel %vm141_vm0, %v312_v58, 0 }
 0x28f   : > { %v1111_v49 = vpop.eup %1110 }
 0x290   : > { %v234_v52 = vmul.f32 %v1111_v49, %v1105_v35 }
 0x291   : > { %v310_v60 = vpop.permute.xlu1 %309 }
 0x293   : > { %v1113_v50 = vpop.eup %1112 }
 0x294   : > { %v235_v53 = vmul.f32 %v1113_v50, %v1107_v37 }
 0x296   : > { %v237_v54 = vpack.c.bf16 %v235_v53, %v234_v52 }
 0x298   : > { %1005 = vmatprep.mubr.msk.bf16.mxu1 %vm202_vm2, %v237_v54 }
 0x299   : > { %1006 = vmatmul.mubr.msk.bf16.vlgmr.msra.gmra.mxu1 %vm202_vm2, %v238_v56 }
 0x29a   : > { %1010 = vmatpush3.bf16.xpose.msra.mxu1 %v325_v55  ;;  %1013 = vmatprep.mubr.msk.bf16.mxu1 %vm141_vm0, %v308_v57 }
 0x29b   : > { %1060 = vmatprep.subr.msk.bf16.mxu1 %vm141_vm0, %v312_v58 }
 0x2a2   : > { %1012 = vmatpush3.bf16.xpose.msra.mxu1 %v322_v59 }
 0x2a9   : > { %1014 = vmatmul.mubr.msk.bf16.vlgmr.msra.gmra.mxu1 %vm141_vm0, %v310_v60 }
 0x359   : > { %v1250_v61 = vpop.f32.mrf.mxu1 }
 0x35b   : > { %v1252_v62 = vpop.f32.mrf.mxu1 }
 0x35d   : > { %v1008_v63 = vpop.f32.mrf.mxu1 }
 0x35f   : > { %v1254_v0 = vpop.f32.mrf.mxu1 }
 0x369   : > { %v1015_v1 = vpop.f32.mrf.mxu1 }
 0x36a   : > { %v381_v8 = vsel %vm209_vm1, %v1015_v1, -inf }
 0x36b   : > { %v361_v2 = vpop.f32.mrf.mxu1 }
 0x36c   : > { %v375_v4 = vsel %vm202_vm2, %v361_v2, -inf }
 0x36d   : > { %376 = vmax.xlane.f32.xlu1 %v375_v4  ;;  %v1016_v5 = vpop.f32.mrf.mxu1 }
 0x36f   : > { %v364_v7 = vpop.f32.mrf.mxu1 }
 0x370   : > { %v378_v10 = vsel %vm202_vm2, %v364_v7, -inf }
 0x371   : > { %382 = vmax.xlane.f32.xlu1 %v381_v8  ;;  %379 = vmax.xlane.f32.xlu0 %v378_v10 }
 0x382   : > { %412 = vrot.lane.b32.xlu1 %v1224_v39, %s1159_s13 }
 0x3f6   : > { %v377_v11 = vpop.xlane.xlu1 %376 }
 0x3f7   : > { %v384_v12 = vsub.f32 %v361_v2, %v377_v11 }
 0x3f9   : > { %v387_v13 = vmul.f32 1.442695, %v384_v12 }
 0x3fa   : > { %v383_v14 = vpop.xlane.xlu1 %382  ;;  %v380_v15 = vpop.xlane.xlu0 %379 }
 0x3fb   : > { %1114 = vpow2.f32 %v387_v13  ;;  %v386_v17 = vsub.f32 %v1015_v1, %v383_v14  ;;  %v385_v18 = vsub.f32 %v364_v7, %v380_v15 }
 0x3fd   : > { %v391_v19 = vmul.f32 1.442695, %v386_v17  ;;  %v389_v20 = vmul.f32 1.442695, %v385_v18 }
 0x3fe   : > { %v413_v21 = vpop.permute.xlu1 %412 }
 0x3ff   : > { %1116 = vpow2.f32 %v391_v19  ;;  %v422_v22 = vand.u32 %v413_v21, %v1226_v41 }
 0x400   : > { %1118 = vpow2.f32 %v389_v20 }
 0x401   : > { %1017 = vmatprep.subr.bf16.mxu0 %v422_v22 }
 0x402   : > { %1018 = vmatpush3.bf16.msra.mxu0 %v422_v22 }
 0x408   : > { %v1115_v23 = vpop.eup %1114 }
 0x409   : > { %v393_v24 = vsel %vm202_vm2, %v1115_v23, 0.0 }
 0x40a   : > { %394 = vadd.xlane.f32.xlu1 %v393_v24 }
 0x40c   : > { %v1117_v25 = vpop.eup %1116 }
 0x40d   : > { %v1119_v26 = vpop.eup %1118  ;;  %v399_v27 = vsel %vm209_vm1, %v1117_v25, 0.0 }
 0x40e   : > { %400 = vadd.xlane.f32.xlu0 %v399_v27  ;;  %v396_v28 = vsel %vm202_vm2, %v1119_v26, 0.0 }
 0x40f   : > { %397 = vadd.xlane.f32.xlu1 %v396_v28 }
 0x420   : > { %478 = vrot.lane.b32.xlu1 %v1194_v3, %s1162_s15 }
 0x424   : > { %410 = vrot.lane.b32.xlu0 %v1232_v43, %s1159_s13  ;;  %476 = vrot.lane.b32.xlu1 %v1201_v6, %s1162_s15 }
 0x428   : > { %472 = vrot.lane.b32.xlu0 %v1203_v9, %s1163_s16  ;;  %474 = vrot.lane.b32.xlu1 %v1212_v16, %s1163_s16 }
 0x493   : > { %v395_v29 = vpop.xlane.xlu1 %394 }
 0x494   : > { %1120 = vrcp.f32 %v395_v29 }
 0x497   : > { %v401_v30 = vpop.xlane.xlu0 %400 }
 0x498   : > { %v398_v31 = vpop.xlane.xlu1 %397  ;;  %1122 = vrcp.f32 %v401_v30 }
 0x499   : > { %1124 = vrcp.f32 %v398_v31 }
 0x49b   : > { %v411_v32 = vpop.permute.xlu0 %410 }
 0x49c   : > { %1019 = vmatprep.subr.bf16.mxu0 %v411_v32  ;;  %v479_v33 = vpop.permute.xlu1 %478 }
 0x49d   : > { %1020 = vmatpush3.bf16.msra.mxu0 %v411_v32  ;;  %v490_v45 = vsel %vm141_vm0, %v479_v33, 0 }
 0x49e   : > { %1061 = vmatprep.subr.msk.bf16.mxu0 %vm141_vm0, %v479_v33 }
 0x49f   : > { %v473_v46 = vpop.permute.xlu0 %472 }
 0x4a0   : > { %v477_v47 = vpop.permute.xlu1 %476 }
 0x4a1   : > { %v1121_v34 = vpop.eup %1120  ;;  %v487_v48 = vsel %vm141_vm0, %v477_v47, 0 }
 0x4a2   : > { %v405_v38 = vmul.f32 %v1121_v34, %v1115_v23 }
 0x4a4   : > { %v475_v49 = vpop.permute.xlu1 %474 }
 0x4a5   : > { %v1123_v35 = vpop.eup %1122 }
 0x4a6   : > { %v1125_v36 = vpop.eup %1124  ;;  %v407_v37 = vmul.f32 %v1123_v35, %v1117_v25 }
 0x4a7   : > { %v406_v40 = vmul.f32 %v1125_v36, %v1119_v26 }
 0x4a8   : > { %v409_v42 = vpack.c.bf16 %v407_v37, %v407_v37 }
 0x4a9   : > { %v408_v44 = vpack.c.bf16 %v406_v40, %v405_v38 }
 0x4ab   : > { %1021 = vmatprep.mubr.msk.bf16.mxu0 %vm202_vm2, %v408_v44 }
 0x4ac   : > { %1022 = vmatmul.mubr.msk.bf16.vlgmr.msra.gmra.mxu0 %vm202_vm2, %v409_v42 }
 0x4ad   : > { %1026 = vmatpush3.bf16.xpose.msra.mxu0 %v490_v45  ;;  %1029 = vmatprep.mubr.msk.bf16.mxu0 %vm141_vm0, %v473_v46 }
 0x4ae   : > { %1062 = vmatprep.subr.msk.bf16.mxu0 %vm141_vm0, %v477_v47 }
 0x4b5   : > { %1028 = vmatpush3.bf16.xpose.msra.mxu0 %v487_v48 }
 0x4bc   : > { %1030 = vmatmul.mubr.msk.bf16.vlgmr.msra.gmra.mxu0 %vm141_vm0, %v475_v49 }
 0x56c   : > { %v1283_v50 = vpop.f32.mrf.mxu0 }
 0x56e   : > { %v1285_v51 = vpop.f32.mrf.mxu0 }
 0x56f   : > { %v1083_v52 = vpack.i.bf16 %v1285_v51, %v1283_v50 }
 0x570   : > { %v1024_v53 = vpop.f32.mrf.mxu0 }
 0x572   : > { %v1289_v54 = vpop.f32.mrf.mxu0 }
 0x57c   : > { %v1031_v55 = vpop.f32.mrf.mxu0 }
 0x57d   : > { %v546_v60 = vsel %vm209_vm1, %v1031_v55, -inf }
 0x57e   : > { %v526_v56 = vpop.f32.mrf.mxu0 }
 0x57f   : > { %v540_v57 = vsel %vm202_vm2, %v526_v56, -inf }
 0x580   : > { %541 = vmax.xlane.f32.xlu0 %v540_v57  ;;  %v1032_v58 = vpop.f32.mrf.mxu0 }
 0x582   : > { %v529_v59 = vpop.f32.mrf.mxu0 }
 0x583   : > { %v543_v63 = vsel %vm202_vm2, %v529_v59, -inf }
 0x584   : > { %547 = vmax.xlane.f32.xlu0 %v546_v60  ;;  %544 = vmax.xlane.f32.xlu1 %v543_v63 }
 0x595   : > { %577 = vrot.lane.b32.xlu1 %v1224_v39, %s1163_s16 }
 0x609   : > { %v542_v1 = vpop.xlane.xlu0 %541 }
 0x60a   : > { %v549_v2 = vsub.f32 %v526_v56, %v542_v1 }
 0x60c   : > { %v552_v10 = vmul.f32 1.442695, %v549_v2 }
 0x60d   : > { %v548_v4 = vpop.xlane.xlu0 %547  ;;  %v545_v5 = vpop.xlane.xlu1 %544 }
 0x60e   : > { %v551_v7 = vsub.f32 %v1031_v55, %v548_v4  ;;  %v550_v8 = vsub.f32 %v529_v59, %v545_v5 }
 0x610   : > { %v556_v11 = vmul.f32 1.442695, %v551_v7  ;;  %v554_v12 = vmul.f32 1.442695, %v550_v8 }
 0x611   : > { %v578_v13 = vpop.permute.xlu1 %577 }
 0x612   : > { %1126 = vpow2.f32 %v556_v11  ;;  %v587_v14 = vand.u32 %v578_v13, %v1226_v41 }
 0x613   : > { %1128 = vpow2.f32 %v554_v12 }
 0x614   : > { %1130 = vpow2.f32 %v552_v10  ;;  %1033 = vmatprep.subr.bf16.mxu1 %v587_v14 }
 0x615   : > { %1034 = vmatpush3.bf16.msra.mxu1 %v587_v14 }
 0x61f   : > { %v1127_v15 = vpop.eup %1126 }
 0x620   : > { %v1129_v17 = vpop.eup %1128  ;;  %v564_v18 = vsel %vm209_vm1, %v1127_v15, 0.0 }
 0x621   : > { %v1131_v19 = vpop.eup %1130  ;;  %565 = vadd.xlane.f32.xlu0 %v564_v18  ;;  %v561_v20 = vsel %vm202_vm2, %v1129_v17, 0.0 }
 0x622   : > { %562 = vadd.xlane.f32.xlu1 %v561_v20  ;;  %v558_v21 = vsel %vm202_vm2, %v1131_v19, 0.0 }
 0x625   : > { %559 = vadd.xlane.f32.xlu0 %v558_v21 }
 0x633   : > { %643 = vrot.lane.b32.xlu1 %v1194_v3, %s1164_s17 }
 0x637   : > { %641 = vrot.lane.b32.xlu1 %v1201_v6, %s1164_s17 }
 0x63b   : > { %575 = vrot.lane.b32.xlu0 %v1232_v43, %s1163_s16  ;;  %639 = vrot.lane.b32.xlu1 %v1212_v16, %s1165_s18 }
 0x63f   : > { %637 = vrot.lane.b32.xlu0 %v1203_v9, %s1165_s18 }
 0x6aa   : > { %v566_v22 = vpop.xlane.xlu0 %565 }
 0x6ab   : > { %v563_v23 = vpop.xlane.xlu1 %562  ;;  %1132 = vrcp.f32 %v566_v22 }
 0x6ac   : > { %1134 = vrcp.f32 %v563_v23 }
 0x6ae   : > { %v560_v24 = vpop.xlane.xlu0 %559 }
 0x6af   : > { %1136 = vrcp.f32 %v560_v24  ;;  %v644_v25 = vpop.permute.xlu1 %643 }
 0x6b0   : > { %v655_v9 = vsel %vm141_vm0, %v644_v25, 0 }
 0x6b2   : > { %v576_v3 = vpop.permute.xlu0 %575 }
 0x6b3   : > { %1035 = vmatprep.subr.bf16.mxu1 %v576_v3  ;;  %v642_v33 = vpop.permute.xlu1 %641 }
 0x6b4   : > { %1036 = vmatpush3.bf16.msra.mxu1 %v576_v3  ;;  %v652_v34 = vsel %vm141_vm0, %v642_v33, 0 }
 0x6b5   : > { %1063 = vmatprep.subr.msk.bf16.mxu1 %vm141_vm0, %v644_v25 }
 0x6b6   : > { %v638_v32 = vpop.permute.xlu0 %637 }
 0x6b7   : > { %v640_v35 = vpop.permute.xlu1 %639 }
 0x6b8   : > { %v1133_v6 = vpop.eup %1132 }
 0x6b9   : > { %v1135_v26 = vpop.eup %1134  ;;  %v572_v28 = vmul.f32 %v1133_v6, %v1127_v15 }
 0x6ba   : > { %v571_v29 = vmul.f32 %v1135_v26, %v1129_v17 }
 0x6bb   : > { %v574_v31 = vpack.c.bf16 %v572_v28, %v572_v28 }
 0x6bc   : > { %v1137_v27 = vpop.eup %1136 }
 0x6bd   : > { %v570_v16 = vmul.f32 %v1137_v27, %v1131_v19 }
 0x6bf   : > { %v573_v30 = vpack.c.bf16 %v571_v29, %v570_v16 }
 0x6c1   : > { %1037 = vmatprep.mubr.msk.bf16.mxu1 %vm202_vm2, %v573_v30 }
 0x6c2   : > { %1038 = vmatmul.mubr.msk.bf16.vlgmr.msra.gmra.mxu1 %vm202_vm2, %v574_v31 }
 0x6c3   : > { %1042 = vmatpush3.bf16.xpose.msra.mxu1 %v655_v9  ;;  %1045 = vmatprep.mubr.msk.bf16.mxu1 %vm141_vm0, %v638_v32 }
 0x6c4   : > { %1064 = vmatprep.subr.msk.bf16.mxu1 %vm141_vm0, %v642_v33 }
 0x6cb   : > { %1044 = vmatpush3.bf16.xpose.msra.mxu1 %v652_v34 }
 0x6d2   : > { %1046 = vmatmul.mubr.msk.bf16.vlgmr.msra.gmra.mxu1 %vm141_vm0, %v640_v35 }
 0x782   : > { %v1039_v36 = vpop.f32.mrf.mxu1 }
 0x784   : > { %v623_v37 = vpop.f32.mrf.mxu1 }
 0x785   : > { %v1088_v38 = vpack.i.bf16 %v623_v37, %v1039_v36 }
 0x786   : > { %v1040_v40 = vpop.f32.mrf.mxu1 }
 0x788   : > { %v626_v42 = vpop.f32.mrf.mxu1 }
 0x792   : > { %v1047_v44 = vpop.f32.mrf.mxu1 }
 0x793   : > { %v711_v49 = vsel %vm209_vm1, %v1047_v44, -inf }
 0x794   : > { %v691_v45 = vpop.f32.mrf.mxu1 }
 0x795   : > { %v705_v46 = vsel %vm202_vm2, %v691_v45, -inf }
 0x796   : > { %706 = vmax.xlane.f32.xlu0 %v705_v46  ;;  %v1048_v47 = vpop.f32.mrf.mxu1 }
 0x798   : > { %v694_v48 = vpop.f32.mrf.mxu1 }
 0x799   : > { %v708_v53 = vsel %vm202_vm2, %v694_v48, -inf }
 0x79a   : > { %712 = vmax.xlane.f32.xlu0 %v711_v49  ;;  %709 = vmax.xlane.f32.xlu1 %v708_v53 }
 0x81f   : > { %v707_v55 = vpop.xlane.xlu0 %706 }
 0x820   : > { %v714_v56 = vsub.f32 %v691_v45, %v707_v55 }
 0x822   : > { %v717_v63 = vmul.f32 1.442695, %v714_v56 }
 0x823   : > { %v713_v57 = vpop.xlane.xlu0 %712  ;;  %v710_v58 = vpop.xlane.xlu1 %709 }
 0x824   : > { %v716_v59 = vsub.f32 %v1047_v44, %v713_v57  ;;  %v715_v60 = vsub.f32 %v694_v48, %v710_v58 }
 0x826   : > { %v721_v1 = vmul.f32 1.442695, %v716_v59  ;;  %v719_v2 = vmul.f32 1.442695, %v715_v60 }
 0x828   : > { %1138 = vpow2.f32 %v721_v1 }
 0x829   : > { %1140 = vpow2.f32 %v719_v2 }
 0x82a   : > { %1142 = vpow2.f32 %v717_v63 }
 0x835   : > { %v1139_v4 = vpop.eup %1138 }
 0x836   : > { %v1141_v5 = vpop.eup %1140  ;;  %v729_v7 = vsel %vm209_vm1, %v1139_v4, 0.0 }
 0x837   : > { %v1143_v8 = vpop.eup %1142  ;;  %730 = vadd.xlane.f32.xlu0 %v729_v7  ;;  %v726_v10 = vsel %vm202_vm2, %v1141_v5, 0.0 }
 0x838   : > { %727 = vadd.xlane.f32.xlu1 %v726_v10  ;;  %v723_v11 = vsel %vm202_vm2, %v1143_v8, 0.0 }
 0x83b   : > { %724 = vadd.xlane.f32.xlu0 %v723_v11 }
 0x849   : > { %742 = vrot.lane.b32.xlu1 %v1224_v39, %s1165_s18 }
 0x84d   : > { %1084 = vrot.lane.b32.xlu1 %v1083_v52, %s1164_s17 }
 0x851   : > { %807 = vrot.lane.b32.xlu1 %v1289_v54, %s1164_s17  ;;  %740 = vrot.lane.b32.xlu0 %v1232_v43, %s1165_s18 }
 0x855   : > { %819 = vrot.lane.b32.xlu1 %v626_v42, %s1162_s15  ;;  %1089 = vrot.lane.b32.xlu0 %v1088_v38, %s1162_s15  ;;  %v868_v38 = vld [vmem:[%s116_s22 + $0x8] sm:$0x1] }
 0x8c0   : > { %v731_v12 = vpop.xlane.xlu0 %730 }
 0x8c1   : > { %v728_v13 = vpop.xlane.xlu1 %727  ;;  %1144 = vrcp.f32 %v731_v12 }
 0x8c2   : > { %1146 = vrcp.f32 %v728_v13 }
 0x8c4   : > { %v725_v39 = vpop.xlane.xlu0 %724 }
 0x8c5   : > { %1148 = vrcp.f32 %v725_v39  ;;  %v743_v14 = vpop.permute.xlu1 %742 }
 0x8c6   : > { %v752_v50 = vand.u32 %v743_v14, %v1226_v41 }
 0x8c8   : > { %1049 = vmatprep.subr.bf16.mxu0 %v752_v50  ;;  %v741_v51 = vpop.permute.xlu0 %740 }
 0x8c9   : > { %1050 = vmatpush3.bf16.msra.mxu0 %v752_v50  ;;  %v1085_v3 = vpop.permute.xlu1 %1084 }
 0x8ca   : > { %1051 = vmatprep.subr.bf16.mxu0 %v741_v51  ;;  %v1087_v26 = vunpack.i.h.bf16 %v1085_v3  ;;  %v1086_v27 = vunpack.i.l.bf16 %v1085_v3 }
 0x8cc   : > { %v1090_v6 = vpop.permute.xlu0 %1089  ;;  %v838_v30 = vsel %vm141_vm0, %v1252_v62, %v1087_v26  ;;  %v840_v31 = vsel %vm141_vm0, %v1250_v61, %v1086_v27 }
 0x8cd   : > { %1052 = vmatpush3.bf16.msra.mxu0 %v741_v51  ;;  %v808_v25 = vpop.permute.xlu1 %807  ;;  %v1092_v28 = vunpack.i.h.bf16 %v1090_v6  ;;  %v1091_v16 = vunpack.i.l.bf16 %v1090_v6 }
 0x8ce   : > { %v1145_v52 = vpop.eup %1144  ;;  %v839_v32 = vsel %vm141_vm0, %v1254_v0, %v808_v25 }
 0x8cf   : > { %v1147_v43 = vpop.eup %1146  ;;  %v737_v15 = vmul.f32 %v1145_v52, %v1139_v4  ;;  %v842_v35 = vsel %vm841_vm4, %v838_v30, %v1092_v28  ;;  %v844_v37 = vsel %vm841_vm4, %v840_v31, %v1091_v16 }
 0x8d0   : > { %v736_v18 = vmul.f32 %v1147_v43, %v1141_v5 }
 0x8d1   : > { %v739_v20 = vpack.c.bf16 %v737_v15, %v737_v15  ;;  %v820_v29 = vpop.permute.xlu1 %819 }
 0x8d2   : > { %v1149_v54 = vpop.eup %1148  ;;  %v843_v36 = vsel %vm841_vm4, %v839_v32, %v820_v29 }
 0x8d3   : > { %v735_v17 = vmul.f32 %v1149_v54, %v1143_v8 }
 0x8d5   : > { %v738_v19 = vpack.c.bf16 %v736_v18, %v735_v17 }
 0x8d7   : > { %1053 = vmatprep.mubr.msk.bf16.mxu0 %vm202_vm2, %v738_v19 }
 0x8d8   : > { %1054 = vmatmul.mubr.msk.bf16.vlgmr.msra.gmra.mxu0 %vm202_vm2, %v739_v20 }
 0x998   : > { %v1055_v21 = vpop.f32.mrf.mxu0 }
 0x99a   : > { %v788_v41 = vpop.f32.mrf.mxu0 }
 0x99b   : > { %v1093_v22 = vpack.i.bf16 %v788_v41, %v1055_v21 }
 0x99c   : > { %v1056_v23 = vpop.f32.mrf.mxu0 }
 0x99d   : > { %1094 = vrot.lane.b32.xlu0 %v1093_v22, %s1161_s14 }
 0x99e   : > { %v791_v24 = vpop.f32.mrf.mxu0 }
 0x99f   : > { %831 = vrot.lane.b32.xlu1 %v791_v24, %s1161_s14 }
 0xa0f   : > { %v1095_v9 = vpop.permute.xlu0 %1094 }
 0xa10   : > { %v1097_v33 = vunpack.i.h.bf16 %v1095_v9  ;;  %v1096_v34 = vunpack.i.l.bf16 %v1095_v9 }
 0xa11   : > { %v832_v62 = vpop.permute.xlu1 %831 }
 0xa12   : > { %v846_v40 = vsel %vm845_vm5, %v842_v35, %v1097_v33  ;;  %v847_v42 = vsel %vm845_vm5, %v843_v36, %v832_v62  ;;  %v848_v44 = vsel %vm845_vm5, %v844_v37, %v1096_v34 }
 0xa13   : > { %v958_v45 = vpack.c.bf16 %v846_v40, %v846_v40  ;;  %v959_v61 = vpack.c.bf16 %v847_v42, %v847_v42  ;;  %v960_v46 = vpack.c.bf16 %v848_v44, %v848_v44 }
 0xa15   : > { %863 = vst.msk [vmem:[%s116_s22] sm:$0xf] %vm862_vm8, %v958_v45  ;;  %864 = vst.msk [vmem:[%s116_s22 + $0x4] sm:$0xf] %vm862_vm8, %v959_v61  ;;  %v869_v0 = vsel %vm867_vm9, %v960_v46, %v868_v38 }
 0xa16   : > { %870 = vst [vmem:[%s116_s22 + $0x8] sm:$0x1] %v869_v0 }
 0xa17 PF: > { %s11_s6 = sadd.s32 1, %s1156_s6  }
 0xa18   : > { %p8_p4 = scmp.ge.s32.totalorder %s11_s6, 4  }
 0xa1a   :  { %10 = sbr.rel (!%p8_p4) target bundleno = 1 (0x1), region = 54 }

// kernel: _lambda_.29
= control target key start
LH: loop header
LB: loop body
LE: loop exit
PB: predicated region body
PF: predicated region fallthrough
CT: control target
= control target key end

     0   :  { %v262_v0 = vmov 0.0   ;;  %vm263_vm0 = vmmov 0   ;;  %vm75_vm1 = vcmask 523264   ;;  %vm177_vm2 = vcmask 519168   ;;  %s344_s1 = inlined_call_operand.vmem [shape: bf16[64,64], index: 1, kind: input, shape index: {}]   ;;  %s345_s0 = inlined_call_operand.vmem [shape: bf16[34,64], index: 0, kind: input, shape index: {}]   ;;  %s346_s3 = inlined_call_operand.vmem [shape: bf16[34,64], index: 3, kind: input, shape index: {}]   ;;  %s347_s2 = inlined_call_operand.vmem [shape: f32[1,64], index: 2, kind: input, shape index: {}]   ;;  %s348_s4 = inlined_call_operand.vmem [shape: bf16[34,64], index: 4, kind: output, shape index: {}]  }
   0x1   :  { %225 = vmatprep.subr.bf16.mxu0 %v262_v0  ;;  %245 = vmatprep.subr.bf16.mxu1 %v262_v0  ;;  %v255_v1 = vld [vmem:[%s344_s1 + $0x18] sm:$0xff]   ;;  %v256_v2 = vld [vmem:[%s344_s1 + $0x10] sm:$0xff]   ;;  %v257_v3 = vld [vmem:[%s344_s1 + $0x8] sm:$0xff]   ;;  %vm182_vm3 = vcmask 516096  }
   0x2   :  { %233 = vmatprep.mubr.msk.bf16.mxu0 %vm263_vm0, %v262_v0  ;;  %237 = vmatprep.mubr.msk.bf16.mxu1 %vm263_vm0, %v262_v0  ;;  %v258_v4 = vld [vmem:[%s344_s1] sm:$0xff]   ;;  %v260_v6 = vld [vmem:[%s345_s0 + $0x8] sm:$0xff]   ;;  %v261_v7 = vld [vmem:[%s345_s0 + $0x10] ss:$0 sps:$4 sm:$0x11]  }
   0x3   :  { %226 = vmatpush3.bf16.msra.mxu0 %v255_v1  ;;  %249 = vmatpush3.bf16.msra.mxu1 %v255_v1  ;;  %v259_v5 = vld [vmem:[%s345_s0] sm:$0xff]   ;;  %v217_v9 = vld [vmem:[%s346_s3 + $0x8] sm:$0xff]   ;;  %v145_v25 = vld [vmem:[%s346_s3 + $0x10] sm:$0x1] }
   0x4   :  { %227 = vmatprep.subr.bf16.mxu0 %v262_v0  ;;  %246 = vmatprep.subr.bf16.mxu1 %v262_v0  ;;  %v210_v8 = vld [vmem:[%s346_s3] sm:$0xff]   ;;  %v215_v12 = vunpack.c.l.bf16 %v217_v9  ;;  %v216_v22 = vunpack.c.h.bf16 %v217_v9  ;;  %v150_v34 = vunpack.c.l.bf16 %v145_v25 }
   0x5   :  { %v188_v10 = vld [vmem:[%s347_s2] ss:$0 sm:$0xff]  ;;  %v211_v11 = vunpack.c.l.bf16 %v210_v8  ;;  %v212_v21 = vunpack.c.h.bf16 %v210_v8 }
   0x7   :  { %228 = vmatpush3.bf16.msra.mxu0 %v256_v2  ;;  %250 = vmatpush3.bf16.msra.mxu1 %v256_v2 }
   0x8   :  { %229 = vmatprep.subr.bf16.mxu0 %v262_v0  ;;  %247 = vmatprep.subr.bf16.mxu1 %v262_v0 }
   0xb   :  { %230 = vmatpush3.bf16.msra.mxu0 %v257_v3  ;;  %251 = vmatpush3.bf16.msra.mxu1 %v257_v3 }
   0xc   :  { %231 = vmatprep.subr.bf16.mxu0 %v262_v0  ;;  %248 = vmatprep.subr.bf16.mxu1 %v262_v0 }
   0xf   :  { %232 = vmatpush3.bf16.msra.mxu0 %v258_v4  ;;  %252 = vmatpush3.bf16.msra.mxu1 %v258_v4 }
  0x12   :  { %234 = vmatmul.mubr.msk.bf16.vlgmr.msra.gmra.mxu0 %vm75_vm1, %v259_v5  ;;  %238 = vmatmul.mubr.msk.bf16.vlgmr.msra.gmra.mxu1 %vm75_vm1, %v260_v6 }
  0x13   :  { %241 = vmatprep.mubr.msk.bf16.mxu1 %vm263_vm0, %v262_v0 }
  0x1a   :  { %242 = vmatmul.mubr.msk.bf16.gmra.mxu1 %vm75_vm1, %v261_v7 }
  0xd2   :  { %v119_v13 = vpop.f32.mrf.mxu0  ;;  %v127_v14 = vpop.f32.mrf.mxu1 }
  0xd3   :  { %v120_v15 = vadd.f32 %v188_v10, %v119_v13  ;;  %v128_v16 = vadd.f32 %v188_v10, %v127_v14 }
  0xd4   :  { %v235_v17 = vpop.f32.mrf.mxu0  ;;  %v239_v18 = vpop.f32.mrf.mxu1 }
  0xd5   :  { %v151_v19 = vadd.f32 %v211_v11, %v120_v15  ;;  %v153_v20 = vadd.f32 %v215_v12, %v128_v16 }
  0xd6   :  { %v122_v23 = vpop.f32.mrf.mxu0  ;;  %v130_v24 = vpop.f32.mrf.mxu1 }
  0xd7   :  { %v204_v26 = vpack.c.bf16 %v151_v19, %v151_v19  ;;  %v206_v27 = vpack.c.bf16 %v153_v20, %v153_v20  ;;  %v123_v28 = vadd.f32 %v188_v10, %v122_v23  ;;  %v131_v29 = vadd.f32 %v188_v10, %v130_v24 }
  0xd8   :  { %v236_v30 = vpop.f32.mrf.mxu0  ;;  %v240_v31 = vpop.f32.mrf.mxu1 }
  0xd9   :  { %178 = vst.msk [vmem:[%s348_s4] sm:$0xf] %vm177_vm2, %v204_v26  ;;  %180 = vst.msk [vmem:[%s348_s4 + $0x8] sm:$0xf] %vm177_vm2, %v206_v27  ;;  %v152_v32 = vadd.f32 %v212_v21, %v123_v28  ;;  %v154_v33 = vadd.f32 %v216_v22, %v131_v29 }
  0xda   :  { %v135_v35 = vpop.f32.mrf.mxu1 }
  0xdb   :  { %v205_v36 = vpack.c.bf16 %v152_v32, %v152_v32  ;;  %v207_v37 = vpack.c.bf16 %v154_v33, %v154_v33  ;;  %v136_v38 = vadd.f32 %v188_v10, %v135_v35 }
  0xdc   :  { %v243_v39 = vpop.f32.mrf.mxu1 }
  0xdd   :  { %179 = vst.msk [vmem:[%s348_s4 + $0x4] sm:$0xf] %vm177_vm2, %v205_v36  ;;  %181 = vst.msk [vmem:[%s348_s4 + $0xc] sm:$0xf] %vm177_vm2, %v207_v37  ;;  %v155_v40 = vadd.f32 %v150_v34, %v136_v38 }
  0xde   :  { %v138_v41 = vpop.f32.mrf.mxu1 }
  0xdf   :  { %v208_v42 = vpack.c.bf16 %v155_v40, %v155_v40 }
  0xe0   :  { %v244_v43 = vpop.f32.mrf.mxu1 }
  0xe1   :  { %183 = vst.msk [vmem:[%s348_s4 + $0x10] sm:$0x1] %vm182_vm3, %v208_v42 }

// kernel: _lambda_.30
= control target key start
LH: loop header
LB: loop body
LE: loop exit
PB: predicated region body
PF: predicated region fallthrough
CT: control target
= control target key end

     0   :  { %vm31_vm0 = vcmask 523264   ;;  %vm44_vm1 = vcmask 517120   ;;  %v490_v40 = vmov 0   ;;  %s659_s0 = inlined_call_operand.vmem [shape: bf16[34,64], index: 0, kind: input, shape index: {}]   ;;  %s660_s1 = inlined_call_operand.vmem [shape: bf16[64,256], index: 1, kind: input, shape index: {}]   ;;  %s661_s3 = inlined_call_operand.vmem [shape: f32[1,64], index: 3, kind: input, shape index: {}]   ;;  %s662_s4 = inlined_call_operand.vmem [shape: f32[1,64], index: 4, kind: input, shape index: {}]   ;;  %s663_s2 = inlined_call_operand.vmem [shape: f32[1,256], index: 2, kind: input, shape index: {}]   ;;  %s664_s5 = inlined_call_operand.vmem [shape: bf16[34,256], index: 5, kind: output, shape index: {}]  }
   0x1   :  { %v418_v0 = vld [vmem:[%s659_s0 + $0x8] sm:$0xff]   ;;  %v411_v1 = vld [vmem:[%s659_s0] sm:$0xff]   ;;  %v25_v5 = vld [vmem:[%s659_s0 + $0x10] sm:$0x1]  ;;  %237 = vmatprep.mubr.bf16.mxu1 %v490_v40  ;;  %227 = vmatprep.mubr.bf16.mxu0 %v490_v40 }
   0x2   :  { %v416_v2 = vunpack.c.l.bf16 %v418_v0  ;;  %v417_v3 = vunpack.c.h.bf16 %v418_v0  ;;  %v412_v4 = vunpack.c.l.bf16 %v411_v1  ;;  %v413_v6 = vunpack.c.h.bf16 %v411_v1  ;;  %v428_v38 = vld [vmem:[%s660_s1 + $0x34] ss:$8 sps:$4 sm:$0xff]   ;;  %v430_v39 = vld [vmem:[%s660_s1 + $0x30] ss:$8 sps:$4 sm:$0xff]   ;;  %v431_v41 = vld [vmem:[%s660_s1 + $0x24] ss:$8 sps:$4 sm:$0xff]  }
   0x3   :  { %v30_v10 = vunpack.c.l.bf16 %v25_v5  ;;  %419 = vmatprep.subr.bf16.mxu1 %v428_v38  ;;  %203 = vmatprep.subr.bf16.mxu0 %v428_v38  ;;  %v433_v42 = vld [vmem:[%s660_s1 + $0x20] ss:$8 sps:$4 sm:$0xff]   ;;  %v434_v43 = vld [vmem:[%s660_s1 + $0x14] ss:$8 sps:$4 sm:$0xff]   ;;  %v436_v44 = vld [vmem:[%s660_s1 + $0x10] ss:$8 sps:$4 sm:$0xff]  }
   0x4   :  { %v38_v7 = vsel %vm31_vm0, %v416_v2, 0.0  ;;  %v32_v8 = vsel %vm31_vm0, %v412_v4, 0.0  ;;  %v41_v9 = vsel %vm31_vm0, %v417_v3, 0.0  ;;  %v35_v11 = vsel %vm31_vm0, %v413_v6, 0.0  ;;  %423 = vmatpush1.bf16.msra.mxu1 %v430_v39  ;;  %204 = vmatpush1.bf16.msra.mxu0 %v430_v39  ;;  %v437_v45 = vld [vmem:[%s660_s1 + $0x4] ss:$8 sps:$4 sm:$0xff]  }
   0x5   :  { %39 = vadd.xlane.f32.xlu0 %v38_v7  ;;  %33 = vadd.xlane.f32.xlu1 %v32_v8  ;;  %v45_v12 = vsel %vm44_vm1, %v30_v10, 0.0  ;;  %v439_v46 = vld [vmem:[%s660_s1] ss:$8 sps:$4 sm:$0xff]  }
   0x6   :  { %420 = vmatprep.subr.bf16.mxu1 %v431_v41  ;;  %205 = vmatprep.subr.bf16.mxu0 %v431_v41  ;;  %v377_v0 = vld [vmem:[%s661_s3] ss:$0 sm:$0xff] }
   0x7   :  { %v378_v5 = vld [vmem:[%s662_s4] ss:$0 sm:$0xff] }
   0x8   :  { %424 = vmatpush1.bf16.msra.mxu1 %v433_v42  ;;  %206 = vmatpush1.bf16.msra.mxu0 %v433_v42 }
   0x9   :  { %42 = vadd.xlane.f32.xlu0 %v41_v9  ;;  %36 = vadd.xlane.f32.xlu1 %v35_v11 }
   0xa   :  { %421 = vmatprep.subr.bf16.mxu1 %v434_v43  ;;  %207 = vmatprep.subr.bf16.mxu0 %v434_v43 }
   0xc   :  { %425 = vmatpush1.bf16.msra.mxu1 %v436_v44  ;;  %208 = vmatpush1.bf16.msra.mxu0 %v436_v44 }
   0xd   :  { %46 = vadd.xlane.f32.xlu0 %v45_v12  ;;  %422 = vmatprep.subr.bf16.mxu1 %v437_v45 }
   0xe   :  { %209 = vmatprep.subr.bf16.mxu0 %v437_v45 }
  0x10   :  { %426 = vmatpush1.bf16.msra.mxu1 %v439_v46  ;;  %210 = vmatpush1.bf16.msra.mxu0 %v439_v46 }
  0x8e   :  { %v40_v13 = vpop.xlane.xlu0 %39  ;;  %v34_v14 = vpop.xlane.xlu1 %33 }
  0x8f   :  { %v51_v15 = vmul.f32 0.015625, %v40_v13  ;;  %v49_v16 = vmul.f32 0.015625, %v34_v14 }
  0x91   :  { %v535_v17 = vsub.f32 %v416_v2, %v51_v15  ;;  %v537_v18 = vsub.f32 %v412_v4, %v49_v16 }
  0x92   :  { %v43_v19 = vpop.xlane.xlu0 %42  ;;  %v37_v20 = vpop.xlane.xlu1 %36 }
  0x93   :  { %v52_v21 = vmul.f32 0.015625, %v43_v19  ;;  %v61_v22 = vmul.f32 %v535_v17, %v535_v17  ;;  %v50_v23 = vmul.f32 0.015625, %v37_v20  ;;  %v59_v24 = vmul.f32 %v537_v18, %v537_v18 }
  0x95   :  { %v543_v25 = vsub.f32 %v417_v3, %v52_v21  ;;  %v70_v26 = vsel %vm31_vm0, %v61_v22, 0.0  ;;  %v546_v27 = vsub.f32 %v413_v6, %v50_v23  ;;  %v64_v31 = vsel %vm31_vm0, %v59_v24, 0.0 }
  0x96   :  { %v47_v28 = vpop.xlane.xlu0 %46  ;;  %71 = vadd.xlane.f32.xlu1 %v70_v26  ;;  %v136_v23 = vlaneseq  ;;  %v134_v26 = vld [vmem:[%s663_s2] sm:$0x3] }
  0x97   :  { %v53_v29 = vmul.f32 0.015625, %v47_v28  ;;  %v62_v30 = vmul.f32 %v543_v25, %v543_v25  ;;  %v60_v32 = vmul.f32 %v546_v27, %v546_v27 }
  0x98   :  { %v137_v24 = vshrl.u32 %v136_v23, 7 }
  0x99   :  { %v553_v33 = vsub.f32 %v30_v10, %v53_v29  ;;  %v73_v34 = vsel %vm31_vm0, %v62_v30, 0.0  ;;  %v67_v36 = vsel %vm31_vm0, %v60_v32, 0.0 }
  0x9a   :  { %74 = vadd.xlane.f32.xlu0 %v73_v34  ;;  %65 = vadd.xlane.f32.xlu1 %v64_v31 }
  0x9b   :  { %v63_v35 = vmul.f32 %v553_v33, %v553_v33 }
  0x9d   :  { %v76_v37 = vsel %vm44_vm1, %v63_v35, 0.0 }
  0x9e   :  { %77 = vadd.xlane.f32.xlu1 %v76_v37  ;;  %68 = vadd.xlane.f32.xlu0 %v67_v36 }
 0x11f   :  { %v72_v47 = vpop.xlane.xlu1 %71 }
 0x120   :  { %v81_v48 = vmul.f32 0.015625, %v72_v47 }
 0x122   :  { %v86_v49 = vadd.f32 1e-05, %v81_v48 }
 0x123   :  { %v75_v50 = vpop.xlane.xlu0 %74  ;;  %v66_v51 = vpop.xlane.xlu1 %65 }
 0x124   :  { %440 = vrsqrt.f32 %v86_v49  ;;  %v82_v52 = vmul.f32 0.015625, %v75_v50  ;;  %v79_v53 = vmul.f32 0.015625, %v66_v51 }
 0x126   :  { %v87_v54 = vadd.f32 1e-05, %v82_v52  ;;  %v84_v55 = vadd.f32 1e-05, %v79_v53 }
 0x127   :  { %v69_v56 = vpop.xlane.xlu0 %68  ;;  %v78_v57 = vpop.xlane.xlu1 %77 }
 0x128   :  { %442 = vrsqrt.f32 %v87_v54  ;;  %v80_v58 = vmul.f32 0.015625, %v69_v56  ;;  %v83_v59 = vmul.f32 0.015625, %v78_v57 }
 0x129   :  { %444 = vrsqrt.f32 %v84_v55 }
 0x12a   :  { %v85_v60 = vadd.f32 1e-05, %v80_v58  ;;  %v88_v61 = vadd.f32 1e-05, %v83_v59 }
 0x12c   :  { %446 = vrsqrt.f32 %v85_v60 }
 0x12d   :  { %448 = vrsqrt.f32 %v88_v61 }
 0x131   :  { %v441_v62 = vpop.eup %440 }
 0x132   :  { %v96_v63 = vmul.f32 %v441_v62, %v535_v17 }
 0x134   :  { %v108_v4 = vmul.f32 %v377_v0, %v96_v63 }
 0x135   :  { %v443_v1 = vpop.eup %442 }
 0x136   :  { %v445_v2 = vpop.eup %444  ;;  %v97_v3 = vmul.f32 %v443_v1, %v543_v25  ;;  %v120_v10 = vadd.f32 %v378_v5, %v108_v4  ;;  %v138_v25 = vsub.s32 0, %v137_v24 }
 0x137   :  { %v94_v6 = vmul.f32 %v445_v2, %v537_v18 }
 0x138   :  { %v109_v7 = vmul.f32 %v377_v0, %v97_v3  ;;  %v139_v28 = vrot.slane %v134_v26, %v138_v25 }
 0x139   :  { %v447_v8 = vpop.eup %446  ;;  %v106_v13 = vmul.f32 %v377_v0, %v94_v6 }
 0x13a   :  { %v449_v9 = vpop.eup %448  ;;  %v121_v11 = vadd.f32 %v378_v5, %v109_v7  ;;  %v95_v12 = vmul.f32 %v447_v8, %v546_v27  ;;  %v142_v27 = vsub.s32 1, %v137_v24 }
 0x13b   :  { %v98_v14 = vmul.f32 %v449_v9, %v553_v33  ;;  %v118_v19 = vadd.f32 %v378_v5, %v106_v13 }
 0x13c   :  { %v124_v15 = vpack.c.bf16 %v121_v11, %v120_v10  ;;  %v107_v16 = vmul.f32 %v377_v0, %v95_v12  ;;  %v143_v29 = vrot.slane %v134_v26, %v142_v27 }
 0x13d   :  { %v110_v17 = vmul.f32 %v377_v0, %v98_v14 }
 0x13e   :  { %388 = vmatmul.mubr.msk.bf16.vlgmr.msra.gmra.mxu1 %vm31_vm0, %v124_v15  ;;  %v119_v20 = vadd.f32 %v378_v5, %v107_v16 }
 0x13f   :  { %247 = vmatprep.mubr.bf16.mxu1 %v490_v40  ;;  %v122_v21 = vadd.f32 %v378_v5, %v110_v17 }
 0x140   :  { %v123_v18 = vpack.c.bf16 %v119_v20, %v118_v19 }
 0x141   :  { %v125_v22 = vpack.c.bf16 %v122_v21, %v122_v21 }
 0x142   :  { %387 = vmatmul.mubr.msk.bf16.vlgmr.msra.gmra.mxu0 %vm31_vm0, %v123_v18 }
 0x146   :  { %389 = vmatmul.mubr.msk.bf16.gmra.mxu1 %vm31_vm0, %v125_v22 }
 0x1fe   :  { %v239_v30 = vpop.f32.mrf.mxu1 }
 0x1ff   :  { %v604_v31 = vadd.f32 %v239_v30, %v139_v28 }
 0x200   :  { %v241_v32 = vpop.f32.mrf.mxu1 }
 0x201   :  { %v394_v33 = vmul.f32 -1.702, %v604_v31  ;;  %v607_v34 = vadd.f32 %v241_v32, %v143_v29 }
 0x202   :  { %v229_v35 = vpop.f32.mrf.mxu0  ;;  %v243_v36 = vpop.f32.mrf.mxu1 }
 0x203   :  { %v284_v37 = vmul.f32 1.442695, %v394_v33  ;;  %v395_v38 = vmul.f32 -1.702, %v607_v34  ;;  %v610_v39 = vadd.f32 %v229_v35, %v139_v28  ;;  %v612_v40 = vadd.f32 %v243_v36, %v139_v28 }
 0x204   :  { %v231_v41 = vpop.f32.mrf.mxu0  ;;  %v245_v42 = vpop.f32.mrf.mxu1 }
 0x205   :  { %450 = vpow2.f32 %v284_v37  ;;  %v286_v43 = vmul.f32 1.442695, %v395_v38  ;;  %v390_v44 = vmul.f32 -1.702, %v610_v39  ;;  %v396_v45 = vmul.f32 -1.702, %v612_v40 }
 0x206   :  { %v616_v46 = vadd.f32 %v231_v41, %v143_v29  ;;  %v618_v47 = vadd.f32 %v245_v42, %v143_v29  ;;  %v233_v48 = vpop.f32.mrf.mxu0  ;;  %v249_v49 = vpop.f32.mrf.mxu1 }
 0x207   :  { %452 = vpow2.f32 %v286_v43  ;;  %v276_v50 = vmul.f32 1.442695, %v390_v44  ;;  %v288_v51 = vmul.f32 1.442695, %v396_v45  ;;  %v620_v52 = vadd.f32 %v233_v48, %v139_v28 }
 0x208   :  { %v391_v53 = vmul.f32 -1.702, %v616_v46  ;;  %v397_v54 = vmul.f32 -1.702, %v618_v47  ;;  %v624_v55 = vadd.f32 %v249_v49, %v139_v28  ;;  %v235_v56 = vpop.f32.mrf.mxu0  ;;  %v251_v57 = vpop.f32.mrf.mxu1 }
 0x209   :  { %454 = vpow2.f32 %v276_v50  ;;  %v392_v58 = vmul.f32 -1.702, %v620_v52  ;;  %v627_v59 = vadd.f32 %v235_v56, %v143_v29  ;;  %v629_v60 = vadd.f32 %v251_v57, %v143_v29 }
 0x20a   :  { %456 = vpow2.f32 %v288_v51  ;;  %v278_v61 = vmul.f32 1.442695, %v391_v53  ;;  %v290_v62 = vmul.f32 1.442695, %v397_v54  ;;  %v398_v63 = vmul.f32 -1.702, %v624_v55  ;;  %v253_v0 = vpop.f32.mrf.mxu1 }
 0x20b   :  { %v280_v1 = vmul.f32 1.442695, %v392_v58  ;;  %v393_v2 = vmul.f32 -1.702, %v627_v59  ;;  %v399_v3 = vmul.f32 -1.702, %v629_v60 }
 0x20c   :  { %458 = vpow2.f32 %v278_v61  ;;  %v292_v4 = vmul.f32 1.442695, %v398_v63  ;;  %v254_v5 = vpop.f32.mrf.mxu1 }
 0x20d   :  { %460 = vpow2.f32 %v290_v62  ;;  %v282_v6 = vmul.f32 1.442695, %v393_v2  ;;  %v294_v7 = vmul.f32 1.442695, %v399_v3 }
 0x20e   :  { %462 = vpow2.f32 %v280_v1 }
 0x20f   :  { %464 = vpow2.f32 %v292_v4 }
 0x210   :  { %466 = vpow2.f32 %v282_v6 }
 0x211   :  { %468 = vpow2.f32 %v294_v7 }
 0x212   :  { %v451_v8 = vpop.eup %450 }
 0x213   :  { %v300_v9 = vadd.f32 1.0, %v451_v8 }
 0x214   :  { %v453_v10 = vpop.eup %452 }
 0x215   :  { %470 = vrcp.f32 %v300_v9  ;;  %v301_v11 = vadd.f32 1.0, %v453_v10 }
 0x216   :  { %v455_v12 = vpop.eup %454 }
 0x217   :  { %v457_v13 = vpop.eup %456  ;;  %472 = vrcp.f32 %v301_v11  ;;  %v296_v14 = vadd.f32 1.0, %v455_v12 }
 0x218   :  { %v302_v15 = vadd.f32 1.0, %v457_v13 }
 0x219   :  { %v459_v16 = vpop.eup %458  ;;  %474 = vrcp.f32 %v296_v14 }
 0x21a   :  { %v461_v17 = vpop.eup %460  ;;  %v297_v19 = vadd.f32 1.0, %v459_v16  ;;  %476 = vrcp.f32 %v302_v15 }
 0x21b   :  { %v463_v20 = vpop.eup %462  ;;  %v303_v18 = vadd.f32 1.0, %v461_v17 }
 0x21c   :  { %v465_v21 = vpop.eup %464  ;;  %478 = vrcp.f32 %v297_v19  ;;  %v298_v22 = vadd.f32 1.0, %v463_v20 }
 0x21d   :  { %v467_v23 = vpop.eup %466  ;;  %480 = vrcp.f32 %v303_v18  ;;  %v304_v24 = vadd.f32 1.0, %v465_v21 }
 0x21e   :  { %v469_v25 = vpop.eup %468  ;;  %482 = vrcp.f32 %v298_v22  ;;  %v299_v26 = vadd.f32 1.0, %v467_v23 }
 0x21f   :  { %484 = vrcp.f32 %v304_v24  ;;  %v305_v27 = vadd.f32 1.0, %v469_v25 }
 0x220   :  { %486 = vrcp.f32 %v299_v26 }
 0x221   :  { %488 = vrcp.f32 %v305_v27 }
 0x222   :  { %v471_v28 = vpop.eup %470 }
 0x223   :  { %v330_v30 = vmul.f32 %v471_v28, %v604_v31 }
 0x224   :  { %v473_v29 = vpop.eup %472 }
 0x225   :  { %v331_v32 = vmul.f32 %v473_v29, %v607_v34 }
 0x226   :  { %v475_v33 = vpop.eup %474 }
 0x227   :  { %v407_v35 = vpack.c.bf16 %v331_v32, %v330_v30  ;;  %v477_v36 = vpop.eup %476  ;;  %v326_v41 = vmul.f32 %v475_v33, %v610_v39 }
 0x228   :  { %v332_v44 = vmul.f32 %v477_v36, %v612_v40 }
 0x229   :  { %v479_v37 = vpop.eup %478  ;;  %370 = vst [vmem:[%s664_s5 + $0x10] sm:$0xff] %v407_v35 }
 0x22a   :  { %v481_v38 = vpop.eup %480  ;;  %v327_v42 = vmul.f32 %v479_v37, %v616_v46 }
 0x22b   :  { %v483_v43 = vpop.eup %482  ;;  %v333_v31 = vmul.f32 %v481_v38, %v618_v47 }
 0x22c   :  { %v485_v45 = vpop.eup %484  ;;  %v405_v34 = vpack.c.bf16 %v327_v42, %v326_v41  ;;  %v328_v51 = vmul.f32 %v483_v43, %v620_v52 }
 0x22d   :  { %v487_v48 = vpop.eup %486  ;;  %v408_v49 = vpack.c.bf16 %v333_v31, %v332_v44  ;;  %v334_v40 = vmul.f32 %v485_v45, %v624_v55 }
 0x22e   :  { %v489_v50 = vpop.eup %488  ;;  %368 = vst [vmem:[%s664_s5] sm:$0xff] %v405_v34  ;;  %v329_v39 = vmul.f32 %v487_v48, %v627_v59 }
 0x22f   :  { %371 = vst [vmem:[%s664_s5 + $0x18] sm:$0xff] %v408_v49  ;;  %v335_v46 = vmul.f32 %v489_v50, %v629_v60 }
 0x230   :  { %v406_v47 = vpack.c.bf16 %v329_v39, %v328_v51 }
 0x231   :  { %v409_v53 = vpack.c.bf16 %v335_v46, %v334_v40 }
 0x232   :  { %369 = vst [vmem:[%s664_s5 + $0x8] sm:$0xff] %v406_v47 }
 0x233   :  { %372 = vst [vmem:[%s664_s5 + $0x20] sm:$0x11] %v409_v53 }

// kernel: _lambda_.31
= control target key start
LH: loop header
LB: loop body
LE: loop exit
PB: predicated region body
PF: predicated region fallthrough
CT: control target
= control target key end

     0   :  { %vm277_vm0 = vcmask 519168   ;;  %vm282_vm1 = vcmask 516096   ;;  %s523_s1 = inlined_call_operand.vmem [shape: bf16[256,64], index: 1, kind: input, shape index: {}]   ;;  %s524_s0 = inlined_call_operand.vmem [shape: bf16[34,256], index: 0, kind: input, shape index: {}]   ;;  %s525_s3 = inlined_call_operand.vmem [shape: bf16[34,64], index: 3, kind: input, shape index: {}]   ;;  %s526_s2 = inlined_call_operand.vmem [shape: f32[1,64], index: 2, kind: input, shape index: {}]   ;;  %s527_s4 = inlined_call_operand.vmem [shape: bf16[34,64], index: 4, kind: output, shape index: {}]  }
   0x1   :  { %v380_v0 = vld [vmem:[%s523_s1 + $0x78] sm:$0xff]   ;;  %v382_v2 = vld [vmem:[%s523_s1 + $0x70] sm:$0xff]   ;;  %v384_v4 = vld [vmem:[%s523_s1 + $0x68] sm:$0xff]  }
   0x2   :  { %v381_v1 = vld [vmem:[%s523_s1 + $0x38] sm:$0xff]   ;;  %330 = vmatprep.subr.bf16.mxu0 %v380_v0  ;;  %364 = vmatprep.subr.bf16.mxu1 %v380_v0  ;;  %v383_v3 = vld [vmem:[%s523_s1 + $0x30] sm:$0xff]   ;;  %v385_v5 = vld [vmem:[%s523_s1 + $0x28] sm:$0xff]  }
   0x3   :  { %331 = vmatpush3.bf16.msra.mxu0 %v381_v1  ;;  %372 = vmatpush3.bf16.msra.mxu1 %v381_v1  ;;  %v386_v6 = vld [vmem:[%s523_s1 + $0x60] sm:$0xff]   ;;  %v388_v8 = vld [vmem:[%s523_s1 + $0x58] sm:$0xff]   ;;  %v390_v10 = vld [vmem:[%s523_s1 + $0x50] sm:$0xff]  }
   0x4   :  { %332 = vmatprep.subr.bf16.mxu0 %v382_v2  ;;  %365 = vmatprep.subr.bf16.mxu1 %v382_v2  ;;  %v387_v7 = vld [vmem:[%s523_s1 + $0x20] sm:$0xff]   ;;  %v389_v9 = vld [vmem:[%s523_s1 + $0x18] sm:$0xff]   ;;  %v391_v13 = vld [vmem:[%s523_s1 + $0x10] sm:$0xff]  }
   0x5   :  { %v398_v11 = vld [vmem:[%s524_s0 + $0x4] ss:$8 sps:$4 sm:$0xff]   ;;  %v401_v12 = vld [vmem:[%s524_s0 + $0x14] ss:$8 sps:$4 sm:$0xff]   ;;  %v396_v19 = vld [vmem:[%s524_s0] ss:$8 sps:$4 sm:$0xff]  }
   0x6   :  { %v392_v14 = vld [vmem:[%s523_s1 + $0x48] sm:$0xff]   ;;  %217 = vmatprep.mubr.bf16.mxu0 %v398_v11  ;;  %225 = vmatprep.mubr.bf16.mxu1 %v401_v12  ;;  %v394_v16 = vld [vmem:[%s523_s1 + $0x40] sm:$0xff]   ;;  %v399_v20 = vld [vmem:[%s524_s0 + $0x10] ss:$8 sps:$4 sm:$0xff]  }
   0x7   :  { %333 = vmatpush3.bf16.msra.mxu0 %v383_v3  ;;  %373 = vmatpush3.bf16.msra.mxu1 %v383_v3  ;;  %v393_v15 = vld [vmem:[%s523_s1 + $0x8] sm:$0xff]   ;;  %v395_v17 = vld [vmem:[%s523_s1] sm:$0xff]   ;;  %v245_v47 = vld [vmem:[%s525_s3 + $0x10] sm:$0x1] }
   0x8   :  { %334 = vmatprep.subr.bf16.mxu0 %v384_v4  ;;  %366 = vmatprep.subr.bf16.mxu1 %v384_v4  ;;  %v22_v18 = vld [vmem:[%s524_s0 + $0x20] sm:$0x11]  ;;  %v329_v26 = vld [vmem:[%s525_s3 + $0x8] sm:$0xff]   ;;  %v250_v56 = vunpack.c.l.bf16 %v245_v47 }
   0x9   :  { %v294_v21 = vcombine.high %v22_v18, %v22_v18  ;;  %v293_v22 = vcombine.low %v22_v18, %v22_v18  ;;  %v322_v25 = vld [vmem:[%s525_s3] sm:$0xff]   ;;  %v327_v33 = vunpack.c.l.bf16 %v329_v26  ;;  %v328_v41 = vunpack.c.h.bf16 %v329_v26 }
   0xa   :  { %v288_v27 = vld [vmem:[%s526_s2] ss:$0 sm:$0xff]  ;;  %v323_v31 = vunpack.c.l.bf16 %v322_v25  ;;  %v324_v39 = vunpack.c.h.bf16 %v322_v25 }
   0xb   :  { %335 = vmatpush3.bf16.msra.mxu0 %v385_v5  ;;  %374 = vmatpush3.bf16.msra.mxu1 %v385_v5 }
   0xc   :  { %336 = vmatprep.subr.bf16.mxu0 %v386_v6  ;;  %367 = vmatprep.subr.bf16.mxu1 %v386_v6 }
   0xf   :  { %337 = vmatpush3.bf16.msra.mxu0 %v387_v7  ;;  %375 = vmatpush3.bf16.msra.mxu1 %v387_v7 }
  0x10   :  { %338 = vmatprep.subr.bf16.mxu0 %v388_v8  ;;  %368 = vmatprep.subr.bf16.mxu1 %v388_v8 }
  0x13   :  { %339 = vmatpush3.bf16.msra.mxu0 %v389_v9  ;;  %376 = vmatpush3.bf16.msra.mxu1 %v389_v9 }
  0x14   :  { %340 = vmatprep.subr.bf16.mxu0 %v390_v10  ;;  %369 = vmatprep.subr.bf16.mxu1 %v390_v10 }
  0x17   :  { %341 = vmatpush3.bf16.msra.mxu0 %v391_v13  ;;  %377 = vmatpush3.bf16.msra.mxu1 %v391_v13 }
  0x18   :  { %342 = vmatprep.subr.bf16.mxu0 %v392_v14  ;;  %370 = vmatprep.subr.bf16.mxu1 %v392_v14 }
  0x1b   :  { %343 = vmatpush3.bf16.msra.mxu0 %v393_v15  ;;  %378 = vmatpush3.bf16.msra.mxu1 %v393_v15 }
  0x1c   :  { %344 = vmatprep.subr.bf16.mxu0 %v394_v16  ;;  %371 = vmatprep.subr.bf16.mxu1 %v394_v16 }
  0x1f   :  { %345 = vmatpush3.bf16.msra.mxu0 %v395_v17  ;;  %379 = vmatpush3.bf16.msra.mxu1 %v395_v17 }
  0x22   :  { %218 = vmatmul.mubr.bf16.vlgmr.msra.gmra.mxu0 %v396_v19  ;;  %226 = vmatmul.mubr.bf16.vlgmr.msra.gmra.mxu1 %v399_v20 }
  0x23   :  { %233 = vmatprep.mubr.bf16.mxu1 %v294_v21 }
  0x2a   :  { %234 = vmatmul.mubr.bf16.gmra.mxu1 %v293_v22 }
  0xe2   :  { %v346_v23 = vpop.f32.mrf.mxu0  ;;  %v352_v24 = vpop.f32.mrf.mxu1 }
  0xe4   :  { %v347_v28 = vpop.f32.mrf.mxu0  ;;  %v353_v29 = vpop.f32.mrf.mxu1 }
  0xe5   :  { %v348_v30 = vadd.f32 %v347_v28, %v346_v23  ;;  %v354_v32 = vadd.f32 %v353_v29, %v352_v24 }
  0xe6   :  { %v349_v34 = vpop.f32.mrf.mxu0  ;;  %v355_v35 = vpop.f32.mrf.mxu1 }
  0xe7   :  { %v220_v36 = vadd.f32 %v348_v30, %v288_v27  ;;  %v228_v37 = vadd.f32 %v354_v32, %v288_v27 }
  0xe8   :  { %v350_v38 = vpop.f32.mrf.mxu0  ;;  %v356_v40 = vpop.f32.mrf.mxu1 }
  0xe9   :  { %v251_v42 = vadd.f32 %v323_v31, %v220_v36  ;;  %v253_v43 = vadd.f32 %v327_v33, %v228_v37  ;;  %v351_v44 = vadd.f32 %v350_v38, %v349_v34  ;;  %v357_v45 = vadd.f32 %v356_v40, %v355_v35 }
  0xea   :  { %v358_v46 = vpop.f32.mrf.mxu1 }
  0xeb   :  { %v316_v48 = vpack.c.bf16 %v251_v42, %v251_v42  ;;  %v318_v49 = vpack.c.bf16 %v253_v43, %v253_v43  ;;  %v223_v50 = vadd.f32 %v351_v44, %v288_v27  ;;  %v231_v51 = vadd.f32 %v357_v45, %v288_v27 }
  0xec   :  { %v359_v52 = vpop.f32.mrf.mxu1 }
  0xed   :  { %278 = vst.msk [vmem:[%s527_s4] sm:$0xf] %vm277_vm0, %v316_v48  ;;  %280 = vst.msk [vmem:[%s527_s4 + $0x8] sm:$0xf] %vm277_vm0, %v318_v49  ;;  %v252_v53 = vadd.f32 %v324_v39, %v223_v50  ;;  %v254_v54 = vadd.f32 %v328_v41, %v231_v51  ;;  %v360_v55 = vadd.f32 %v359_v52, %v358_v46 }
  0xee   :  { %v361_v57 = vpop.f32.mrf.mxu1 }
  0xef   :  { %v317_v58 = vpack.c.bf16 %v252_v53, %v252_v53  ;;  %v319_v59 = vpack.c.bf16 %v254_v54, %v254_v54  ;;  %v236_v60 = vadd.f32 %v360_v55, %v288_v27 }
  0xf0   :  { %v362_v61 = vpop.f32.mrf.mxu1 }
  0xf1   :  { %279 = vst.msk [vmem:[%s527_s4 + $0x4] sm:$0xf] %vm277_vm0, %v317_v58  ;;  %281 = vst.msk [vmem:[%s527_s4 + $0xc] sm:$0xf] %vm277_vm0, %v319_v59  ;;  %v255_v62 = vadd.f32 %v250_v56, %v236_v60 }
  0xf3   :  { %v320_v63 = vpack.c.bf16 %v255_v62, %v255_v62 }
  0xf5   :  { %283 = vst.msk [vmem:[%s527_s4 + $0x10] sm:$0x1] %vm282_vm1, %v320_v63 }

// kernel: _lambda_.37
= control target key start
LH: loop header
LB: loop body
LE: loop exit
PB: predicated region body
PF: predicated region fallthrough
CT: control target
= control target key end

     0   :  { %vm20_vm0 = vcmask 517120   ;;  %v165_v8 = vmov 0.0   ;;  %vm166_vm1 = vmmov 0   ;;  %vm84_vm2 = vcmask 523264   ;;  %s219_s0 = inlined_call_operand.vmem [shape: bf16[2,64], index: 0, kind: input, shape index: {}]   ;;  %s220_s1 = inlined_call_operand.vmem [shape: bf16[64,64], index: 1, kind: input, shape index: {}]   ;;  %s221_s2 = inlined_call_operand.vmem [shape: f32[1,64], index: 2, kind: input, shape index: {}]   ;;  %s222_s3 = inlined_call_operand.vmem [shape: f32[1,64], index: 3, kind: input, shape index: {}]   ;;  %s223_s4 = inlined_call_operand.vmem [shape: f32[2,64], index: 4, kind: output, shape index: {}]  }
   0x1   :  { %v18_v0 = vld [vmem:[%s219_s0] sm:$0x1]  ;;  %145 = vmatprep.subr.bf16.mxu0 %v165_v8  ;;  %v159_v9 = vld [vmem:[%s220_s1 + $0x18] sm:$0xff]   ;;  %153 = vmatprep.mubr.msk.bf16.mxu0 %vm166_vm1, %v165_v8  ;;  %v160_v10 = vld [vmem:[%s220_s1 + $0x10] sm:$0xff]  }
   0x2   :  { %v19_v1 = vunpack.c.l.bf16 %v18_v0  ;;  %146 = vmatpush3.bf16.msra.mxu0 %v159_v9  ;;  %v161_v11 = vld [vmem:[%s220_s1 + $0x8] sm:$0xff]   ;;  %v162_v12 = vld [vmem:[%s220_s1] sm:$0xff]  }
   0x3   :  { %147 = vmatprep.subr.bf16.mxu0 %v165_v8  ;;  %v133_v17 = vld [vmem:[%s221_s2] ss:$0 sm:$0xff] }
   0x4   :  { %v21_v2 = vsel %vm20_vm0, %v19_v1, 0.0  ;;  %v134_v19 = vld [vmem:[%s222_s3] ss:$0 sm:$0xff] }
   0x5   :  { %22 = vadd.xlane.f32.xlu0 %v21_v2 }
   0x6   :  { %148 = vmatpush3.bf16.msra.mxu0 %v160_v10 }
   0x7   :  { %149 = vmatprep.subr.bf16.mxu0 %v165_v8 }
   0xa   :  { %150 = vmatpush3.bf16.msra.mxu0 %v161_v11 }
   0xb   :  { %151 = vmatprep.subr.bf16.mxu0 %v165_v8 }
   0xe   :  { %152 = vmatpush3.bf16.msra.mxu0 %v162_v12 }
  0x8e   :  { %v23_v3 = vpop.xlane.xlu0 %22 }
  0x8f   :  { %v25_v4 = vmul.f32 0.015625, %v23_v3 }
  0x91   :  { %v26_v5 = vsub.f32 %v19_v1, %v25_v4 }
  0x93   :  { %v27_v6 = vmul.f32 %v26_v5, %v26_v5 }
  0x95   :  { %v28_v7 = vsel %vm20_vm0, %v27_v6, 0.0 }
  0x96   :  { %29 = vadd.xlane.f32.xlu0 %v28_v7 }
 0x11f   :  { %v30_v13 = vpop.xlane.xlu0 %29 }
 0x120   :  { %v31_v14 = vmul.f32 0.015625, %v30_v13 }
 0x122   :  { %v32_v15 = vadd.f32 1e-05, %v31_v14 }
 0x124   :  { %163 = vrsqrt.f32 %v32_v15 }
 0x131   :  { %v164_v16 = vpop.eup %163 }
 0x132   :  { %v34_v18 = vmul.f32 %v164_v16, %v26_v5 }
 0x134   :  { %v42_v20 = vmul.f32 %v133_v17, %v34_v18 }
 0x136   :  { %v50_v21 = vadd.f32 %v134_v19, %v42_v20 }
 0x138   :  { %v51_v22 = vpack.c.bf16 %v50_v21, %v50_v21 }
 0x13a   :  { %154 = vmatmul.mubr.msk.bf16.vlgmr.msra.gmra.mxu0 %vm84_vm2, %v51_v22 }
 0x1fa   :  { %v122_v23 = vpop.f32.mrf.mxu0 }
 0x1fb   :  { %128 = vst.msk [vmem:[%s223_s4] sm:$0x3] %vm20_vm0, %v122_v23 }
 0x1fc   :  { %v155_v24 = vpop.f32.mrf.mxu0 }
 0x1fe   :  { %v125_v25 = vpop.f32.mrf.mxu0 }
 0x200   :  { %v156_v26 = vpop.f32.mrf.mxu0 }

// kernel: _lambda_.38
= control target key start
LH: loop header
LB: loop body
LE: loop exit
PB: predicated region body
PF: predicated region fallthrough
CT: control target
= control target key end

     0   :  { %vm33_vm0 = vcmask 523264   ;;  %v395_v50 = vmov 0   ;;  %vm310_vm1 = vcmask 1043456   ;;  %vm311_vm2 = vcmask 523268   ;;  %s550_s0 = inlined_call_operand.vmem [shape: bf16[48,64], index: 0, kind: input, shape index: {}]   ;;  %s551_s1 = inlined_call_operand.vmem [shape: bf16[64,192], index: 1, kind: input, shape index: {}]   ;;  %s552_s3 = inlined_call_operand.vmem [shape: f32[1,64], index: 3, kind: input, shape index: {}]   ;;  %s553_s4 = inlined_call_operand.vmem [shape: f32[1,64], index: 4, kind: input, shape index: {}]   ;;  %s554_s2 = inlined_call_operand.vmem [shape: f32[1,192], index: 2, kind: input, shape index: {}]   ;;  %s555_s5 = inlined_call_operand.vmem [shape: bf16[48,192], index: 5, kind: output, shape index: {}]  }
   0x1   :  { %v360_v0 = vld [vmem:[%s550_s0 + $0x8] sm:$0xff]   ;;  %v349_v1 = vld [vmem:[%s550_s0] sm:$0xff]   ;;  %v361_v5 = vld [vmem:[%s550_s0 + $0x10] sm:$0xff]   ;;  %253 = vmatprep.mubr.bf16.mxu1 %v395_v50  ;;  %243 = vmatprep.mubr.bf16.mxu0 %v395_v50 }
   0x2   :  { %v354_v2 = vunpack.c.l.bf16 %v360_v0  ;;  %v355_v3 = vunpack.c.h.bf16 %v360_v0  ;;  %v350_v4 = vunpack.c.l.bf16 %v349_v1  ;;  %v351_v6 = vunpack.c.h.bf16 %v349_v1  ;;  %v371_v45 = vld [vmem:[%s551_s1 + $0x34] ss:$8 sps:$4 sm:$0xff]   ;;  %v373_v46 = vld [vmem:[%s551_s1 + $0x30] ss:$8 sps:$4 sm:$0xff]   ;;  %v374_v47 = vld [vmem:[%s551_s1 + $0x24] ss:$8 sps:$4 sm:$0xff]  }
   0x3   :  { %v358_v10 = vunpack.c.l.bf16 %v361_v5  ;;  %v359_v12 = vunpack.c.h.bf16 %v361_v5  ;;  %362 = vmatprep.subr.bf16.mxu1 %v371_v45  ;;  %219 = vmatprep.subr.bf16.mxu0 %v371_v45  ;;  %v376_v48 = vld [vmem:[%s551_s1 + $0x20] ss:$8 sps:$4 sm:$0xff]   ;;  %v377_v49 = vld [vmem:[%s551_s1 + $0x14] ss:$8 sps:$4 sm:$0xff]   ;;  %v379_v51 = vld [vmem:[%s551_s1 + $0x10] ss:$8 sps:$4 sm:$0xff]  }
   0x4   :  { %v40_v7 = vsel %vm33_vm0, %v354_v2, 0.0  ;;  %v34_v8 = vsel %vm33_vm0, %v350_v4, 0.0  ;;  %v43_v9 = vsel %vm33_vm0, %v355_v3, 0.0  ;;  %v37_v11 = vsel %vm33_vm0, %v351_v6, 0.0  ;;  %366 = vmatpush1.bf16.msra.mxu1 %v373_v46  ;;  %220 = vmatpush1.bf16.msra.mxu0 %v373_v46  ;;  %v380_v52 = vld [vmem:[%s551_s1 + $0x4] ss:$8 sps:$4 sm:$0xff]   ;;  %vm516_vm3 = vmor %vm311_vm2, %vm310_vm1 }
   0x5   :  { %41 = vadd.xlane.f32.xlu0 %v40_v7  ;;  %35 = vadd.xlane.f32.xlu1 %v34_v8  ;;  %v46_v13 = vsel %vm33_vm0, %v358_v10, 0.0  ;;  %v49_v14 = vsel %vm33_vm0, %v359_v12, 0.0  ;;  %v382_v53 = vld [vmem:[%s551_s1] ss:$8 sps:$4 sm:$0xff]  }
   0x6   :  { %363 = vmatprep.subr.bf16.mxu1 %v374_v47  ;;  %221 = vmatprep.subr.bf16.mxu0 %v374_v47 }
   0x8   :  { %367 = vmatpush1.bf16.msra.mxu1 %v376_v48  ;;  %222 = vmatpush1.bf16.msra.mxu0 %v376_v48 }
   0x9   :  { %44 = vadd.xlane.f32.xlu0 %v43_v9  ;;  %38 = vadd.xlane.f32.xlu1 %v37_v11 }
   0xa   :  { %364 = vmatprep.subr.bf16.mxu1 %v377_v49  ;;  %223 = vmatprep.subr.bf16.mxu0 %v377_v49 }
   0xc   :  { %368 = vmatpush1.bf16.msra.mxu1 %v379_v51  ;;  %224 = vmatpush1.bf16.msra.mxu0 %v379_v51 }
   0xd   :  { %47 = vadd.xlane.f32.xlu0 %v46_v13  ;;  %50 = vadd.xlane.f32.xlu1 %v49_v14 }
   0xe   :  { %365 = vmatprep.subr.bf16.mxu1 %v380_v52  ;;  %225 = vmatprep.subr.bf16.mxu0 %v380_v52 }
  0x10   :  { %369 = vmatpush1.bf16.msra.mxu1 %v382_v53  ;;  %226 = vmatpush1.bf16.msra.mxu0 %v382_v53 }
  0x8e   :  { %v42_v15 = vpop.xlane.xlu0 %41  ;;  %v36_v16 = vpop.xlane.xlu1 %35 }
  0x8f   :  { %v55_v17 = vmul.f32 0.015625, %v42_v15  ;;  %v53_v18 = vmul.f32 0.015625, %v36_v16  ;;  %v324_v16 = vld [vmem:[%s553_s4] ss:$0 sm:$0xff] }
  0x91   :  { %v441_v19 = vsub.f32 %v354_v2, %v55_v17  ;;  %v443_v20 = vsub.f32 %v350_v4, %v53_v18 }
  0x92   :  { %v45_v21 = vpop.xlane.xlu0 %44  ;;  %v39_v22 = vpop.xlane.xlu1 %38 }
  0x93   :  { %v56_v23 = vmul.f32 0.015625, %v45_v21  ;;  %v67_v24 = vmul.f32 %v441_v19, %v441_v19  ;;  %v54_v25 = vmul.f32 0.015625, %v39_v22  ;;  %v65_v26 = vmul.f32 %v443_v20, %v443_v20 }
  0x95   :  { %v449_v27 = vsub.f32 %v355_v3, %v56_v23  ;;  %v77_v28 = vsel %vm33_vm0, %v67_v24, 0.0  ;;  %v452_v29 = vsub.f32 %v351_v6, %v54_v25  ;;  %v71_v31 = vsel %vm33_vm0, %v65_v26, 0.0 }
  0x96   :  { %78 = vadd.xlane.f32.xlu0 %v77_v28  ;;  %v48_v30 = vpop.xlane.xlu0 %47  ;;  %v51_v32 = vpop.xlane.xlu1 %50 }
  0x97   :  { %v57_v33 = vmul.f32 0.015625, %v48_v30  ;;  %v68_v34 = vmul.f32 %v449_v27, %v449_v27  ;;  %v58_v35 = vmul.f32 0.015625, %v51_v32  ;;  %v66_v36 = vmul.f32 %v452_v29, %v452_v29 }
  0x99   :  { %v459_v37 = vsub.f32 %v358_v10, %v57_v33  ;;  %v80_v38 = vsel %vm33_vm0, %v68_v34, 0.0  ;;  %v462_v39 = vsub.f32 %v359_v12, %v58_v35  ;;  %v74_v41 = vsel %vm33_vm0, %v66_v36, 0.0  ;;  %v323_v10 = vld [vmem:[%s552_s3] ss:$0 sm:$0xff] }
  0x9a   :  { %81 = vadd.xlane.f32.xlu1 %v80_v38  ;;  %72 = vadd.xlane.f32.xlu0 %v71_v31 }
  0x9b   :  { %v69_v40 = vmul.f32 %v459_v37, %v459_v37  ;;  %v70_v42 = vmul.f32 %v462_v39, %v462_v39 }
  0x9d   :  { %v83_v43 = vsel %vm33_vm0, %v69_v40, 0.0  ;;  %v86_v44 = vsel %vm33_vm0, %v70_v42, 0.0 }
  0x9e   :  { %84 = vadd.xlane.f32.xlu0 %v83_v43  ;;  %75 = vadd.xlane.f32.xlu1 %v74_v41  ;;  %v150_v41 = vld [vmem:[%s554_s2] sm:$0x3] }
  0xa2   :  { %87 = vadd.xlane.f32.xlu1 %v86_v44 }
 0x11f   :  { %v79_v54 = vpop.xlane.xlu0 %78 }
 0x120   :  { %v91_v55 = vmul.f32 0.015625, %v79_v54 }
 0x122   :  { %v97_v56 = vadd.f32 1e-05, %v91_v55 }
 0x123   :  { %v73_v57 = vpop.xlane.xlu0 %72  ;;  %v82_v58 = vpop.xlane.xlu1 %81 }
 0x124   :  { %383 = vrsqrt.f32 %v97_v56  ;;  %v89_v59 = vmul.f32 0.015625, %v73_v57  ;;  %v92_v60 = vmul.f32 0.015625, %v82_v58 }
 0x126   :  { %v95_v61 = vadd.f32 1e-05, %v89_v59  ;;  %v98_v62 = vadd.f32 1e-05, %v92_v60 }
 0x127   :  { %v85_v63 = vpop.xlane.xlu0 %84  ;;  %v76_v0 = vpop.xlane.xlu1 %75 }
 0x128   :  { %385 = vrsqrt.f32 %v95_v61  ;;  %v93_v1 = vmul.f32 0.015625, %v85_v63  ;;  %v90_v2 = vmul.f32 0.015625, %v76_v0 }
 0x129   :  { %387 = vrsqrt.f32 %v98_v62 }
 0x12a   :  { %v99_v3 = vadd.f32 1e-05, %v93_v1  ;;  %v96_v4 = vadd.f32 1e-05, %v90_v2 }
 0x12b   :  { %v88_v5 = vpop.xlane.xlu1 %87 }
 0x12c   :  { %389 = vrsqrt.f32 %v99_v3  ;;  %v94_v6 = vmul.f32 0.015625, %v88_v5 }
 0x12d   :  { %391 = vrsqrt.f32 %v96_v4 }
 0x12e   :  { %v100_v7 = vadd.f32 1e-05, %v94_v6 }
 0x130   :  { %393 = vrsqrt.f32 %v100_v7 }
 0x131   :  { %v384_v8 = vpop.eup %383 }
 0x132   :  { %v109_v9 = vmul.f32 %v384_v8, %v441_v19 }
 0x134   :  { %v122_v14 = vmul.f32 %v323_v10, %v109_v9 }
 0x135   :  { %v386_v11 = vpop.eup %385 }
 0x136   :  { %v388_v12 = vpop.eup %387  ;;  %v107_v15 = vmul.f32 %v386_v11, %v443_v20  ;;  %v135_v22 = vadd.f32 %v324_v16, %v122_v14 }
 0x137   :  { %v110_v13 = vmul.f32 %v388_v12, %v449_v27 }
 0x138   :  { %v120_v25 = vmul.f32 %v323_v10, %v107_v15 }
 0x139   :  { %v390_v17 = vpop.eup %389  ;;  %v123_v18 = vmul.f32 %v323_v10, %v110_v13 }
 0x13a   :  { %v392_v21 = vpop.eup %391  ;;  %v111_v19 = vmul.f32 %v390_v17, %v459_v37  ;;  %v133_v31 = vadd.f32 %v324_v16, %v120_v25  ;;  %v152_v37 = vlaneseq }
 0x13b   :  { %v136_v23 = vadd.f32 %v324_v16, %v123_v18  ;;  %v108_v24 = vmul.f32 %v392_v21, %v452_v29 }
 0x13c   :  { %v124_v20 = vmul.f32 %v323_v10, %v111_v19  ;;  %v153_v38 = vshrl.u32 %v152_v37, 7 }
 0x13d   :  { %v394_v26 = vpop.eup %393  ;;  %v140_v28 = vpack.c.bf16 %v136_v23, %v135_v22  ;;  %v121_v27 = vmul.f32 %v323_v10, %v108_v24 }
 0x13e   :  { %v112_v30 = vmul.f32 %v394_v26, %v462_v39  ;;  %v137_v35 = vadd.f32 %v324_v16, %v124_v20  ;;  %v154_v40 = vsub.s32 0, %v153_v38  ;;  %v158_v39 = vsub.s32 1, %v153_v38 }
 0x13f   :  { %334 = vmatmul.mubr.msk.bf16.vlgmr.msra.gmra.mxu1 %vm33_vm0, %v140_v28  ;;  %v134_v32 = vadd.f32 %v324_v16, %v121_v27 }
 0x140   :  { %263 = vmatprep.mubr.bf16.mxu1 %v395_v50  ;;  %v125_v33 = vmul.f32 %v323_v10, %v112_v30  ;;  %v155_v42 = vrot.slane %v150_v41, %v154_v40  ;;  %v159_v43 = vrot.slane %v150_v41, %v158_v39 }
 0x141   :  { %v139_v34 = vpack.c.bf16 %v134_v32, %v133_v31 }
 0x142   :  { %v138_v36 = vadd.f32 %v324_v16, %v125_v33 }
 0x143   :  { %333 = vmatmul.mubr.msk.bf16.vlgmr.msra.gmra.mxu0 %vm33_vm0, %v139_v34 }
 0x144   :  { %v141_v29 = vpack.c.bf16 %v138_v36, %v137_v35 }
 0x147   :  { %335 = vmatmul.mubr.msk.bf16.gmra.mxu1 %vm33_vm0, %v141_v29 }
 0x1ff   :  { %v255_v44 = vpop.f32.mrf.mxu1 }
 0x200   :  { %v256_v46 = vadd.f32 %v255_v44, %v155_v42 }
 0x201   :  { %v257_v45 = vpop.f32.mrf.mxu1 }
 0x202   :  { %v258_v47 = vadd.f32 %v257_v45, %v159_v43 }
 0x203   :  { %v245_v49 = vpop.f32.mrf.mxu0  ;;  %v259_v50 = vpop.f32.mrf.mxu1 }
 0x204   :  { %v344_v51 = vpack.c.bf16 %v258_v47, %v256_v46  ;;  %v246_v54 = vadd.f32 %v245_v49, %v155_v42  ;;  %v260_v55 = vadd.f32 %v259_v50, %v155_v42 }
 0x205   :  { %v247_v52 = vpop.f32.mrf.mxu0  ;;  %v261_v53 = vpop.f32.mrf.mxu1 }
 0x206   :  { %315 = vst.msk [vmem:[%s555_s5 + $0x10] sm:$0xff] %vm516_vm3, %v344_v51  ;;  %v248_v56 = vadd.f32 %v247_v52, %v159_v43  ;;  %v262_v57 = vadd.f32 %v261_v53, %v159_v43 }
 0x207   :  { %v249_v58 = vpop.f32.mrf.mxu0  ;;  %v265_v59 = vpop.f32.mrf.mxu1 }
 0x208   :  { %v342_v60 = vpack.c.bf16 %v248_v56, %v246_v54  ;;  %v345_v61 = vpack.c.bf16 %v262_v57, %v260_v55  ;;  %v250_v0 = vadd.f32 %v249_v58, %v155_v42  ;;  %v266_v1 = vadd.f32 %v265_v59, %v155_v42 }
 0x209   :  { %v251_v62 = vpop.f32.mrf.mxu0  ;;  %v267_v63 = vpop.f32.mrf.mxu1 }
 0x20a   :  { %313 = vst.msk [vmem:[%s555_s5] sm:$0xff] %vm516_vm3, %v342_v60  ;;  %316 = vst.msk [vmem:[%s555_s5 + $0x18] sm:$0xff] %vm516_vm3, %v345_v61  ;;  %v252_v2 = vadd.f32 %v251_v62, %v159_v43  ;;  %v268_v3 = vadd.f32 %v267_v63, %v159_v43 }
 0x20b   :  { %v269_v4 = vpop.f32.mrf.mxu1 }
 0x20c   :  { %v343_v5 = vpack.c.bf16 %v252_v2, %v250_v0  ;;  %v346_v6 = vpack.c.bf16 %v268_v3, %v266_v1  ;;  %v270_v8 = vadd.f32 %v269_v4, %v155_v42 }
 0x20d   :  { %v271_v7 = vpop.f32.mrf.mxu1 }
 0x20e   :  { %314 = vst.msk [vmem:[%s555_s5 + $0x8] sm:$0xff] %vm516_vm3, %v343_v5  ;;  %317 = vst.msk [vmem:[%s555_s5 + $0x20] sm:$0xff] %vm516_vm3, %v346_v6  ;;  %v272_v9 = vadd.f32 %v271_v7, %v159_v43 }
 0x210   :  { %v347_v10 = vpack.c.bf16 %v272_v9, %v270_v8 }
 0x212   :  { %318 = vst.msk [vmem:[%s555_s5 + $0x28] sm:$0xff] %vm516_vm3, %v347_v10 }

// kernel: _lambda_.39
= control target key start
LH: loop header
LB: loop body
LE: loop exit
PB: predicated region body
PF: predicated region fallthrough
CT: control target
= control target key end

     0   :  { %s912_s6 = smov 0   ;;  %s1046_s0 = inlined_call_operand.vmem [shape: bf16[3,16,192], index: 0, kind: input, shape index: {}]   ;;  %s1047_s1 = inlined_call_operand.vmem [shape: bf16[3,16,64], index: 1, kind: output, shape index: {}]  }
   0x1 LB: > { %s728_s7 = sadd.s32 4294967295, %s891_s6   ;;  %p732_p0 = scmp.ge.s32.totalorder %s891_s6, 1  ;;  %s891_s6 = sphi %s912_s6, %s11_s6  }
   0x2   : > { %p87_p1 = scmp.lt.s32.totalorder %s891_s6, 4 }
   0x4   : > { %p88_p2 = pnand %p732_p0, %p87_p1 }
   0x5   : > { %p107_p3 = scmp.lt.s32.totalorder (!%p88_p2), %s728_s7, 2  ;;  %s895_s12 = smov (!%p88_p2), 64  }
   0x6   : > { %91 = sbr.rel (%p88_p2) target bundleno = 1553 (0x611), region = 24  ;;  %s896_s13 = smov (!%p88_p2), 48  }
   0x7   : > { %s897_s14 = smov (!%p88_p2), 96   ;;  %s898_s15 = smov (!%p88_p2), 112  }
   0x8   : > { %s899_s16 = smov (!%p88_p2), 32   ;;  %s900_s17 = smov (!%p88_p2), 16  }
   0x9   : > { %s901_s18 = smov (!%p88_p2), 80  }
   0xb   : > { %v893_v0 = vmov 0.0   ;;  %vm894_vm0 = vmmov 0   ;;  %s1049_s7 = smov (!%p107_p3, %s728_s7), 2  ;;  %vm139_vm1 = vcmask 130048   ;;  %v120_v11 = vlaneseq }
   0xc   : > { %771 = vmatprep.subr.bf16.mxu0 %v893_v0  ;;  %773 = vmatprep.mubr.msk.bf16.mxu0 %vm894_vm0, %v893_v0  ;;  %s751_s8 = sshll.u32 %s1049_s7, 4  ;;  %vm656_vm4 = vcmask 261120   ;;  %s752_s19 = sshll.u32 %s1049_s7, 3  ;;  %vm659_vm5 = vcmask 392192   ;;  %vm670_vm6 = vcmask 519168  }
   0xd   : > { %777 = vmatprep.subr.bf16.mxu1 %v893_v0  ;;  %779 = vmatprep.mubr.msk.bf16.mxu1 %vm894_vm0, %v893_v0  ;;  %s111_s11 = scalar_lea.vmem %s1046_s0, %s751_s8  ;;  %v937_v12 = vshrl.u32 %v120_v11, 7  ;;  %v939_v13 = vand.u32 127, %v120_v11  ;;  %s116_s22 = scalar_lea.vmem %s1047_s1, %s752_s19 }
   0xe   : > { %v118_v1 = vld [vmem:[%s111_s11] sm:$0xff]  ;;  %v119_v2 = vld [vmem:[%s111_s11 + $0x8] sm:$0xff] }
   0xf   : > { %v737_v3 = vcombine.low %v118_v1, %v119_v2  ;;  %v127_v4 = vunpack.c.l.bf16 %v118_v1  ;;  %v128_v5 = vunpack.c.l.bf16 %v119_v2  ;;  %vm125_vm2 = vcmp.le.s32.totalorder %v939_v13, %v937_v12 }
  0x10   : > { %v944_v14 = vadd.s32 8, %v937_v12  ;;  %v960_v33 = vcombine.high %v118_v1, %v119_v2 }
  0x11   : > { %137 = vrot.lane.b32.xlu0 %v737_v3, %s895_s12  ;;  %v129_v8 = vmul.f32 0.25, %v127_v4  ;;  %v130_v9 = vmul.f32 0.25, %v128_v5 }
  0x12   : > { %vm126_vm3 = vcmp.le.s32.totalorder %v939_v13, %v944_v14  ;;  %778 = vmatpush3.bf16.msra.mxu1 %v960_v33 }
  0x13   : > { %v131_v10 = vpack.c.bf16 %v130_v9, %v129_v8  ;;  %783 = vmatprep.subr.bf16.mxu1 %v893_v0 }
  0x83   : > { %v138_v6 = vpop.permute.xlu0 %137 }
  0x84   : > { %v144_v7 = vsel %vm139_vm1, %v138_v6, 0 }
  0x85   : > { %772 = vmatpush3.bf16.xpose.msra.mxu0 %v144_v7 }
  0x86   : > { %789 = vmatprep.subr.bf16.mxu0 %v893_v0 }
  0x8c   : > { %774 = vmatmul.mubr.msk.bf16.vlgmr.msra.gmra.mxu0 %vm139_vm1, %v131_v10 }
  0x8d   : > { %791 = vmatprep.mubr.msk.bf16.mxu0 %vm894_vm0, %v893_v0 }
 0x14c   : > { %v180_v15 = vpop.f32.mrf.mxu0 }
 0x14d   : > { %v187_v16 = vsel %vm125_vm2, %v180_v15, -1e+30 }
 0x14e   : > { %v775_v17 = vpop.f32.mrf.mxu0  ;;  %v189_v18 = vsel %vm139_vm1, %v187_v16, -inf }
 0x14f   : > { %190 = vmax.xlane.f32.xlu0 %v189_v18 }
 0x150   : > { %v183_v19 = vpop.f32.mrf.mxu0 }
 0x151   : > { %v188_v20 = vsel %vm126_vm3, %v183_v19, -1e+30 }
 0x152   : > { %v776_v21 = vpop.f32.mrf.mxu0  ;;  %v192_v22 = vsel %vm139_vm1, %v188_v20, -inf }
 0x153   : > { %193 = vmax.xlane.f32.xlu1 %v192_v22 }
 0x164   : > { %263 = vrot.lane.b32.xlu1 %v737_v3, %s896_s13 }
 0x165   : > { %384 = vrot.lane.b32.xlu0 %v131_v10, %s897_s14 }
 0x1d8   : > { %v191_v23 = vpop.xlane.xlu0 %190 }
 0x1d9   : > { %v195_v24 = vsub.f32 %v187_v16, %v191_v23 }
 0x1db   : > { %v197_v25 = vmul.f32 1.442695, %v195_v24 }
 0x1dc   : > { %v194_v26 = vpop.xlane.xlu1 %193  ;;  %v385_v47 = vpop.permute.xlu0 %384 }
 0x1dd   : > { %853 = vpow2.f32 %v197_v25  ;;  %v196_v27 = vsub.f32 %v188_v20, %v194_v26 }
 0x1df   : > { %v199_v28 = vmul.f32 1.442695, %v196_v27 }
 0x1e0   : > { %v264_v34 = vpop.permute.xlu1 %263 }
 0x1e1   : > { %855 = vpow2.f32 %v199_v28  ;;  %v269_v43 = vsel %vm139_vm1, %v264_v34, 0 }
 0x1ea   : > { %v854_v29 = vpop.eup %853 }
 0x1eb   : > { %v201_v30 = vsel %vm139_vm1, %v854_v29, 0.0 }
 0x1ec   : > { %202 = vadd.xlane.f32.xlu1 %v201_v30 }
 0x1ee   : > { %v856_v31 = vpop.eup %855 }
 0x1ef   : > { %v204_v32 = vsel %vm139_vm1, %v856_v31, 0.0 }
 0x1f0   : > { %205 = vadd.xlane.f32.xlu1 %v204_v32 }
 0x201   : > { %261 = vrot.lane.b32.xlu1 %v131_v10, %s898_s15 }
 0x205   : > { %386 = vrot.lane.b32.xlu1 %v737_v3, %s899_s16 }
 0x209   : > { %509 = vrot.lane.b32.xlu1 %v737_v3, %s900_s17 }
 0x20d   : > { %507 = vrot.lane.b32.xlu1 %v131_v10, %s901_s18 }
 0x275   : > { %v203_v35 = vpop.xlane.xlu1 %202 }
 0x276   : > { %857 = vrcp.f32 %v203_v35 }
 0x279   : > { %v206_v36 = vpop.xlane.xlu1 %205 }
 0x27a   : > { %859 = vrcp.f32 %v206_v36 }
 0x27d   : > { %v262_v41 = vpop.permute.xlu1 %261 }
 0x281   : > { %v387_v44 = vpop.permute.xlu1 %386 }
 0x282   : > { %v392_v45 = vsel %vm139_vm1, %v387_v44, 0 }
 0x283   : > { %v858_v37 = vpop.eup %857 }
 0x284   : > { %v209_v39 = vmul.f32 %v858_v37, %v854_v29 }
 0x285   : > { %v510_v46 = vpop.permute.xlu1 %509 }
 0x286   : > { %v515_v48 = vsel %vm139_vm1, %v510_v46, 0 }
 0x287   : > { %v860_v38 = vpop.eup %859 }
 0x288   : > { %v210_v40 = vmul.f32 %v860_v38, %v856_v31 }
 0x289   : > { %v508_v49 = vpop.permute.xlu1 %507 }
 0x28a   : > { %v211_v42 = vpack.c.bf16 %v210_v40, %v209_v39 }
 0x28c   : > { %780 = vmatmul.mubr.msk.bf16.vlgmr.msra.gmra.mxu1 %vm139_vm1, %v211_v42 }
 0x28d   : > { %784 = vmatpush3.bf16.xpose.msra.mxu1 %v269_v43  ;;  %785 = vmatprep.mubr.msk.bf16.mxu1 %vm894_vm0, %v893_v0 }
 0x28e   : > { %795 = vmatprep.subr.bf16.mxu1 %v893_v0 }
 0x294   : > { %786 = vmatmul.mubr.msk.bf16.vlgmr.msra.gmra.mxu1 %vm139_vm1, %v262_v41 }
 0x295   : > { %796 = vmatpush3.bf16.xpose.msra.mxu1 %v392_v45  ;;  %797 = vmatprep.mubr.msk.bf16.mxu1 %vm894_vm0, %v893_v0 }
 0x296   : > { %807 = vmatprep.subr.bf16.mxu1 %v893_v0 }
 0x29c   : > { %798 = vmatmul.mubr.msk.bf16.vlgmr.msra.gmra.mxu1 %vm139_vm1, %v385_v47 }
 0x29d   : > { %808 = vmatpush3.bf16.xpose.msra.mxu1 %v515_v48  ;;  %809 = vmatprep.mubr.msk.bf16.mxu1 %vm894_vm0, %v893_v0 }
 0x2a4   : > { %810 = vmatmul.mubr.msk.bf16.vlgmr.msra.gmra.mxu1 %vm139_vm1, %v508_v49 }
 0x34c   : > { %v983_v50 = vpop.f32.mrf.mxu1 }
 0x34e   : > { %v781_v51 = vpop.f32.mrf.mxu1 }
 0x350   : > { %v985_v52 = vpop.f32.mrf.mxu1 }
 0x352   : > { %v782_v53 = vpop.f32.mrf.mxu1 }
 0x354   : > { %v305_v54 = vpop.f32.mrf.mxu1 }
 0x355   : > { %v312_v55 = vsel %vm125_vm2, %v305_v54, -1e+30 }
 0x356   : > { %v787_v56 = vpop.f32.mrf.mxu1  ;;  %v314_v57 = vsel %vm139_vm1, %v312_v55, -inf }
 0x357   : > { %315 = vmax.xlane.f32.xlu1 %v314_v57 }
 0x358   : > { %v308_v58 = vpop.f32.mrf.mxu1 }
 0x359   : > { %v313_v59 = vsel %vm126_vm3, %v308_v58, -1e+30 }
 0x35a   : > { %v788_v60 = vpop.f32.mrf.mxu1  ;;  %v317_v61 = vsel %vm139_vm1, %v313_v59, -inf }
 0x35b   : > { %318 = vmax.xlane.f32.xlu0 %v317_v61 }
 0x35c   : > { %v428_v62 = vpop.f32.mrf.mxu1 }
 0x35d   : > { %v435_v63 = vsel %vm125_vm2, %v428_v62, -1e+30 }
 0x35e   : > { %v799_v1 = vpop.f32.mrf.mxu1  ;;  %v437_v2 = vsel %vm139_vm1, %v435_v63, -inf }
 0x35f   : > { %438 = vmax.xlane.f32.xlu1 %v437_v2 }
 0x360   : > { %v431_v3 = vpop.f32.mrf.mxu1 }
 0x361   : > { %v436_v4 = vsel %vm126_vm3, %v431_v3, -1e+30 }
 0x362   : > { %v800_v5 = vpop.f32.mrf.mxu1  ;;  %v440_v6 = vsel %vm139_vm1, %v436_v4, -inf }
 0x363   : > { %441 = vmax.xlane.f32.xlu1 %v440_v6 }
 0x364   : > { %v551_v7 = vpop.f32.mrf.mxu1 }
 0x365   : > { %v558_v8 = vsel %vm125_vm2, %v551_v7, -1e+30 }
 0x366   : > { %v811_v9 = vpop.f32.mrf.mxu1  ;;  %v560_v10 = vsel %vm139_vm1, %v558_v8, -inf }
 0x367   : > { %561 = vmax.xlane.f32.xlu0 %v560_v10 }
 0x368   : > { %v554_v11 = vpop.f32.mrf.mxu1 }
 0x369   : > { %v559_v15 = vsel %vm126_vm3, %v554_v11, -1e+30 }
 0x36a   : > { %v563_v16 = vsel %vm139_vm1, %v559_v15, -inf  ;;  %v812_v17 = vpop.f32.mrf.mxu1 }
 0x36b   : > { %564 = vmax.xlane.f32.xlu1 %v563_v16 }
 0x3e0   : > { %v316_v18 = vpop.xlane.xlu1 %315 }
 0x3e1   : > { %v320_v19 = vsub.f32 %v312_v55, %v316_v18 }
 0x3e3   : > { %v322_v20 = vmul.f32 1.442695, %v320_v19 }
 0x3e4   : > { %v319_v21 = vpop.xlane.xlu0 %318 }
 0x3e5   : > { %861 = vpow2.f32 %v322_v20  ;;  %v321_v12 = vsub.f32 %v313_v59, %v319_v21 }
 0x3e7   : > { %v324_v22 = vmul.f32 1.442695, %v321_v12 }
 0x3e8   : > { %v439_v23 = vpop.xlane.xlu1 %438 }
 0x3e9   : > { %863 = vpow2.f32 %v324_v22  ;;  %v443_v24 = vsub.f32 %v435_v63, %v439_v23 }
 0x3eb   : > { %v445_v25 = vmul.f32 1.442695, %v443_v24 }
 0x3ec   : > { %v442_v26 = vpop.xlane.xlu1 %441 }
 0x3ed   : > { %865 = vpow2.f32 %v445_v25  ;;  %v444_v27 = vsub.f32 %v436_v4, %v442_v26 }
 0x3ef   : > { %v447_v13 = vmul.f32 1.442695, %v444_v27 }
 0x3f0   : > { %v562_v14 = vpop.xlane.xlu0 %561 }
 0x3f1   : > { %867 = vpow2.f32 %v447_v13  ;;  %v566_v28 = vsub.f32 %v558_v8, %v562_v14 }
 0x3f2   : > { %v862_v29 = vpop.eup %861 }
 0x3f3   : > { %v568_v30 = vmul.f32 1.442695, %v566_v28  ;;  %v326_v31 = vsel %vm139_vm1, %v862_v29, 0.0 }
 0x3f4   : > { %327 = vadd.xlane.f32.xlu0 %v326_v31  ;;  %v565_v41 = vpop.xlane.xlu1 %564 }
 0x3f5   : > { %869 = vpow2.f32 %v568_v30  ;;  %v567_v42 = vsub.f32 %v559_v15, %v565_v41 }
 0x3f6   : > { %v864_v32 = vpop.eup %863 }
 0x3f7   : > { %v329_v34 = vsel %vm139_vm1, %v864_v32, 0.0  ;;  %v570_v43 = vmul.f32 1.442695, %v567_v42 }
 0x3f8   : > { %330 = vadd.xlane.f32.xlu1 %v329_v34 }
 0x3f9   : > { %871 = vpow2.f32 %v570_v43 }
 0x3fa   : > { %v866_v35 = vpop.eup %865 }
 0x3fb   : > { %v449_v36 = vsel %vm139_vm1, %v866_v35, 0.0 }
 0x3fc   : > { %450 = vadd.xlane.f32.xlu0 %v449_v36 }
 0x3fe   : > { %v868_v37 = vpop.eup %867 }
 0x3ff   : > { %v452_v38 = vsel %vm139_vm1, %v868_v37, 0.0 }
 0x400   : > { %453 = vadd.xlane.f32.xlu1 %v452_v38 }
 0x402   : > { %v870_v39 = vpop.eup %869 }
 0x403   : > { %v572_v40 = vsel %vm139_vm1, %v870_v39, 0.0 }
 0x404   : > { %573 = vadd.xlane.f32.xlu0 %v572_v40 }
 0x406   : > { %v872_v44 = vpop.eup %871 }
 0x407   : > { %v575_v45 = vsel %vm139_vm1, %v872_v44, 0.0 }
 0x411   : > { %460 = vrot.lane.b32.xlu1 %v960_v33, %s897_s14 }
 0x41a   : > { %337 = vrot.lane.b32.xlu0 %v960_v33, %s898_s15 }
 0x435   : > { %576 = vadd.xlane.f32.xlu1 %v575_v45 }
 0x446   : > { %583 = vrot.lane.b32.xlu1 %v960_v33, %s901_s18 }
 0x47d   : > { %v328_v46 = vpop.xlane.xlu0 %327 }
 0x47e   : > { %873 = vrcp.f32 %v328_v46 }
 0x481   : > { %v331_v47 = vpop.xlane.xlu1 %330 }
 0x482   : > { %875 = vrcp.f32 %v331_v47 }
 0x485   : > { %v451_v48 = vpop.xlane.xlu0 %450 }
 0x486   : > { %877 = vrcp.f32 %v451_v48 }
 0x489   : > { %v454_v49 = vpop.xlane.xlu1 %453 }
 0x48a   : > { %879 = vrcp.f32 %v454_v49 }
 0x48b   : > { %v874_v51 = vpop.eup %873 }
 0x48c   : > { %v334_v55 = vmul.f32 %v874_v51, %v862_v29 }
 0x48d   : > { %v574_v53 = vpop.xlane.xlu0 %573  ;;  %v461_v33 = vpop.permute.xlu1 %460 }
 0x48e   : > { %881 = vrcp.f32 %v574_v53 }
 0x48f   : > { %v876_v54 = vpop.eup %875 }
 0x490   : > { %v335_v56 = vmul.f32 %v876_v54, %v864_v32 }
 0x491   : > { %v338_v57 = vpop.permute.xlu0 %337 }
 0x492   : > { %790 = vmatpush3.bf16.msra.mxu0 %v338_v57  ;;  %v336_v58 = vpack.c.bf16 %v335_v56, %v334_v55 }
 0x493   : > { %801 = vmatprep.subr.bf16.mxu0 %v893_v0  ;;  %v878_v59 = vpop.eup %877 }
 0x494   : > { %v457_v61 = vmul.f32 %v878_v59, %v866_v35 }
 0x495   : > { %792 = vmatmul.mubr.msk.bf16.vlgmr.msra.gmra.mxu0 %vm139_vm1, %v336_v58 }
 0x496   : > { %802 = vmatpush3.bf16.msra.mxu0 %v461_v33  ;;  %803 = vmatprep.mubr.msk.bf16.mxu0 %vm894_vm0, %v893_v0 }
 0x497   : > { %v880_v60 = vpop.eup %879  ;;  %813 = vmatprep.subr.bf16.mxu0 %v893_v0 }
 0x498   : > { %v458_v62 = vmul.f32 %v880_v60, %v868_v37 }
 0x49a   : > { %v459_v63 = vpack.c.bf16 %v458_v62, %v457_v61 }
 0x49b   : > { %v882_v3 = vpop.eup %881 }
 0x49c   : > { %v580_v5 = vmul.f32 %v882_v3, %v870_v39 }
 0x49d   : > { %804 = vmatmul.mubr.msk.bf16.vlgmr.msra.gmra.mxu0 %vm139_vm1, %v459_v63 }
 0x49e   : > { %815 = vmatprep.mubr.msk.bf16.mxu0 %vm894_vm0, %v893_v0 }
 0x4be   : > { %v577_v1 = vpop.xlane.xlu1 %576 }
 0x4bf   : > { %883 = vrcp.f32 %v577_v1 }
 0x4c2   : > { %v584_v2 = vpop.permute.xlu1 %583 }
 0x4c3   : > { %814 = vmatpush3.bf16.msra.mxu0 %v584_v2 }
 0x4cc   : > { %v884_v4 = vpop.eup %883 }
 0x4cd   : > { %v581_v6 = vmul.f32 %v884_v4, %v872_v44 }
 0x4cf   : > { %v582_v7 = vpack.c.bf16 %v581_v6, %v580_v5 }
 0x4d1   : > { %816 = vmatmul.mubr.msk.bf16.vlgmr.msra.gmra.mxu0 %vm139_vm1, %v582_v7 }
 0x555   : > { %v377_v8 = vpop.f32.mrf.mxu0 }
 0x557   : > { %v793_v9 = vpop.f32.mrf.mxu0 }
 0x559   : > { %v380_v10 = vpop.f32.mrf.mxu0 }
 0x55a   : > { %v836_v11 = vpack.i.bf16 %v380_v10, %v377_v8 }
 0x55b   : > { %v794_v15 = vpop.f32.mrf.mxu0 }
 0x55c   : > { %837 = vrot.lane.b32.xlu0 %v836_v11, %s900_s17 }
 0x55d   : > { %v500_v0 = vpop.f32.mrf.mxu0 }
 0x55f   : > { %v805_v16 = vpop.f32.mrf.mxu0 }
 0x561   : > { %v503_v17 = vpop.f32.mrf.mxu0 }
 0x562   : > { %v841_v18 = vpack.i.bf16 %v503_v17, %v500_v0 }
 0x563   : > { %v806_v19 = vpop.f32.mrf.mxu0 }
 0x564   : > { %842 = vrot.lane.b32.xlu1 %v841_v18, %s899_s16 }
 0x591   : > { %v623_v20 = vpop.f32.mrf.mxu0 }
 0x593   : > { %v817_v21 = vpop.f32.mrf.mxu0 }
 0x595   : > { %v626_v12 = vpop.f32.mrf.mxu0 }
 0x596   : > { %v846_v22 = vpack.i.bf16 %v626_v12, %v623_v20 }
 0x597   : > { %v818_v23 = vpop.f32.mrf.mxu0 }
 0x598   : > { %847 = vrot.lane.b32.xlu0 %v846_v22, %s896_s13 }
 0x5ce   : > { %v838_v24 = vpop.permute.xlu0 %837 }
 0x5cf   : > { %v840_v26 = vunpack.i.h.bf16 %v838_v24  ;;  %v839_v27 = vunpack.i.l.bf16 %v838_v24 }
 0x5d1   : > { %v655_v29 = vsel %vm139_vm1, %v985_v52, %v840_v26  ;;  %v654_v30 = vsel %vm139_vm1, %v983_v50, %v839_v27 }
 0x5d6   : > { %v843_v25 = vpop.permute.xlu1 %842 }
 0x5d7   : > { %v845_v13 = vunpack.i.h.bf16 %v843_v25  ;;  %v844_v14 = vunpack.i.l.bf16 %v843_v25 }
 0x5d9   : > { %v658_v34 = vsel %vm656_vm4, %v655_v29, %v845_v13  ;;  %v657_v35 = vsel %vm656_vm4, %v654_v30, %v844_v14 }
 0x60a   : > { %v848_v28 = vpop.permute.xlu0 %847 }
 0x60b   : > { %v850_v31 = vunpack.i.h.bf16 %v848_v28  ;;  %v849_v32 = vunpack.i.l.bf16 %v848_v28 }
 0x60d   : > { %v661_v36 = vsel %vm659_vm5, %v658_v34, %v850_v31  ;;  %v660_v37 = vsel %vm659_vm5, %v657_v35, %v849_v32 }
 0x60e   : > { %v754_v38 = vpack.c.bf16 %v661_v36, %v661_v36  ;;  %v753_v39 = vpack.c.bf16 %v660_v37, %v660_v37 }
 0x610   : > { %672 = vst.msk [vmem:[%s116_s22 + $0x4] sm:$0xf] %vm670_vm6, %v754_v38  ;;  %671 = vst.msk [vmem:[%s116_s22] sm:$0xf] %vm670_vm6, %v753_v39 }
 0x611 PF: > { %s11_s6 = sadd.s32 1, %s891_s6  }
 0x612   : > { %p8_p4 = scmp.ge.s32.totalorder %s11_s6, 5  }
 0x614   :  { %10 = sbr.rel (!%p8_p4) target bundleno = 1 (0x1), region = 54 }

// kernel: _lambda_.40
= control target key start
LH: loop header
LB: loop body
LE: loop exit
PB: predicated region body
PF: predicated region fallthrough
CT: control target
= control target key end

     0   :  { %v279_v0 = vmov 0.0   ;;  %vm280_vm0 = vmmov 0   ;;  %vm78_vm1 = vcmask 523264   ;;  %vm187_vm2 = vcmask 519168   ;;  %s366_s1 = inlined_call_operand.vmem [shape: bf16[64,64], index: 1, kind: input, shape index: {}]   ;;  %s367_s0 = inlined_call_operand.vmem [shape: bf16[48,64], index: 0, kind: input, shape index: {}]   ;;  %s368_s3 = inlined_call_operand.vmem [shape: bf16[48,64], index: 3, kind: input, shape index: {}]   ;;  %s369_s2 = inlined_call_operand.vmem [shape: f32[1,64], index: 2, kind: input, shape index: {}]   ;;  %s370_s4 = inlined_call_operand.vmem [shape: bf16[48,64], index: 4, kind: output, shape index: {}]  }
   0x1   :  { %262 = vmatprep.subr.bf16.mxu1 %v279_v0  ;;  %v272_v1 = vld [vmem:[%s366_s1 + $0x18] sm:$0xff]   ;;  %242 = vmatprep.subr.bf16.mxu0 %v279_v0  ;;  %v273_v2 = vld [vmem:[%s366_s1 + $0x10] sm:$0xff]   ;;  %v274_v3 = vld [vmem:[%s366_s1 + $0x8] sm:$0xff]  }
   0x2   :  { %254 = vmatprep.mubr.msk.bf16.mxu1 %vm280_vm0, %v279_v0  ;;  %250 = vmatprep.mubr.msk.bf16.mxu0 %vm280_vm0, %v279_v0  ;;  %v275_v4 = vld [vmem:[%s366_s1] sm:$0xff]   ;;  %v276_v5 = vld [vmem:[%s367_s0 + $0x8] sm:$0xff]   ;;  %v278_v7 = vld [vmem:[%s367_s0 + $0x10] sm:$0xff]  }
   0x3   :  { %266 = vmatpush3.bf16.msra.mxu1 %v272_v1  ;;  %243 = vmatpush3.bf16.msra.mxu0 %v272_v1  ;;  %v277_v6 = vld [vmem:[%s367_s0] sm:$0xff]   ;;  %v233_v8 = vld [vmem:[%s368_s3 + $0x8] sm:$0xff]   ;;  %v234_v25 = vld [vmem:[%s368_s3 + $0x10] sm:$0xff]  }
   0x4   :  { %263 = vmatprep.subr.bf16.mxu1 %v279_v0  ;;  %244 = vmatprep.subr.bf16.mxu0 %v279_v0  ;;  %v222_v9 = vld [vmem:[%s368_s3] sm:$0xff]   ;;  %v227_v11 = vunpack.c.l.bf16 %v233_v8  ;;  %v228_v21 = vunpack.c.h.bf16 %v233_v8  ;;  %v231_v34 = vunpack.c.l.bf16 %v234_v25  ;;  %v232_v41 = vunpack.c.h.bf16 %v234_v25 }
   0x5   :  { %v198_v10 = vld [vmem:[%s369_s2] ss:$0 sm:$0xff]  ;;  %v223_v12 = vunpack.c.l.bf16 %v222_v9  ;;  %v224_v22 = vunpack.c.h.bf16 %v222_v9 }
   0x7   :  { %267 = vmatpush3.bf16.msra.mxu1 %v273_v2  ;;  %245 = vmatpush3.bf16.msra.mxu0 %v273_v2 }
   0x8   :  { %264 = vmatprep.subr.bf16.mxu1 %v279_v0  ;;  %246 = vmatprep.subr.bf16.mxu0 %v279_v0 }
   0xb   :  { %268 = vmatpush3.bf16.msra.mxu1 %v274_v3  ;;  %247 = vmatpush3.bf16.msra.mxu0 %v274_v3 }
   0xc   :  { %265 = vmatprep.subr.bf16.mxu1 %v279_v0  ;;  %248 = vmatprep.subr.bf16.mxu0 %v279_v0 }
   0xf   :  { %269 = vmatpush3.bf16.msra.mxu1 %v275_v4  ;;  %249 = vmatpush3.bf16.msra.mxu0 %v275_v4 }
  0x12   :  { %255 = vmatmul.mubr.msk.bf16.vlgmr.msra.gmra.mxu1 %vm78_vm1, %v276_v5  ;;  %251 = vmatmul.mubr.msk.bf16.vlgmr.msra.gmra.mxu0 %vm78_vm1, %v277_v6 }
  0x13   :  { %258 = vmatprep.mubr.msk.bf16.mxu1 %vm280_vm0, %v279_v0 }
  0x1a   :  { %259 = vmatmul.mubr.msk.bf16.gmra.mxu1 %vm78_vm1, %v278_v7 }
  0xd2   :  { %v130_v13 = vpop.f32.mrf.mxu1  ;;  %v122_v14 = vpop.f32.mrf.mxu0 }
  0xd3   :  { %v131_v15 = vadd.f32 %v198_v10, %v130_v13  ;;  %v123_v16 = vadd.f32 %v198_v10, %v122_v14 }
  0xd4   :  { %v256_v17 = vpop.f32.mrf.mxu1  ;;  %v252_v18 = vpop.f32.mrf.mxu0 }
  0xd5   :  { %v159_v19 = vadd.f32 %v227_v11, %v131_v15  ;;  %v157_v20 = vadd.f32 %v223_v12, %v123_v16 }
  0xd6   :  { %v133_v23 = vpop.f32.mrf.mxu1  ;;  %v125_v24 = vpop.f32.mrf.mxu0 }
  0xd7   :  { %v217_v26 = vpack.c.bf16 %v159_v19, %v159_v19  ;;  %v215_v27 = vpack.c.bf16 %v157_v20, %v157_v20  ;;  %v134_v28 = vadd.f32 %v198_v10, %v133_v23  ;;  %v126_v29 = vadd.f32 %v198_v10, %v125_v24 }
  0xd8   :  { %v257_v30 = vpop.f32.mrf.mxu1  ;;  %v253_v31 = vpop.f32.mrf.mxu0 }
  0xd9   :  { %190 = vst.msk [vmem:[%s370_s4 + $0x8] sm:$0xf] %vm187_vm2, %v217_v26  ;;  %188 = vst.msk [vmem:[%s370_s4] sm:$0xf] %vm187_vm2, %v215_v27  ;;  %v160_v32 = vadd.f32 %v228_v21, %v134_v28  ;;  %v158_v33 = vadd.f32 %v224_v22, %v126_v29 }
  0xda   :  { %v138_v35 = vpop.f32.mrf.mxu1 }
  0xdb   :  { %v218_v36 = vpack.c.bf16 %v160_v32, %v160_v32  ;;  %v216_v37 = vpack.c.bf16 %v158_v33, %v158_v33  ;;  %v139_v38 = vadd.f32 %v198_v10, %v138_v35 }
  0xdc   :  { %v260_v39 = vpop.f32.mrf.mxu1 }
  0xdd   :  { %191 = vst.msk [vmem:[%s370_s4 + $0xc] sm:$0xf] %vm187_vm2, %v218_v36  ;;  %189 = vst.msk [vmem:[%s370_s4 + $0x4] sm:$0xf] %vm187_vm2, %v216_v37  ;;  %v161_v40 = vadd.f32 %v231_v34, %v139_v38 }
  0xde   :  { %v141_v42 = vpop.f32.mrf.mxu1 }
  0xdf   :  { %v219_v43 = vpack.c.bf16 %v161_v40, %v161_v40  ;;  %v142_v44 = vadd.f32 %v198_v10, %v141_v42 }
  0xe0   :  { %v261_v45 = vpop.f32.mrf.mxu1 }
  0xe1   :  { %192 = vst.msk [vmem:[%s370_s4 + $0x10] sm:$0xf] %vm187_vm2, %v219_v43  ;;  %v162_v46 = vadd.f32 %v232_v41, %v142_v44 }
  0xe3   :  { %v220_v47 = vpack.c.bf16 %v162_v46, %v162_v46 }
  0xe5   :  { %193 = vst.msk [vmem:[%s370_s4 + $0x14] sm:$0xf] %vm187_vm2, %v220_v47 }

// kernel: _lambda_.41
= control target key start
LH: loop header
LB: loop body
LE: loop exit
PB: predicated region body
PF: predicated region fallthrough
CT: control target
= control target key end

     0   :  { %vm33_vm0 = vcmask 523264   ;;  %v548_v50 = vmov 0   ;;  %s735_s0 = inlined_call_operand.vmem [shape: bf16[48,64], index: 0, kind: input, shape index: {}]   ;;  %s736_s1 = inlined_call_operand.vmem [shape: bf16[64,256], index: 1, kind: input, shape index: {}]   ;;  %s737_s3 = inlined_call_operand.vmem [shape: f32[1,64], index: 3, kind: input, shape index: {}]   ;;  %s738_s4 = inlined_call_operand.vmem [shape: f32[1,64], index: 4, kind: input, shape index: {}]   ;;  %s739_s2 = inlined_call_operand.vmem [shape: f32[1,256], index: 2, kind: input, shape index: {}]   ;;  %s740_s5 = inlined_call_operand.vmem [shape: bf16[48,256], index: 5, kind: output, shape index: {}]  }
   0x1   :  { %v465_v0 = vld [vmem:[%s735_s0 + $0x8] sm:$0xff]   ;;  %v454_v1 = vld [vmem:[%s735_s0] sm:$0xff]   ;;  %v466_v5 = vld [vmem:[%s735_s0 + $0x10] sm:$0xff]   ;;  %253 = vmatprep.mubr.bf16.mxu1 %v548_v50  ;;  %243 = vmatprep.mubr.bf16.mxu0 %v548_v50 }
   0x2   :  { %v459_v2 = vunpack.c.l.bf16 %v465_v0  ;;  %v460_v3 = vunpack.c.h.bf16 %v465_v0  ;;  %v455_v4 = vunpack.c.l.bf16 %v454_v1  ;;  %v456_v6 = vunpack.c.h.bf16 %v454_v1  ;;  %v476_v45 = vld [vmem:[%s736_s1 + $0x34] ss:$8 sps:$4 sm:$0xff]   ;;  %v478_v46 = vld [vmem:[%s736_s1 + $0x30] ss:$8 sps:$4 sm:$0xff]   ;;  %v479_v47 = vld [vmem:[%s736_s1 + $0x24] ss:$8 sps:$4 sm:$0xff]  }
   0x3   :  { %v463_v10 = vunpack.c.l.bf16 %v466_v5  ;;  %v464_v12 = vunpack.c.h.bf16 %v466_v5  ;;  %467 = vmatprep.subr.bf16.mxu1 %v476_v45  ;;  %219 = vmatprep.subr.bf16.mxu0 %v476_v45  ;;  %v481_v48 = vld [vmem:[%s736_s1 + $0x20] ss:$8 sps:$4 sm:$0xff]   ;;  %v482_v49 = vld [vmem:[%s736_s1 + $0x14] ss:$8 sps:$4 sm:$0xff]   ;;  %v484_v51 = vld [vmem:[%s736_s1 + $0x10] ss:$8 sps:$4 sm:$0xff]  }
   0x4   :  { %v40_v7 = vsel %vm33_vm0, %v459_v2, 0.0  ;;  %v34_v8 = vsel %vm33_vm0, %v455_v4, 0.0  ;;  %v43_v9 = vsel %vm33_vm0, %v460_v3, 0.0  ;;  %v37_v11 = vsel %vm33_vm0, %v456_v6, 0.0  ;;  %471 = vmatpush1.bf16.msra.mxu1 %v478_v46  ;;  %220 = vmatpush1.bf16.msra.mxu0 %v478_v46  ;;  %v485_v52 = vld [vmem:[%s736_s1 + $0x4] ss:$8 sps:$4 sm:$0xff]  }
   0x5   :  { %41 = vadd.xlane.f32.xlu0 %v40_v7  ;;  %35 = vadd.xlane.f32.xlu1 %v34_v8  ;;  %v46_v13 = vsel %vm33_vm0, %v463_v10, 0.0  ;;  %v49_v14 = vsel %vm33_vm0, %v464_v12, 0.0  ;;  %v487_v53 = vld [vmem:[%s736_s1] ss:$8 sps:$4 sm:$0xff]  }
   0x6   :  { %468 = vmatprep.subr.bf16.mxu1 %v479_v47  ;;  %221 = vmatprep.subr.bf16.mxu0 %v479_v47 }
   0x8   :  { %472 = vmatpush1.bf16.msra.mxu1 %v481_v48  ;;  %222 = vmatpush1.bf16.msra.mxu0 %v481_v48 }
   0x9   :  { %44 = vadd.xlane.f32.xlu0 %v43_v9  ;;  %38 = vadd.xlane.f32.xlu1 %v37_v11 }
   0xa   :  { %469 = vmatprep.subr.bf16.mxu1 %v482_v49  ;;  %223 = vmatprep.subr.bf16.mxu0 %v482_v49 }
   0xc   :  { %473 = vmatpush1.bf16.msra.mxu1 %v484_v51  ;;  %224 = vmatpush1.bf16.msra.mxu0 %v484_v51 }
   0xd   :  { %47 = vadd.xlane.f32.xlu0 %v46_v13  ;;  %50 = vadd.xlane.f32.xlu1 %v49_v14 }
   0xe   :  { %470 = vmatprep.subr.bf16.mxu1 %v485_v52  ;;  %225 = vmatprep.subr.bf16.mxu0 %v485_v52 }
  0x10   :  { %474 = vmatpush1.bf16.msra.mxu1 %v487_v53  ;;  %226 = vmatpush1.bf16.msra.mxu0 %v487_v53 }
  0x8e   :  { %v42_v15 = vpop.xlane.xlu0 %41  ;;  %v36_v16 = vpop.xlane.xlu1 %35 }
  0x8f   :  { %v55_v17 = vmul.f32 0.015625, %v42_v15  ;;  %v53_v18 = vmul.f32 0.015625, %v36_v16  ;;  %v417_v16 = vld [vmem:[%s738_s4] ss:$0 sm:$0xff] }
  0x91   :  { %v594_v19 = vsub.f32 %v459_v2, %v55_v17  ;;  %v596_v20 = vsub.f32 %v455_v4, %v53_v18 }
  0x92   :  { %v45_v21 = vpop.xlane.xlu0 %44  ;;  %v39_v22 = vpop.xlane.xlu1 %38 }
  0x93   :  { %v56_v23 = vmul.f32 0.015625, %v45_v21  ;;  %v67_v24 = vmul.f32 %v594_v19, %v594_v19  ;;  %v54_v25 = vmul.f32 0.015625, %v39_v22  ;;  %v65_v26 = vmul.f32 %v596_v20, %v596_v20 }
  0x95   :  { %v602_v27 = vsub.f32 %v460_v3, %v56_v23  ;;  %v77_v28 = vsel %vm33_vm0, %v67_v24, 0.0  ;;  %v605_v29 = vsub.f32 %v456_v6, %v54_v25  ;;  %v71_v31 = vsel %vm33_vm0, %v65_v26, 0.0 }
  0x96   :  { %78 = vadd.xlane.f32.xlu0 %v77_v28  ;;  %v48_v30 = vpop.xlane.xlu0 %47  ;;  %v51_v32 = vpop.xlane.xlu1 %50 }
  0x97   :  { %v57_v33 = vmul.f32 0.015625, %v48_v30  ;;  %v68_v34 = vmul.f32 %v602_v27, %v602_v27  ;;  %v58_v35 = vmul.f32 0.015625, %v51_v32  ;;  %v66_v36 = vmul.f32 %v605_v29, %v605_v29 }
  0x99   :  { %v612_v37 = vsub.f32 %v463_v10, %v57_v33  ;;  %v80_v38 = vsel %vm33_vm0, %v68_v34, 0.0  ;;  %v615_v39 = vsub.f32 %v464_v12, %v58_v35  ;;  %v74_v41 = vsel %vm33_vm0, %v66_v36, 0.0  ;;  %v416_v10 = vld [vmem:[%s737_s3] ss:$0 sm:$0xff] }
  0x9a   :  { %81 = vadd.xlane.f32.xlu1 %v80_v38  ;;  %72 = vadd.xlane.f32.xlu0 %v71_v31 }
  0x9b   :  { %v69_v40 = vmul.f32 %v612_v37, %v612_v37  ;;  %v70_v42 = vmul.f32 %v615_v39, %v615_v39 }
  0x9d   :  { %v83_v43 = vsel %vm33_vm0, %v69_v40, 0.0  ;;  %v86_v44 = vsel %vm33_vm0, %v70_v42, 0.0 }
  0x9e   :  { %84 = vadd.xlane.f32.xlu0 %v83_v43  ;;  %75 = vadd.xlane.f32.xlu1 %v74_v41 }
  0xa2   :  { %87 = vadd.xlane.f32.xlu1 %v86_v44 }
 0x11f   :  { %v79_v54 = vpop.xlane.xlu0 %78 }
 0x120   :  { %v91_v55 = vmul.f32 0.015625, %v79_v54 }
 0x122   :  { %v97_v56 = vadd.f32 1e-05, %v91_v55 }
 0x123   :  { %v73_v57 = vpop.xlane.xlu0 %72  ;;  %v82_v58 = vpop.xlane.xlu1 %81 }
 0x124   :  { %488 = vrsqrt.f32 %v97_v56  ;;  %v89_v59 = vmul.f32 0.015625, %v73_v57  ;;  %v92_v60 = vmul.f32 0.015625, %v82_v58 }
 0x126   :  { %v95_v61 = vadd.f32 1e-05, %v89_v59  ;;  %v98_v62 = vadd.f32 1e-05, %v92_v60 }
 0x127   :  { %v85_v63 = vpop.xlane.xlu0 %84  ;;  %v76_v0 = vpop.xlane.xlu1 %75 }
 0x128   :  { %490 = vrsqrt.f32 %v95_v61  ;;  %v93_v1 = vmul.f32 0.015625, %v85_v63  ;;  %v90_v2 = vmul.f32 0.015625, %v76_v0 }
 0x129   :  { %492 = vrsqrt.f32 %v98_v62 }
 0x12a   :  { %v99_v3 = vadd.f32 1e-05, %v93_v1  ;;  %v96_v4 = vadd.f32 1e-05, %v90_v2 }
 0x12b   :  { %v88_v5 = vpop.xlane.xlu1 %87 }
 0x12c   :  { %494 = vrsqrt.f32 %v99_v3  ;;  %v94_v6 = vmul.f32 0.015625, %v88_v5 }
 0x12d   :  { %496 = vrsqrt.f32 %v96_v4 }
 0x12e   :  { %v100_v7 = vadd.f32 1e-05, %v94_v6 }
 0x130   :  { %498 = vrsqrt.f32 %v100_v7 }
 0x131   :  { %v489_v8 = vpop.eup %488 }
 0x132   :  { %v109_v9 = vmul.f32 %v489_v8, %v594_v19 }
 0x134   :  { %v122_v14 = vmul.f32 %v416_v10, %v109_v9 }
 0x135   :  { %v491_v11 = vpop.eup %490 }
 0x136   :  { %v493_v12 = vpop.eup %492  ;;  %v107_v15 = vmul.f32 %v491_v11, %v596_v20  ;;  %v135_v22 = vadd.f32 %v417_v16, %v122_v14 }
 0x137   :  { %v110_v13 = vmul.f32 %v493_v12, %v602_v27 }
 0x138   :  { %v120_v25 = vmul.f32 %v416_v10, %v107_v15 }
 0x139   :  { %v495_v17 = vpop.eup %494  ;;  %v123_v18 = vmul.f32 %v416_v10, %v110_v13 }
 0x13a   :  { %v497_v21 = vpop.eup %496  ;;  %v111_v19 = vmul.f32 %v495_v17, %v612_v37  ;;  %v133_v31 = vadd.f32 %v417_v16, %v120_v25  ;;  %v152_v37 = vlaneseq }
 0x13b   :  { %v136_v23 = vadd.f32 %v417_v16, %v123_v18  ;;  %v108_v24 = vmul.f32 %v497_v21, %v605_v29 }
 0x13c   :  { %v124_v20 = vmul.f32 %v416_v10, %v111_v19  ;;  %v153_v38 = vshrl.u32 %v152_v37, 7 }
 0x13d   :  { %v499_v26 = vpop.eup %498  ;;  %v140_v28 = vpack.c.bf16 %v136_v23, %v135_v22  ;;  %v121_v27 = vmul.f32 %v416_v10, %v108_v24 }
 0x13e   :  { %v112_v30 = vmul.f32 %v499_v26, %v615_v39  ;;  %v137_v35 = vadd.f32 %v417_v16, %v124_v20  ;;  %v154_v40 = vsub.s32 0, %v153_v38  ;;  %v150_v39 = vld [vmem:[%s739_s2] sm:$0x3]  ;;  %v158_v41 = vsub.s32 1, %v153_v38 }
 0x13f   :  { %427 = vmatmul.mubr.msk.bf16.vlgmr.msra.gmra.mxu1 %vm33_vm0, %v140_v28  ;;  %v134_v32 = vadd.f32 %v417_v16, %v121_v27 }
 0x140   :  { %263 = vmatprep.mubr.bf16.mxu1 %v548_v50  ;;  %v125_v33 = vmul.f32 %v416_v10, %v112_v30  ;;  %v155_v42 = vrot.slane %v150_v39, %v154_v40  ;;  %v159_v43 = vrot.slane %v150_v39, %v158_v41 }
 0x141   :  { %v139_v34 = vpack.c.bf16 %v134_v32, %v133_v31 }
 0x142   :  { %v138_v36 = vadd.f32 %v417_v16, %v125_v33 }
 0x143   :  { %426 = vmatmul.mubr.msk.bf16.vlgmr.msra.gmra.mxu0 %vm33_vm0, %v139_v34 }
 0x144   :  { %v141_v29 = vpack.c.bf16 %v138_v36, %v137_v35 }
 0x147   :  { %428 = vmatmul.mubr.msk.bf16.gmra.mxu1 %vm33_vm0, %v141_v29 }
 0x1ff   :  { %v255_v44 = vpop.f32.mrf.mxu1 }
 0x200   :  { %v669_v45 = vadd.f32 %v255_v44, %v155_v42 }
 0x201   :  { %v257_v46 = vpop.f32.mrf.mxu1 }
 0x202   :  { %v433_v47 = vmul.f32 -1.702, %v669_v45  ;;  %v672_v48 = vadd.f32 %v257_v46, %v159_v43 }
 0x203   :  { %v245_v49 = vpop.f32.mrf.mxu0  ;;  %v259_v50 = vpop.f32.mrf.mxu1 }
 0x204   :  { %v306_v51 = vmul.f32 1.442695, %v433_v47  ;;  %v434_v52 = vmul.f32 -1.702, %v672_v48  ;;  %v675_v53 = vadd.f32 %v245_v49, %v155_v42  ;;  %v677_v54 = vadd.f32 %v259_v50, %v155_v42 }
 0x205   :  { %v247_v55 = vpop.f32.mrf.mxu0  ;;  %v261_v56 = vpop.f32.mrf.mxu1 }
 0x206   :  { %500 = vpow2.f32 %v306_v51  ;;  %v308_v57 = vmul.f32 1.442695, %v434_v52  ;;  %v429_v58 = vmul.f32 -1.702, %v675_v53  ;;  %v435_v59 = vmul.f32 -1.702, %v677_v54 }
 0x207   :  { %v681_v60 = vadd.f32 %v247_v55, %v159_v43  ;;  %v683_v61 = vadd.f32 %v261_v56, %v159_v43  ;;  %v249_v62 = vpop.f32.mrf.mxu0  ;;  %v265_v63 = vpop.f32.mrf.mxu1 }
 0x208   :  { %502 = vpow2.f32 %v308_v57  ;;  %v298_v0 = vmul.f32 1.442695, %v429_v58  ;;  %v310_v1 = vmul.f32 1.442695, %v435_v59  ;;  %v685_v2 = vadd.f32 %v249_v62, %v155_v42 }
 0x209   :  { %v430_v3 = vmul.f32 -1.702, %v681_v60  ;;  %v436_v4 = vmul.f32 -1.702, %v683_v61  ;;  %v689_v5 = vadd.f32 %v265_v63, %v155_v42  ;;  %v251_v6 = vpop.f32.mrf.mxu0  ;;  %v267_v7 = vpop.f32.mrf.mxu1 }
 0x20a   :  { %504 = vpow2.f32 %v298_v0  ;;  %v431_v8 = vmul.f32 -1.702, %v685_v2  ;;  %v692_v9 = vadd.f32 %v251_v6, %v159_v43  ;;  %v694_v10 = vadd.f32 %v267_v7, %v159_v43 }
 0x20b   :  { %506 = vpow2.f32 %v310_v1  ;;  %v300_v11 = vmul.f32 1.442695, %v430_v3  ;;  %v312_v12 = vmul.f32 1.442695, %v436_v4  ;;  %v437_v13 = vmul.f32 -1.702, %v689_v5  ;;  %v269_v14 = vpop.f32.mrf.mxu1 }
 0x20c   :  { %v302_v15 = vmul.f32 1.442695, %v431_v8  ;;  %v432_v16 = vmul.f32 -1.702, %v692_v9  ;;  %v438_v17 = vmul.f32 -1.702, %v694_v10  ;;  %v699_v18 = vadd.f32 %v269_v14, %v155_v42 }
 0x20d   :  { %508 = vpow2.f32 %v300_v11  ;;  %v314_v21 = vmul.f32 1.442695, %v437_v13  ;;  %v271_v19 = vpop.f32.mrf.mxu1 }
 0x20e   :  { %510 = vpow2.f32 %v312_v12  ;;  %v304_v22 = vmul.f32 1.442695, %v432_v16  ;;  %v316_v23 = vmul.f32 1.442695, %v438_v17  ;;  %v439_v24 = vmul.f32 -1.702, %v699_v18 }
 0x20f   :  { %512 = vpow2.f32 %v302_v15  ;;  %v702_v25 = vadd.f32 %v271_v19, %v159_v43 }
 0x210   :  { %514 = vpow2.f32 %v314_v21  ;;  %v318_v26 = vmul.f32 1.442695, %v439_v24 }
 0x211   :  { %516 = vpow2.f32 %v304_v22  ;;  %v440_v28 = vmul.f32 -1.702, %v702_v25 }
 0x212   :  { %518 = vpow2.f32 %v316_v23 }
 0x213   :  { %v501_v27 = vpop.eup %500  ;;  %520 = vpow2.f32 %v318_v26  ;;  %v320_v30 = vmul.f32 1.442695, %v440_v28 }
 0x214   :  { %v326_v20 = vadd.f32 1.0, %v501_v27 }
 0x215   :  { %v503_v31 = vpop.eup %502  ;;  %522 = vpow2.f32 %v320_v30 }
 0x216   :  { %524 = vrcp.f32 %v326_v20  ;;  %v327_v32 = vadd.f32 1.0, %v503_v31 }
 0x217   :  { %v505_v33 = vpop.eup %504 }
 0x218   :  { %v507_v34 = vpop.eup %506  ;;  %526 = vrcp.f32 %v327_v32  ;;  %v322_v35 = vadd.f32 1.0, %v505_v33 }
 0x219   :  { %v328_v36 = vadd.f32 1.0, %v507_v34 }
 0x21a   :  { %v509_v29 = vpop.eup %508  ;;  %528 = vrcp.f32 %v322_v35 }
 0x21b   :  { %v511_v37 = vpop.eup %510  ;;  %v323_v38 = vadd.f32 1.0, %v509_v29  ;;  %530 = vrcp.f32 %v328_v36 }
 0x21c   :  { %v513_v40 = vpop.eup %512  ;;  %v329_v39 = vadd.f32 1.0, %v511_v37 }
 0x21d   :  { %v515_v41 = vpop.eup %514  ;;  %532 = vrcp.f32 %v323_v38  ;;  %v324_v42 = vadd.f32 1.0, %v513_v40 }
 0x21e   :  { %v517_v43 = vpop.eup %516  ;;  %534 = vrcp.f32 %v329_v39  ;;  %v330_v44 = vadd.f32 1.0, %v515_v41 }
 0x21f   :  { %v519_v46 = vpop.eup %518  ;;  %536 = vrcp.f32 %v324_v42  ;;  %v325_v47 = vadd.f32 1.0, %v517_v43 }
 0x220   :  { %v521_v49 = vpop.eup %520  ;;  %538 = vrcp.f32 %v330_v44  ;;  %v331_v50 = vadd.f32 1.0, %v519_v46 }
 0x221   :  { %540 = vrcp.f32 %v325_v47  ;;  %v332_v51 = vadd.f32 1.0, %v521_v49 }
 0x222   :  { %v523_v52 = vpop.eup %522  ;;  %542 = vrcp.f32 %v331_v50 }
 0x223   :  { %v525_v55 = vpop.eup %524  ;;  %544 = vrcp.f32 %v332_v51  ;;  %v333_v56 = vadd.f32 1.0, %v523_v52 }
 0x224   :  { %v362_v58 = vmul.f32 %v525_v55, %v669_v45 }
 0x225   :  { %v527_v57 = vpop.eup %526  ;;  %546 = vrcp.f32 %v333_v56 }
 0x226   :  { %v363_v59 = vmul.f32 %v527_v57, %v672_v48 }
 0x227   :  { %v529_v62 = vpop.eup %528 }
 0x228   :  { %v449_v63 = vpack.c.bf16 %v363_v59, %v362_v58  ;;  %v531_v0 = vpop.eup %530  ;;  %v358_v4 = vmul.f32 %v529_v62, %v675_v53 }
 0x229   :  { %v364_v8 = vmul.f32 %v531_v0, %v677_v54 }
 0x22a   :  { %v533_v1 = vpop.eup %532  ;;  %408 = vst [vmem:[%s740_s5 + $0x10] sm:$0xff] %v449_v63 }
 0x22b   :  { %v535_v3 = vpop.eup %534  ;;  %v359_v6 = vmul.f32 %v533_v1, %v681_v60 }
 0x22c   :  { %v537_v7 = vpop.eup %536  ;;  %v365_v45 = vmul.f32 %v535_v3, %v683_v61 }
 0x22d   :  { %v539_v11 = vpop.eup %538  ;;  %v447_v48 = vpack.c.bf16 %v359_v6, %v358_v4  ;;  %v360_v15 = vmul.f32 %v537_v7, %v685_v2 }
 0x22e   :  { %v541_v12 = vpop.eup %540  ;;  %v450_v13 = vpack.c.bf16 %v365_v45, %v364_v8  ;;  %v366_v54 = vmul.f32 %v539_v11, %v689_v5 }
 0x22f   :  { %v543_v14 = vpop.eup %542  ;;  %406 = vst [vmem:[%s740_s5] sm:$0xff] %v447_v48  ;;  %v361_v53 = vmul.f32 %v541_v12, %v692_v9 }
 0x230   :  { %v545_v16 = vpop.eup %544  ;;  %409 = vst [vmem:[%s740_s5 + $0x18] sm:$0xff] %v450_v13  ;;  %v367_v60 = vmul.f32 %v543_v14, %v694_v10 }
 0x231   :  { %v448_v61 = vpack.c.bf16 %v361_v53, %v360_v15  ;;  %v368_v2 = vmul.f32 %v545_v16, %v699_v18 }
 0x232   :  { %v547_v17 = vpop.eup %546  ;;  %v451_v21 = vpack.c.bf16 %v367_v60, %v366_v54 }
 0x233   :  { %407 = vst [vmem:[%s740_s5 + $0x8] sm:$0xff] %v448_v61  ;;  %v369_v9 = vmul.f32 %v547_v17, %v702_v25 }
 0x234   :  { %410 = vst [vmem:[%s740_s5 + $0x20] sm:$0xff] %v451_v21 }
 0x235   :  { %v452_v19 = vpack.c.bf16 %v369_v9, %v368_v2 }
 0x237   :  { %411 = vst [vmem:[%s740_s5 + $0x28] sm:$0xff] %v452_v19 }

// kernel: _lambda_.42
= control target key start
LH: loop header
LB: loop body
LE: loop exit
PB: predicated region body
PF: predicated region fallthrough
CT: control target
= control target key end

     0   :  { %vm288_vm0 = vcmask 519168   ;;  %s550_s1 = inlined_call_operand.vmem [shape: bf16[256,64], index: 1, kind: input, shape index: {}]   ;;  %s551_s0 = inlined_call_operand.vmem [shape: bf16[48,256], index: 0, kind: input, shape index: {}]   ;;  %s552_s3 = inlined_call_operand.vmem [shape: bf16[48,64], index: 3, kind: input, shape index: {}]   ;;  %s553_s2 = inlined_call_operand.vmem [shape: f32[1,64], index: 2, kind: input, shape index: {}]   ;;  %s554_s4 = inlined_call_operand.vmem [shape: bf16[48,64], index: 4, kind: output, shape index: {}]  }
   0x1   :  { %v398_v0 = vld [vmem:[%s550_s1 + $0x78] sm:$0xff]   ;;  %v400_v2 = vld [vmem:[%s550_s1 + $0x70] sm:$0xff]   ;;  %v402_v4 = vld [vmem:[%s550_s1 + $0x68] sm:$0xff]  }
   0x2   :  { %v399_v1 = vld [vmem:[%s550_s1 + $0x38] sm:$0xff]   ;;  %382 = vmatprep.subr.bf16.mxu1 %v398_v0  ;;  %348 = vmatprep.subr.bf16.mxu0 %v398_v0  ;;  %v401_v3 = vld [vmem:[%s550_s1 + $0x30] sm:$0xff]   ;;  %v403_v5 = vld [vmem:[%s550_s1 + $0x28] sm:$0xff]  }
   0x3   :  { %390 = vmatpush3.bf16.msra.mxu1 %v399_v1  ;;  %349 = vmatpush3.bf16.msra.mxu0 %v399_v1  ;;  %v404_v6 = vld [vmem:[%s550_s1 + $0x60] sm:$0xff]   ;;  %v406_v8 = vld [vmem:[%s550_s1 + $0x58] sm:$0xff]   ;;  %v408_v10 = vld [vmem:[%s550_s1 + $0x50] sm:$0xff]  }
   0x4   :  { %383 = vmatprep.subr.bf16.mxu1 %v400_v2  ;;  %350 = vmatprep.subr.bf16.mxu0 %v400_v2  ;;  %v405_v7 = vld [vmem:[%s550_s1 + $0x20] sm:$0xff]   ;;  %v407_v9 = vld [vmem:[%s550_s1 + $0x18] sm:$0xff]   ;;  %v409_v13 = vld [vmem:[%s550_s1 + $0x10] sm:$0xff]  }
   0x5   :  { %v416_v11 = vld [vmem:[%s551_s0 + $0x14] ss:$8 sps:$4 sm:$0xff]   ;;  %v419_v12 = vld [vmem:[%s551_s0 + $0x4] ss:$8 sps:$4 sm:$0xff]   ;;  %v414_v18 = vld [vmem:[%s551_s0 + $0x10] ss:$8 sps:$4 sm:$0xff]  }
   0x6   :  { %v410_v14 = vld [vmem:[%s550_s1 + $0x48] sm:$0xff]   ;;  %229 = vmatprep.mubr.bf16.mxu1 %v416_v11  ;;  %221 = vmatprep.mubr.bf16.mxu0 %v419_v12  ;;  %v412_v16 = vld [vmem:[%s550_s1 + $0x40] sm:$0xff]   ;;  %v347_v46 = vld [vmem:[%s552_s3 + $0x10] sm:$0xff]  }
   0x7   :  { %391 = vmatpush3.bf16.msra.mxu1 %v401_v3  ;;  %351 = vmatpush3.bf16.msra.mxu0 %v401_v3  ;;  %v411_v15 = vld [vmem:[%s550_s1 + $0x8] sm:$0xff]   ;;  %v413_v17 = vld [vmem:[%s550_s1] sm:$0xff]   ;;  %v344_v55 = vunpack.c.l.bf16 %v347_v46  ;;  %v345_v63 = vunpack.c.h.bf16 %v347_v46 }
   0x8   :  { %384 = vmatprep.subr.bf16.mxu1 %v402_v4  ;;  %352 = vmatprep.subr.bf16.mxu0 %v402_v4  ;;  %v417_v19 = vld [vmem:[%s551_s0] ss:$8 sps:$4 sm:$0xff]   ;;  %v420_v20 = vld [vmem:[%s551_s0 + $0x24] ss:$8 sps:$4 sm:$0xff]  }
   0x9   :  { %v422_v21 = vld [vmem:[%s551_s0 + $0x20] ss:$8 sps:$4 sm:$0xff]  }
   0xa   :  { %v346_v24 = vld [vmem:[%s552_s3 + $0x8] sm:$0xff]   ;;  %v335_v25 = vld [vmem:[%s552_s3] sm:$0xff]  }
   0xb   :  { %392 = vmatpush3.bf16.msra.mxu1 %v403_v5  ;;  %353 = vmatpush3.bf16.msra.mxu0 %v403_v5  ;;  %v299_v26 = vld [vmem:[%s553_s2] ss:$0 sm:$0xff]  ;;  %v340_v30 = vunpack.c.l.bf16 %v346_v24  ;;  %v336_v32 = vunpack.c.l.bf16 %v335_v25  ;;  %v341_v38 = vunpack.c.h.bf16 %v346_v24  ;;  %v337_v40 = vunpack.c.h.bf16 %v335_v25 }
   0xc   :  { %385 = vmatprep.subr.bf16.mxu1 %v404_v6  ;;  %354 = vmatprep.subr.bf16.mxu0 %v404_v6 }
   0xf   :  { %393 = vmatpush3.bf16.msra.mxu1 %v405_v7  ;;  %355 = vmatpush3.bf16.msra.mxu0 %v405_v7 }
  0x10   :  { %386 = vmatprep.subr.bf16.mxu1 %v406_v8  ;;  %356 = vmatprep.subr.bf16.mxu0 %v406_v8 }
  0x13   :  { %394 = vmatpush3.bf16.msra.mxu1 %v407_v9  ;;  %357 = vmatpush3.bf16.msra.mxu0 %v407_v9 }
  0x14   :  { %387 = vmatprep.subr.bf16.mxu1 %v408_v10  ;;  %358 = vmatprep.subr.bf16.mxu0 %v408_v10 }
  0x17   :  { %395 = vmatpush3.bf16.msra.mxu1 %v409_v13  ;;  %359 = vmatpush3.bf16.msra.mxu0 %v409_v13 }
  0x18   :  { %388 = vmatprep.subr.bf16.mxu1 %v410_v14  ;;  %360 = vmatprep.subr.bf16.mxu0 %v410_v14 }
  0x1b   :  { %396 = vmatpush3.bf16.msra.mxu1 %v411_v15  ;;  %361 = vmatpush3.bf16.msra.mxu0 %v411_v15 }
  0x1c   :  { %389 = vmatprep.subr.bf16.mxu1 %v412_v16  ;;  %362 = vmatprep.subr.bf16.mxu0 %v412_v16 }
  0x1f   :  { %397 = vmatpush3.bf16.msra.mxu1 %v413_v17  ;;  %363 = vmatpush3.bf16.msra.mxu0 %v413_v17 }
  0x22   :  { %230 = vmatmul.mubr.bf16.vlgmr.msra.gmra.mxu1 %v414_v18  ;;  %222 = vmatmul.mubr.bf16.vlgmr.msra.gmra.mxu0 %v417_v19 }
  0x23   :  { %237 = vmatprep.mubr.bf16.mxu1 %v420_v20 }
  0x2a   :  { %238 = vmatmul.mubr.bf16.gmra.mxu1 %v422_v21 }
  0xe2   :  { %v370_v22 = vpop.f32.mrf.mxu1  ;;  %v364_v23 = vpop.f32.mrf.mxu0 }
  0xe4   :  { %v371_v27 = vpop.f32.mrf.mxu1  ;;  %v365_v28 = vpop.f32.mrf.mxu0 }
  0xe5   :  { %v372_v29 = vadd.f32 %v371_v27, %v370_v22  ;;  %v366_v31 = vadd.f32 %v365_v28, %v364_v23 }
  0xe6   :  { %v373_v33 = vpop.f32.mrf.mxu1  ;;  %v367_v34 = vpop.f32.mrf.mxu0 }
  0xe7   :  { %v232_v35 = vadd.f32 %v372_v29, %v299_v26  ;;  %v224_v36 = vadd.f32 %v366_v31, %v299_v26 }
  0xe8   :  { %v374_v37 = vpop.f32.mrf.mxu1  ;;  %v368_v39 = vpop.f32.mrf.mxu0 }
  0xe9   :  { %v260_v41 = vadd.f32 %v340_v30, %v232_v35  ;;  %v258_v42 = vadd.f32 %v336_v32, %v224_v36  ;;  %v375_v43 = vadd.f32 %v374_v37, %v373_v33  ;;  %v369_v44 = vadd.f32 %v368_v39, %v367_v34 }
  0xea   :  { %v376_v45 = vpop.f32.mrf.mxu1 }
  0xeb   :  { %v330_v47 = vpack.c.bf16 %v260_v41, %v260_v41  ;;  %v328_v48 = vpack.c.bf16 %v258_v42, %v258_v42  ;;  %v235_v49 = vadd.f32 %v375_v43, %v299_v26  ;;  %v227_v50 = vadd.f32 %v369_v44, %v299_v26 }
  0xec   :  { %v377_v51 = vpop.f32.mrf.mxu1 }
  0xed   :  { %291 = vst.msk [vmem:[%s554_s4 + $0x8] sm:$0xf] %vm288_vm0, %v330_v47  ;;  %289 = vst.msk [vmem:[%s554_s4] sm:$0xf] %vm288_vm0, %v328_v48  ;;  %v261_v52 = vadd.f32 %v341_v38, %v235_v49  ;;  %v259_v53 = vadd.f32 %v337_v40, %v227_v50  ;;  %v378_v54 = vadd.f32 %v377_v51, %v376_v45 }
  0xee   :  { %v379_v56 = vpop.f32.mrf.mxu1 }
  0xef   :  { %v331_v57 = vpack.c.bf16 %v261_v52, %v261_v52  ;;  %v329_v58 = vpack.c.bf16 %v259_v53, %v259_v53  ;;  %v240_v59 = vadd.f32 %v378_v54, %v299_v26 }
  0xf0   :  { %v380_v60 = vpop.f32.mrf.mxu1 }
  0xf1   :  { %292 = vst.msk [vmem:[%s554_s4 + $0xc] sm:$0xf] %vm288_vm0, %v331_v57  ;;  %290 = vst.msk [vmem:[%s554_s4 + $0x4] sm:$0xf] %vm288_vm0, %v329_v58  ;;  %v262_v61 = vadd.f32 %v344_v55, %v240_v59  ;;  %v381_v62 = vadd.f32 %v380_v60, %v379_v56 }
  0xf3   :  { %v332_v0 = vpack.c.bf16 %v262_v61, %v262_v61  ;;  %v243_v1 = vadd.f32 %v381_v62, %v299_v26 }
  0xf5   :  { %293 = vst.msk [vmem:[%s554_s4 + $0x10] sm:$0xf] %vm288_vm0, %v332_v0  ;;  %v263_v2 = vadd.f32 %v345_v63, %v243_v1 }
  0xf7   :  { %v333_v3 = vpack.c.bf16 %v263_v2, %v263_v2 }
  0xf9   :  { %294 = vst.msk [vmem:[%s554_s4 + $0x14] sm:$0xf] %vm288_vm0, %v333_v3 }

// kernel: _lambda_.49
= control target key start
LH: loop header
LB: loop body
LE: loop exit
PB: predicated region body
PF: predicated region fallthrough
CT: control target
= control target key end

     0   :  { %s177_s0 = inlined_call_operand.vmem [shape: f32[2,64], index: 0, kind: input, shape index: {}]   ;;  %s178_s1 = inlined_call_operand.vmem [shape: f32[3,64], index: 1, kind: input, shape index: {}]   ;;  %s179_s2 = inlined_call_operand.<no memory space> [shape: f32[1,1], index: 2, kind: input, shape index: {}]   ;;  %s180_s3 = inlined_call_operand.hbm [shape: f32[2,3], index: 3, kind: output, shape index: {}]  }
   0x1   :  { %v8_v0 = vstv %s179_s2 }
   0x2   :  { %9 = vst [vmem:[#allocation2] sm:$0x1] %v8_v0 }
   0x3   :  { %v18_v1 = vld [vmem:[%s178_s1] sm:$0x7]  ;;  %vm20_vm0 = vcmask 518144  }
   0x4   :  { %10 = vsyncpa [#allocation4], 0  ;;  %v19_v2 = vmul.f32 %v18_v1, %v18_v1  ;;  %v142_v4 = vmov 0.0   ;;  %vm143_vm1 = vmmov 0   ;;  %vm29_vm2 = vcmask 523264   ;;  %s144_s18 = smov [#allocation3]  }
   0x5   :  { %103 = vmatprep.subr.bf16.mxu0 %v142_v4  ;;  %105 = vmatprep.mubr.msk.bf16.mxu0 %vm143_vm1, %v142_v4  ;;  %v26_v14 = vld [vmem:[%s177_s0] sm:$0x3]  ;;  %s92_s19 = sshll.u32 %s144_s18, 4  ;;  %vm84_vm3 = vcmask 17408   ;;  %s93_s19 = int_to_ptr.vmem [resolvable:$true] %s92_s19 }
   0x6   :  { %v21_v3 = vsel %vm20_vm0, %v19_v2, 0.0  ;;  %v27_v15 = vpack.c.bf16 %v26_v14, %v26_v14  ;;  %s120_s20 = scalar_lea.vmem %s93_s19, 32  ;;  %p125_p1 = scmp.lt.s32.totalorder %s93_s19, %s93_s19 }
   0x7   :  { %22 = vadd.xlane.f32.xlu0 %v21_v3  ;;  %p121_p0 = scmp.ne.s32.totalorder %s93_s19, %s120_s20  ;;  %p126_p2 = scmp.lt.s32.totalorder %s120_s20, %s120_s20 }
   0x9   :  { %v76_v5 = vld [vmem:[#allocation2] sm:$0x1]  ;;  %p127_p3 = por %p126_p2, %p125_p1 }
   0xa   :  { %109 = vpush %v76_v5 }
   0xb   :  { %p128_p4 = pnand %p127_p3, %p121_p0 }
  0x3b   :  { %s110_s16 = spop %109 }
  0x3c   :  { %v78_v6 = vstv %s110_s16 }
  0x3d   :  { %v79_v7 = vmul.f32 1.442695, %v78_v6 }
  0x3f   :  { %116 = vpow2.f32 %v79_v7 }
  0x4c   :  { %v117_v8 = vpop.eup %116 }
  0x4d   :  { %111 = vpush %v117_v8 }
  0x7e   :  { %s112_s17 = spop %111 }
  0x7f   :  { %v82_v16 = vstv %s112_s17 }
  0x90   :  { %v23_v9 = vpop.xlane.xlu0 %22 }
  0x91   :  { %118 = vrsqrt.f32 %v23_v9 }
  0x9e   :  { %v119_v10 = vpop.eup %118 }
  0x9f   :  { %v25_v11 = vmul.f32 %v119_v10, %v18_v1 }
  0xa1   :  { %v28_v12 = vpack.c.bf16 %v25_v11, %v25_v11 }
  0xa3   :  { %v34_v13 = vsel %vm29_vm2, %v28_v12, 0 }
  0xa4   :  { %104 = vmatpush3.bf16.xpose.msra.mxu0 %v34_v13 }
  0xab   :  { %106 = vmatmul.mubr.msk.bf16.vlgmr.msra.gmra.mxu0 %vm29_vm2, %v27_v15 }
 0x16b   :  { %v70_v17 = vpop.f32.mrf.mxu0 }
 0x16c   :  { %v83_v18 = vmul.f32 %v82_v16, %v70_v17 }
 0x16d   :  { %v107_v19 = vpop.f32.mrf.mxu0 }
 0x16e   :  { %85 = vst.msk [vmem:[#allocation3] sm:$0x3] %vm84_vm3, %v83_v18 }
 0x16f   :  { %v73_v20 = vpop.f32.mrf.mxu0 }
 0x170   :  { %131 = shalt.err (!%p128_p4)
}
 0x171   :  { %95 = dma.vmem_to_hbm [thread:$0]  %s93_s19, 32, %s180_s3, [#allocation4]   ;;  %v108_v21 = vpop.f32.mrf.mxu0 }
 0x172   :  { %140 = dma.done.wait [#allocation4], 32  }
 0x173   :  { %141 = vsyncadd [#allocation4], 4294967264 }
 0x174   :  { %99 = vsyncpa [#allocation4], 1 }

// kernel: _lambda_.48
= control target key start
LH: loop header
LB: loop body
LE: loop exit
PB: predicated region body
PF: predicated region fallthrough
CT: control target
= control target key end

     0   :  { %vm20_vm0 = vcmask 518144   ;;  %v165_v8 = vmov 0.0   ;;  %vm166_vm1 = vmmov 0   ;;  %vm84_vm2 = vcmask 523264   ;;  %s219_s0 = inlined_call_operand.vmem [shape: bf16[3,64], index: 0, kind: input, shape index: {}]   ;;  %s220_s1 = inlined_call_operand.vmem [shape: bf16[64,64], index: 1, kind: input, shape index: {}]   ;;  %s221_s2 = inlined_call_operand.vmem [shape: f32[1,64], index: 2, kind: input, shape index: {}]   ;;  %s222_s3 = inlined_call_operand.vmem [shape: f32[1,64], index: 3, kind: input, shape index: {}]   ;;  %s223_s4 = inlined_call_operand.vmem [shape: f32[3,64], index: 4, kind: output, shape index: {}]  }
   0x1   :  { %v18_v0 = vld [vmem:[%s219_s0] sm:$0x3]  ;;  %145 = vmatprep.subr.bf16.mxu0 %v165_v8  ;;  %v159_v9 = vld [vmem:[%s220_s1 + $0x18] sm:$0xff]   ;;  %153 = vmatprep.mubr.msk.bf16.mxu0 %vm166_vm1, %v165_v8  ;;  %v160_v10 = vld [vmem:[%s220_s1 + $0x10] sm:$0xff]  }
   0x2   :  { %v19_v1 = vunpack.c.l.bf16 %v18_v0  ;;  %146 = vmatpush3.bf16.msra.mxu0 %v159_v9  ;;  %v161_v11 = vld [vmem:[%s220_s1 + $0x8] sm:$0xff]   ;;  %v162_v12 = vld [vmem:[%s220_s1] sm:$0xff]  }
   0x3   :  { %147 = vmatprep.subr.bf16.mxu0 %v165_v8  ;;  %v133_v17 = vld [vmem:[%s221_s2] ss:$0 sm:$0xff] }
   0x4   :  { %v21_v2 = vsel %vm20_vm0, %v19_v1, 0.0  ;;  %v134_v19 = vld [vmem:[%s222_s3] ss:$0 sm:$0xff] }
   0x5   :  { %22 = vadd.xlane.f32.xlu0 %v21_v2 }
   0x6   :  { %148 = vmatpush3.bf16.msra.mxu0 %v160_v10 }
   0x7   :  { %149 = vmatprep.subr.bf16.mxu0 %v165_v8 }
   0xa   :  { %150 = vmatpush3.bf16.msra.mxu0 %v161_v11 }
   0xb   :  { %151 = vmatprep.subr.bf16.mxu0 %v165_v8 }
   0xe   :  { %152 = vmatpush3.bf16.msra.mxu0 %v162_v12 }
  0x8e   :  { %v23_v3 = vpop.xlane.xlu0 %22 }
  0x8f   :  { %v25_v4 = vmul.f32 0.015625, %v23_v3 }
  0x91   :  { %v26_v5 = vsub.f32 %v19_v1, %v25_v4 }
  0x93   :  { %v27_v6 = vmul.f32 %v26_v5, %v26_v5 }
  0x95   :  { %v28_v7 = vsel %vm20_vm0, %v27_v6, 0.0 }
  0x96   :  { %29 = vadd.xlane.f32.xlu0 %v28_v7 }
 0x11f   :  { %v30_v13 = vpop.xlane.xlu0 %29 }
 0x120   :  { %v31_v14 = vmul.f32 0.015625, %v30_v13 }
 0x122   :  { %v32_v15 = vadd.f32 1e-05, %v31_v14 }
 0x124   :  { %163 = vrsqrt.f32 %v32_v15 }
 0x131   :  { %v164_v16 = vpop.eup %163 }
 0x132   :  { %v34_v18 = vmul.f32 %v164_v16, %v26_v5 }
 0x134   :  { %v42_v20 = vmul.f32 %v133_v17, %v34_v18 }
 0x136   :  { %v50_v21 = vadd.f32 %v134_v19, %v42_v20 }
 0x138   :  { %v51_v22 = vpack.c.bf16 %v50_v21, %v50_v21 }
 0x13a   :  { %154 = vmatmul.mubr.msk.bf16.vlgmr.msra.gmra.mxu0 %vm84_vm2, %v51_v22 }
 0x1fa   :  { %v122_v23 = vpop.f32.mrf.mxu0 }
 0x1fb   :  { %128 = vst.msk [vmem:[%s223_s4] sm:$0x7] %vm20_vm0, %v122_v23 }
 0x1fc   :  { %v155_v24 = vpop.f32.mrf.mxu0 }
 0x1fe   :  { %v125_v25 = vpop.f32.mrf.mxu0 }
 0x200   :  { %v156_v26 = vpop.f32.mrf.mxu0 }

</bundles_post_ra>
